<compile_context>
chip_gen: v7x
topology: tpu7x:2x2x1
jax: 0.10.0
libtpu: 0.0.40
codegen_flags: <defaults>
</compile_context>

<pallas_src>
import functools

import jax
import jax.numpy as jnp
import numpy as np
from jax import lax
from jax.experimental import pallas as pl
from jax.experimental.pallas import tpu as pltpu


# ----------------------------------------------------------------------------
# Fused kernel: all GRU layers + fc(relu(last)) in one invocation (no grid).
# ----------------------------------------------------------------------------
def make_grunet_kernel(n_layers: int, T: int):
    """Positional ref layout:
       inputs : x (T,B,Din), h0 (L,B,H),
                per layer l: wih_r, wih_z, wih_n (D_l,H),
                             whh_r, whh_z, whh_n (H,H),
                             b_r (1,H), b_z (1,H), b_ni (1,H), b_nh (1,H)
                fc_w_t (H,O), fc_b (1,O)
       outputs: out (B,O), hN (L,B,H)
       scratch: seq (T,B,H), gi_r (T,B,H), gi_z (T,B,H), gi_n (T,B,H)
    """

    def kernel(*refs):
        x_ref, h0_ref = refs[0], refs[1]
        idx = 2
        layer_refs = []
        for _ in range(n_layers):
            layer_refs.append(refs[idx:idx + 10])
            idx += 10
        fc_w_ref, fc_b_ref = refs[idx], refs[idx + 1]
        out_ref, hN_ref = refs[idx + 2], refs[idx + 3]
        seq_scr, gir_scr, giz_scr, gin_scr = refs[idx + 4:idx + 8]

        B = h0_ref.shape[1]
        H = h0_ref.shape[2]

        for l in range(n_layers):
            (wir, wiz, win, whr, whz, whn, b_r, b_z, b_ni, b_nh) = layer_refs[l]
            is_last = (l == n_layers - 1)

            # ---- Hoisted input projection: one MXU matmul per gate over ALL
            #      T timesteps (removes half the matmul work from the serial path).
            if l == 0:
                Din = x_ref.shape[2]
                x_flat = x_ref[...].astype(jnp.float32).reshape(T * B, Din)
            else:
                x_flat = seq_scr[...].reshape(T * B, H)

            gir_scr[...] = (jnp.dot(x_flat, wir[...],
                                    preferred_element_type=jnp.float32)
                            + b_r[...]).reshape(T, B, H)
            giz_scr[...] = (jnp.dot(x_flat, wiz[...],
                                    preferred_element_type=jnp.float32)
                            + b_z[...]).reshape(T, B, H)
            gin_scr[...] = (jnp.dot(x_flat, win[...],
                                    preferred_element_type=jnp.float32)
                            + b_ni[...]).reshape(T, B, H)

            # Hoist weight loads out of the recurrence.
            whr_v = whr[...]
            whz_v = whz[...]
            whn_v = whn[...]
            b_nh_v = b_nh[...]

            # ---- Sequential recurrence: small per-gate hidden matmuls + gate math.
            def step(t, h):
                ghr = jnp.dot(h, whr_v, preferred_element_type=jnp.float32)
                ghz = jnp.dot(h, whz_v, preferred_element_type=jnp.float32)
                ghn = jnp.dot(h, whn_v, preferred_element_type=jnp.float32) + b_nh_v
                r = jax.nn.sigmoid(gir_scr[t] + ghr)
                z = jax.nn.sigmoid(giz_scr[t] + ghz)
                n = jnp.tanh(gin_scr[t] + r * ghn)
                h_new = (1.0 - z) * n + z * h
                if not is_last:
                    seq_scr[t] = h_new        # feeds the next layer (VMEM only)
                return h_new

            h_fin = lax.fori_loop(0, T, step, h0_ref[l].astype(jnp.float32),
                                  unroll=True)
            hN_ref[l] = h_fin.astype(hN_ref.dtype)

            # ---- fc(relu(out[:, -1])) fused into the same kernel.
            if is_last:
                x_last = jnp.maximum(h_fin, 0.0)
                out_ref[...] = (jnp.dot(x_last, fc_w_ref[...],
                                        preferred_element_type=jnp.float32)
                                + fc_b_ref[...]).astype(out_ref.dtype)

    return kernel


# ----------------------------------------------------------------------------
# One-time parameter preparation (transpose, per-gate split, bias pre-sum).
# ----------------------------------------------------------------------------
def prepare_params(params):
    layers = []
    for (w_ih, w_hh, b_ih, b_hh) in params["gru_layers"]:
        H = w_hh.shape[1]
        wih_t = jnp.transpose(w_ih)                 # (D, 3H), gate order [r,z,n]
        whh_t = jnp.transpose(w_hh)                 # (H, 3H)
        layers.append((
            wih_t[:, 0:H], wih_t[:, H:2 * H], wih_t[:, 2 * H:3 * H],   # W_i{r,z,n}
            whh_t[:, 0:H], whh_t[:, H:2 * H], whh_t[:, 2 * H:3 * H],   # W_h{r,z,n}
            (b_ih[0:H] + b_hh[0:H]).reshape(1, H),                      # b_ir + b_hr
            (b_ih[H:2 * H] + b_hh[H:2 * H]).reshape(1, H),              # b_iz + b_hz
            b_ih[2 * H:3 * H].reshape(1, H),                            # b_in
            b_hh[2 * H:3 * H].reshape(1, H),                            # b_hn
        ))
    return {
        "layers": layers,
        "fc_w_t": jnp.transpose(params["fc_w"]),    # (H, O)
        "fc_b": params["fc_b"].reshape(1, -1),      # (1, O)
    }


# ----------------------------------------------------------------------------
# Full GRUNet forward (single pallas_call)
# ----------------------------------------------------------------------------
def gru_net_forward(prep, x_btd, h0):
    """x_btd: (batch, seq, input_dim) (PyTorch batch_first).
       h0:    (n_layers, batch, hidden).
       Returns (out (batch, output_dim), h (n_layers, batch, hidden))."""
    B, T, _ = x_btd.shape
    L, _, H = h0.shape
    O = prep["fc_b"].shape[-1]

    x_tbd = jnp.transpose(x_btd, (1, 0, 2))         # time-major (T, B, Din)

    flat_args = [x_tbd, h0]
    for lw in prep["layers"]:
        flat_args.extend(lw)
    flat_args.extend([prep["fc_w_t"], prep["fc_b"]])

    # TODO(synk): for large batch on v7x, add a batch-parallel grid axis so the
    # second TensorCore is used; at B=8 a single invocation is optimal.
    out, hN = pl.pallas_call(
        make_grunet_kernel(L, T),
        out_shape=(jax.ShapeDtypeStruct((B, O), x_btd.dtype),
                   jax.ShapeDtypeStruct((L, B, H), h0.dtype)),
        scratch_shapes=[
            pltpu.VMEM((T, B, H), jnp.float32),     # inter-layer output sequence
            pltpu.VMEM((T, B, H), jnp.float32),     # hoisted gi_r
            pltpu.VMEM((T, B, H), jnp.float32),     # hoisted gi_z
            pltpu.VMEM((T, B, H), jnp.float32),     # hoisted gi_n
        ],
    )(*flat_args)
    return out, hN


# ----------------------------------------------------------------------------
# Pure-JAX reference (correctness check only)
# ----------------------------------------------------------------------------
def gru_net_reference(params, x_btd, h0):
    inp = x_btd
    hs = []
    for li, (w_ih, w_hh, b_ih, b_hh) in enumerate(params["gru_layers"]):
        H = w_hh.shape[1]

        def step(h, x_t, w_ih=w_ih, w_hh=w_hh, b_ih=b_ih, b_hh=b_hh, H=H):
            gi = x_t @ w_ih.T + b_ih
            gh = h @ w_hh.T + b_hh
            r = jax.nn.sigmoid(gi[:, :H] + gh[:, :H])
            z = jax.nn.sigmoid(gi[:, H:2 * H] + gh[:, H:2 * H])
            n = jnp.tanh(gi[:, 2 * H:] + r * gh[:, 2 * H:])
            h_new = (1.0 - z) * n + z * h
            return h_new, h_new

        h_fin, outs = jax.lax.scan(step, h0[li], jnp.transpose(inp, (1, 0, 2)))
        hs.append(h_fin)
        inp = jnp.transpose(outs, (1, 0, 2))
    out = jnp.maximum(inp[:, -1], 0.0) @ params["fc_w"].T + params["fc_b"]
    return out, jnp.stack(hs, axis=0)


# ----------------------------------------------------------------------------
# Deterministic parameter init (PyTorch-style uniform(-1/sqrt(H), 1/sqrt(H)))
# ----------------------------------------------------------------------------
def init_params(key, input_dim, hidden_dim, output_dim, n_layers):
    k = 1.0 / np.sqrt(hidden_dim)
    params = {"gru_layers": []}
    for layer in range(n_layers):
        in_dim = input_dim if layer == 0 else hidden_dim
        key, k1, k2, k3, k4 = jax.random.split(key, 5)
        w_ih = jax.random.uniform(k1, (3 * hidden_dim, in_dim), jnp.float32, -k, k)
        w_hh = jax.random.uniform(k2, (3 * hidden_dim, hidden_dim), jnp.float32, -k, k)
        b_ih = jax.random.uniform(k3, (3 * hidden_dim,), jnp.float32, -k, k)
        b_hh = jax.random.uniform(k4, (3 * hidden_dim,), jnp.float32, -k, k)
        params["gru_layers"].append((w_ih, w_hh, b_ih, b_hh))
    key, k1, k2 = jax.random.split(key, 3)
    kf = 1.0 / np.sqrt(hidden_dim)
    params["fc_w"] = jax.random.uniform(k1, (output_dim, hidden_dim), jnp.float32, -kf, kf)
    params["fc_b"] = jax.random.uniform(k2, (output_dim,), jnp.float32, -kf, kf)
    return params


if __name__ == "__main__":
    batch, seq, input_dim, hidden_dim, output_dim, n_layers = 8, 8, 16, 32, 4, 2

    key = jax.random.PRNGKey(0)
    key, kp, kx = jax.random.split(key, 3)
    params = init_params(kp, input_dim, hidden_dim, output_dim, n_layers)
    prep = prepare_params(params)

    x = jax.random.normal(kx, (batch, seq, input_dim), jnp.float32)
    h0 = jnp.zeros((n_layers, batch, hidden_dim), jnp.float32)   # init_hidden()

    fwd = jax.jit(gru_net_forward)
    out, h = fwd(prep, x, h0)
    out = jax.block_until_ready(out)
    h = jax.block_until_ready(h)

    # Correctness check against a pure-JAX reference of the same math.
    out_ref, h_ref = gru_net_reference(params, x, h0)
    np.testing.assert_allclose(np.asarray(out), np.asarray(out_ref), rtol=1e-5, atol=1e-5)
    np.testing.assert_allclose(np.asarray(h), np.asarray(h_ref), rtol=1e-5, atol=1e-5)

    assert out.shape == (batch, output_dim)
    assert h.shape == (n_layers, batch, hidden_dim)
    print("KERNEL_OK")
</pallas_src>

<mosaic_0001>
module attributes {stable_mosaic.version = 11 : i64} {
  func.func @kernel(%arg0: memref<8x8x16xf32, #tpu.memory_space<vmem>>, %arg1: memref<2x8x32xf32, #tpu.memory_space<vmem>>, %arg2: memref<16x32xf32, #tpu.memory_space<vmem>>, %arg3: memref<16x32xf32, #tpu.memory_space<vmem>>, %arg4: memref<16x32xf32, #tpu.memory_space<vmem>>, %arg5: memref<32x32xf32, #tpu.memory_space<vmem>>, %arg6: memref<32x32xf32, #tpu.memory_space<vmem>>, %arg7: memref<32x32xf32, #tpu.memory_space<vmem>>, %arg8: memref<1x32xf32, #tpu.memory_space<vmem>>, %arg9: memref<1x32xf32, #tpu.memory_space<vmem>>, %arg10: memref<1x32xf32, #tpu.memory_space<vmem>>, %arg11: memref<1x32xf32, #tpu.memory_space<vmem>>, %arg12: memref<32x32xf32, #tpu.memory_space<vmem>>, %arg13: memref<32x32xf32, #tpu.memory_space<vmem>>, %arg14: memref<32x32xf32, #tpu.memory_space<vmem>>, %arg15: memref<32x32xf32, #tpu.memory_space<vmem>>, %arg16: memref<32x32xf32, #tpu.memory_space<vmem>>, %arg17: memref<32x32xf32, #tpu.memory_space<vmem>>, %arg18: memref<1x32xf32, #tpu.memory_space<vmem>>, %arg19: memref<1x32xf32, #tpu.memory_space<vmem>>, %arg20: memref<1x32xf32, #tpu.memory_space<vmem>>, %arg21: memref<1x32xf32, #tpu.memory_space<vmem>>, %arg22: memref<32x4xf32, #tpu.memory_space<vmem>>, %arg23: memref<1x4xf32, #tpu.memory_space<vmem>>, %arg24: memref<8x4xf32, #tpu.memory_space<vmem>>, %arg25: memref<2x8x32xf32, #tpu.memory_space<vmem>>, %arg26: memref<8x8x32xf32, #tpu.memory_space<vmem>>, %arg27: memref<8x8x32xf32, #tpu.memory_space<vmem>>, %arg28: memref<8x8x32xf32, #tpu.memory_space<vmem>>, %arg29: memref<8x8x32xf32, #tpu.memory_space<vmem>>) attributes {dimension_semantics = [], scalar_prefetch = 0 : i64, scratch_operands = 4 : i64, tpu.core_type = #tpu.core_type<tc>} {
    %c0 = arith.constant 0 : index
    %c0_0 = arith.constant 0 : index
    %c0_1 = arith.constant 0 : index
    %0 = vector.load %arg0[%c0, %c0_0, %c0_1] : memref<8x8x16xf32, #tpu.memory_space<vmem>>, vector<8x8x16xf32>
    %1 = vector.shape_cast %0 : vector<8x8x16xf32> to vector<64x16xf32>
    %c0_2 = arith.constant 0 : index
    %c0_3 = arith.constant 0 : index
    %2 = vector.load %arg2[%c0_2, %c0_3] : memref<16x32xf32, #tpu.memory_space<vmem>>, vector<16x32xf32>
    %cst = arith.constant dense<0.000000e+00> : vector<64x32xf32>
    %3 = tpu.matmul %1, %2, %cst {dimension_numbers = #tpu.dot_dimension_numbers<[1], [0], [0], [1], [0, 0, 1, 1], [], []>} : vector<64x16xf32>, vector<16x32xf32>, vector<64x32xf32> -> vector<64x32xf32>
    %c0_4 = arith.constant 0 : index
    %c0_5 = arith.constant 0 : index
    %4 = vector.load %arg8[%c0_4, %c0_5] : memref<1x32xf32, #tpu.memory_space<vmem>>, vector<1x32xf32>
    %5 = vector.broadcast %4 : vector<1x32xf32> to vector<64x32xf32>
    %6 = arith.addf %3, %5 : vector<64x32xf32>
    %7 = vector.shape_cast %6 : vector<64x32xf32> to vector<8x8x32xf32>
    %c0_6 = arith.constant 0 : index
    %c0_7 = arith.constant 0 : index
    %c0_8 = arith.constant 0 : index
    %8 = vector.load %arg27[%c0_6, %c0_7, %c0_8] : memref<8x8x32xf32, #tpu.memory_space<vmem>>, vector<8x8x32xf32>
    tpu.vector_store %arg27[%c0_6, %c0_7, %c0_8], %7 {strides = array<i32>} : memref<8x8x32xf32, #tpu.memory_space<vmem>>, vector<8x8x32xf32>,
    %c0_9 = arith.constant 0 : index
    %c0_10 = arith.constant 0 : index
    %9 = vector.load %arg3[%c0_9, %c0_10] : memref<16x32xf32, #tpu.memory_space<vmem>>, vector<16x32xf32>
    %cst_11 = arith.constant dense<0.000000e+00> : vector<64x32xf32>
    %10 = tpu.matmul %1, %9, %cst_11 {dimension_numbers = #tpu.dot_dimension_numbers<[1], [0], [0], [1], [0, 0, 1, 1], [], []>} : vector<64x16xf32>, vector<16x32xf32>, vector<64x32xf32> -> vector<64x32xf32>
    %c0_12 = arith.constant 0 : index
    %c0_13 = arith.constant 0 : index
    %11 = vector.load %arg9[%c0_12, %c0_13] : memref<1x32xf32, #tpu.memory_space<vmem>>, vector<1x32xf32>
    %12 = vector.broadcast %11 : vector<1x32xf32> to vector<64x32xf32>
    %13 = arith.addf %10, %12 : vector<64x32xf32>
    %14 = vector.shape_cast %13 : vector<64x32xf32> to vector<8x8x32xf32>
    %c0_14 = arith.constant 0 : index
    %c0_15 = arith.constant 0 : index
    %c0_16 = arith.constant 0 : index
    %15 = vector.load %arg28[%c0_14, %c0_15, %c0_16] : memref<8x8x32xf32, #tpu.memory_space<vmem>>, vector<8x8x32xf32>
    tpu.vector_store %arg28[%c0_14, %c0_15, %c0_16], %14 {strides = array<i32>} : memref<8x8x32xf32, #tpu.memory_space<vmem>>, vector<8x8x32xf32>,
    %c0_17 = arith.constant 0 : index
    %c0_18 = arith.constant 0 : index
    %16 = vector.load %arg4[%c0_17, %c0_18] : memref<16x32xf32, #tpu.memory_space<vmem>>, vector<16x32xf32>
    %cst_19 = arith.constant dense<0.000000e+00> : vector<64x32xf32>
    %17 = tpu.matmul %1, %16, %cst_19 {dimension_numbers = #tpu.dot_dimension_numbers<[1], [0], [0], [1], [0, 0, 1, 1], [], []>} : vector<64x16xf32>, vector<16x32xf32>, vector<64x32xf32> -> vector<64x32xf32>
    %c0_20 = arith.constant 0 : index
    %c0_21 = arith.constant 0 : index
    %18 = vector.load %arg10[%c0_20, %c0_21] : memref<1x32xf32, #tpu.memory_space<vmem>>, vector<1x32xf32>
    %19 = vector.broadcast %18 : vector<1x32xf32> to vector<64x32xf32>
    %20 = arith.addf %17, %19 : vector<64x32xf32>
    %21 = vector.shape_cast %20 : vector<64x32xf32> to vector<8x8x32xf32>
    %c0_22 = arith.constant 0 : index
    %c0_23 = arith.constant 0 : index
    %c0_24 = arith.constant 0 : index
    %22 = vector.load %arg29[%c0_22, %c0_23, %c0_24] : memref<8x8x32xf32, #tpu.memory_space<vmem>>, vector<8x8x32xf32>
    tpu.vector_store %arg29[%c0_22, %c0_23, %c0_24], %21 {strides = array<i32>} : memref<8x8x32xf32, #tpu.memory_space<vmem>>, vector<8x8x32xf32>,
    %c0_25 = arith.constant 0 : index
    %c0_26 = arith.constant 0 : index
    %23 = vector.load %arg5[%c0_25, %c0_26] : memref<32x32xf32, #tpu.memory_space<vmem>>, vector<32x32xf32>
    %c0_27 = arith.constant 0 : index
    %c0_28 = arith.constant 0 : index
    %24 = vector.load %arg6[%c0_27, %c0_28] : memref<32x32xf32, #tpu.memory_space<vmem>>, vector<32x32xf32>
    %c0_29 = arith.constant 0 : index
    %c0_30 = arith.constant 0 : index
    %25 = vector.load %arg7[%c0_29, %c0_30] : memref<32x32xf32, #tpu.memory_space<vmem>>, vector<32x32xf32>
    %c0_31 = arith.constant 0 : index
    %c0_32 = arith.constant 0 : index
    %26 = vector.load %arg11[%c0_31, %c0_32] : memref<1x32xf32, #tpu.memory_space<vmem>>, vector<1x32xf32>
    %c0_33 = arith.constant 0 : index
    %c0_34 = arith.constant 0 : index
    %c0_35 = arith.constant 0 : index
    %27 = vector.load %arg1[%c0_33, %c0_34, %c0_35] : memref<2x8x32xf32, #tpu.memory_space<vmem>>, vector<1x8x32xf32>
    %28 = vector.shape_cast %27 : vector<1x8x32xf32> to vector<8x32xf32>
    %c0_i32 = arith.constant 0 : i32
    %cst_36 = arith.constant dense<0.000000e+00> : vector<8x32xf32>
    %29 = tpu.matmul %28, %23, %cst_36 {dimension_numbers = #tpu.dot_dimension_numbers<[1], [0], [0], [1], [0, 0, 1, 1], [], []>} : vector<8x32xf32>, vector<32x32xf32>, vector<8x32xf32> -> vector<8x32xf32>
    %cst_37 = arith.constant dense<0.000000e+00> : vector<8x32xf32>
    %30 = tpu.matmul %28, %24, %cst_37 {dimension_numbers = #tpu.dot_dimension_numbers<[1], [0], [0], [1], [0, 0, 1, 1], [], []>} : vector<8x32xf32>, vector<32x32xf32>, vector<8x32xf32> -> vector<8x32xf32>
    %cst_38 = arith.constant dense<0.000000e+00> : vector<8x32xf32>
    %31 = tpu.matmul %28, %25, %cst_38 {dimension_numbers = #tpu.dot_dimension_numbers<[1], [0], [0], [1], [0, 0, 1, 1], [], []>} : vector<8x32xf32>, vector<32x32xf32>, vector<8x32xf32> -> vector<8x32xf32>
    %32 = vector.broadcast %26 : vector<1x32xf32> to vector<8x32xf32>
    %33 = arith.addf %31, %32 : vector<8x32xf32>
    %34 = arith.index_cast %c0_i32 : i32 to index
    %c0_39 = arith.constant 0 : index
    %c0_40 = arith.constant 0 : index
    %35 = vector.load %arg27[%34, %c0_39, %c0_40] : memref<8x8x32xf32, #tpu.memory_space<vmem>>, vector<1x8x32xf32>
    %36 = vector.shape_cast %35 : vector<1x8x32xf32> to vector<8x32xf32>
    %37 = arith.addf %36, %29 : vector<8x32xf32>
    %38 = arith.negf %37 : vector<8x32xf32>
    %39 = math.exp %38 : vector<8x32xf32>
    %cst_41 = arith.constant 1.000000e+00 : f32
    %40 = vector.broadcast %cst_41 : f32 to vector<8x32xf32>
    %41 = arith.addf %40, %39 : vector<8x32xf32>
    %42 = arith.divf %40, %41 : vector<8x32xf32>
    %43 = arith.index_cast %c0_i32 : i32 to index
    %c0_42 = arith.constant 0 : index
    %c0_43 = arith.constant 0 : index
    %44 = vector.load %arg28[%43, %c0_42, %c0_43] : memref<8x8x32xf32, #tpu.memory_space<vmem>>, vector<1x8x32xf32>
    %45 = vector.shape_cast %44 : vector<1x8x32xf32> to vector<8x32xf32>
    %46 = arith.addf %45, %30 : vector<8x32xf32>
    %47 = arith.negf %46 : vector<8x32xf32>
    %48 = math.exp %47 : vector<8x32xf32>
    %cst_44 = arith.constant 1.000000e+00 : f32
    %49 = vector.broadcast %cst_44 : f32 to vector<8x32xf32>
    %50 = arith.addf %49, %48 : vector<8x32xf32>
    %51 = arith.divf %49, %50 : vector<8x32xf32>
    %52 = arith.index_cast %c0_i32 : i32 to index
    %c0_45 = arith.constant 0 : index
    %c0_46 = arith.constant 0 : index
    %53 = vector.load %arg29[%52, %c0_45, %c0_46] : memref<8x8x32xf32, #tpu.memory_space<vmem>>, vector<1x8x32xf32>
    %54 = vector.shape_cast %53 : vector<1x8x32xf32> to vector<8x32xf32>
    %55 = arith.mulf %42, %33 : vector<8x32xf32>
    %56 = arith.addf %54, %55 : vector<8x32xf32>
    %57 = math.tanh %56 : vector<8x32xf32>
    %cst_47 = arith.constant 1.000000e+00 : f32
    %58 = vector.broadcast %cst_47 : f32 to vector<8x32xf32>
    %59 = arith.subf %58, %51 : vector<8x32xf32>
    %60 = arith.mulf %59, %57 : vector<8x32xf32>
    %61 = arith.mulf %51, %28 : vector<8x32xf32>
    %62 = arith.addf %60, %61 : vector<8x32xf32>
    %63 = arith.index_cast %c0_i32 : i32 to index
    %c0_48 = arith.constant 0 : index
    %c0_49 = arith.constant 0 : index
    %64 = vector.load %arg26[%63, %c0_48, %c0_49] : memref<8x8x32xf32, #tpu.memory_space<vmem>>, vector<1x8x32xf32>
    %65 = vector.shape_cast %64 : vector<1x8x32xf32> to vector<8x32xf32>
    %66 = vector.shape_cast %62 : vector<8x32xf32> to vector<1x8x32xf32>
    tpu.vector_store %arg26[%63, %c0_48, %c0_49], %66 {strides = array<i32>} : memref<8x8x32xf32, #tpu.memory_space<vmem>>, vector<1x8x32xf32>,
    %c1_i32 = arith.constant 1 : i32
    %cst_50 = arith.constant dense<0.000000e+00> : vector<8x32xf32>
    %67 = tpu.matmul %62, %23, %cst_50 {dimension_numbers = #tpu.dot_dimension_numbers<[1], [0], [0], [1], [0, 0, 1, 1], [], []>} : vector<8x32xf32>, vector<32x32xf32>, vector<8x32xf32> -> vector<8x32xf32>
    %cst_51 = arith.constant dense<0.000000e+00> : vector<8x32xf32>
    %68 = tpu.matmul %62, %24, %cst_51 {dimension_numbers = #tpu.dot_dimension_numbers<[1], [0], [0], [1], [0, 0, 1, 1], [], []>} : vector<8x32xf32>, vector<32x32xf32>, vector<8x32xf32> -> vector<8x32xf32>
    %cst_52 = arith.constant dense<0.000000e+00> : vector<8x32xf32>
    %69 = tpu.matmul %62, %25, %cst_52 {dimension_numbers = #tpu.dot_dimension_numbers<[1], [0], [0], [1], [0, 0, 1, 1], [], []>} : vector<8x32xf32>, vector<32x32xf32>, vector<8x32xf32> -> vector<8x32xf32>
    %70 = vector.broadcast %26 : vector<1x32xf32> to vector<8x32xf32>
    %71 = arith.addf %69, %70 : vector<8x32xf32>
    %72 = arith.index_cast %c1_i32 : i32 to index
    %c0_53 = arith.constant 0 : index
    %c0_54 = arith.constant 0 : index
    %73 = vector.load %arg27[%72, %c0_53, %c0_54] : memref<8x8x32xf32, #tpu.memory_space<vmem>>, vector<1x8x32xf32>
    %74 = vector.shape_cast %73 : vector<1x8x32xf32> to vector<8x32xf32>
    %75 = arith.addf %74, %67 : vector<8x32xf32>
    %76 = arith.negf %75 : vector<8x32xf32>
    %77 = math.exp %76 : vector<8x32xf32>
    %cst_55 = arith.constant 1.000000e+00 : f32
    %78 = vector.broadcast %cst_55 : f32 to vector<8x32xf32>
    %79 = arith.addf %78, %77 : vector<8x32xf32>
    %80 = arith.divf %78, %79 : vector<8x32xf32>
    %81 = arith.index_cast %c1_i32 : i32 to index
    %c0_56 = arith.constant 0 : index
    %c0_57 = arith.constant 0 : index
    %82 = vector.load %arg28[%81, %c0_56, %c0_57] : memref<8x8x32xf32, #tpu.memory_space<vmem>>, vector<1x8x32xf32>
    %83 = vector.shape_cast %82 : vector<1x8x32xf32> to vector<8x32xf32>
    %84 = arith.addf %83, %68 : vector<8x32xf32>
    %85 = arith.negf %84 : vector<8x32xf32>
    %86 = math.exp %85 : vector<8x32xf32>
    %cst_58 = arith.constant 1.000000e+00 : f32
    %87 = vector.broadcast %cst_58 : f32 to vector<8x32xf32>
    %88 = arith.addf %87, %86 : vector<8x32xf32>
    %89 = arith.divf %87, %88 : vector<8x32xf32>
    %90 = arith.index_cast %c1_i32 : i32 to index
    %c0_59 = arith.constant 0 : index
    %c0_60 = arith.constant 0 : index
    %91 = vector.load %arg29[%90, %c0_59, %c0_60] : memref<8x8x32xf32, #tpu.memory_space<vmem>>, vector<1x8x32xf32>
    %92 = vector.shape_cast %91 : vector<1x8x32xf32> to vector<8x32xf32>
    %93 = arith.mulf %80, %71 : vector<8x32xf32>
    %94 = arith.addf %92, %93 : vector<8x32xf32>
    %95 = math.tanh %94 : vector<8x32xf32>
    %cst_61 = arith.constant 1.000000e+00 : f32
    %96 = vector.broadcast %cst_61 : f32 to vector<8x32xf32>
    %97 = arith.subf %96, %89 : vector<8x32xf32>
    %98 = arith.mulf %97, %95 : vector<8x32xf32>
    %99 = arith.mulf %89, %62 : vector<8x32xf32>
    %100 = arith.addf %98, %99 : vector<8x32xf32>
    %101 = arith.index_cast %c1_i32 : i32 to index
    %c0_62 = arith.constant 0 : index
    %c0_63 = arith.constant 0 : index
    %102 = vector.load %arg26[%101, %c0_62, %c0_63] : memref<8x8x32xf32, #tpu.memory_space<vmem>>, vector<1x8x32xf32>
    %103 = vector.shape_cast %102 : vector<1x8x32xf32> to vector<8x32xf32>
    %104 = vector.shape_cast %100 : vector<8x32xf32> to vector<1x8x32xf32>
    tpu.vector_store %arg26[%101, %c0_62, %c0_63], %104 {strides = array<i32>} : memref<8x8x32xf32, #tpu.memory_space<vmem>>, vector<1x8x32xf32>,
    %c2_i32 = arith.constant 2 : i32
    %cst_64 = arith.constant dense<0.000000e+00> : vector<8x32xf32>
    %105 = tpu.matmul %100, %23, %cst_64 {dimension_numbers = #tpu.dot_dimension_numbers<[1], [0], [0], [1], [0, 0, 1, 1], [], []>} : vector<8x32xf32>, vector<32x32xf32>, vector<8x32xf32> -> vector<8x32xf32>
    %cst_65 = arith.constant dense<0.000000e+00> : vector<8x32xf32>
    %106 = tpu.matmul %100, %24, %cst_65 {dimension_numbers = #tpu.dot_dimension_numbers<[1], [0], [0], [1], [0, 0, 1, 1], [], []>} : vector<8x32xf32>, vector<32x32xf32>, vector<8x32xf32> -> vector<8x32xf32>
    %cst_66 = arith.constant dense<0.000000e+00> : vector<8x32xf32>
    %107 = tpu.matmul %100, %25, %cst_66 {dimension_numbers = #tpu.dot_dimension_numbers<[1], [0], [0], [1], [0, 0, 1, 1], [], []>} : vector<8x32xf32>, vector<32x32xf32>, vector<8x32xf32> -> vector<8x32xf32>
    %108 = vector.broadcast %26 : vector<1x32xf32> to vector<8x32xf32>
    %109 = arith.addf %107, %108 : vector<8x32xf32>
    %110 = arith.index_cast %c2_i32 : i32 to index
    %c0_67 = arith.constant 0 : index
    %c0_68 = arith.constant 0 : index
    %111 = vector.load %arg27[%110, %c0_67, %c0_68] : memref<8x8x32xf32, #tpu.memory_space<vmem>>, vector<1x8x32xf32>
    %112 = vector.shape_cast %111 : vector<1x8x32xf32> to vector<8x32xf32>
    %113 = arith.addf %112, %105 : vector<8x32xf32>
    %114 = arith.negf %113 : vector<8x32xf32>
    %115 = math.exp %114 : vector<8x32xf32>
    %cst_69 = arith.constant 1.000000e+00 : f32
    %116 = vector.broadcast %cst_69 : f32 to vector<8x32xf32>
    %117 = arith.addf %116, %115 : vector<8x32xf32>
    %118 = arith.divf %116, %117 : vector<8x32xf32>
    %119 = arith.index_cast %c2_i32 : i32 to index
    %c0_70 = arith.constant 0 : index
    %c0_71 = arith.constant 0 : index
    %120 = vector.load %arg28[%119, %c0_70, %c0_71] : memref<8x8x32xf32, #tpu.memory_space<vmem>>, vector<1x8x32xf32>
    %121 = vector.shape_cast %120 : vector<1x8x32xf32> to vector<8x32xf32>
    %122 = arith.addf %121, %106 : vector<8x32xf32>
    %123 = arith.negf %122 : vector<8x32xf32>
    %124 = math.exp %123 : vector<8x32xf32>
    %cst_72 = arith.constant 1.000000e+00 : f32
    %125 = vector.broadcast %cst_72 : f32 to vector<8x32xf32>
    %126 = arith.addf %125, %124 : vector<8x32xf32>
    %127 = arith.divf %125, %126 : vector<8x32xf32>
    %128 = arith.index_cast %c2_i32 : i32 to index
    %c0_73 = arith.constant 0 : index
    %c0_74 = arith.constant 0 : index
    %129 = vector.load %arg29[%128, %c0_73, %c0_74] : memref<8x8x32xf32, #tpu.memory_space<vmem>>, vector<1x8x32xf32>
    %130 = vector.shape_cast %129 : vector<1x8x32xf32> to vector<8x32xf32>
    %131 = arith.mulf %118, %109 : vector<8x32xf32>
    %132 = arith.addf %130, %131 : vector<8x32xf32>
    %133 = math.tanh %132 : vector<8x32xf32>
    %cst_75 = arith.constant 1.000000e+00 : f32
    %134 = vector.broadcast %cst_75 : f32 to vector<8x32xf32>
    %135 = arith.subf %134, %127 : vector<8x32xf32>
    %136 = arith.mulf %135, %133 : vector<8x32xf32>
    %137 = arith.mulf %127, %100 : vector<8x32xf32>
    %138 = arith.addf %136, %137 : vector<8x32xf32>
    %139 = arith.index_cast %c2_i32 : i32 to index
    %c0_76 = arith.constant 0 : index
    %c0_77 = arith.constant 0 : index
    %140 = vector.load %arg26[%139, %c0_76, %c0_77] : memref<8x8x32xf32, #tpu.memory_space<vmem>>, vector<1x8x32xf32>
    %141 = vector.shape_cast %140 : vector<1x8x32xf32> to vector<8x32xf32>
    %142 = vector.shape_cast %138 : vector<8x32xf32> to vector<1x8x32xf32>
    tpu.vector_store %arg26[%139, %c0_76, %c0_77], %142 {strides = array<i32>} : memref<8x8x32xf32, #tpu.memory_space<vmem>>, vector<1x8x32xf32>,
    %c3_i32 = arith.constant 3 : i32
    %cst_78 = arith.constant dense<0.000000e+00> : vector<8x32xf32>
    %143 = tpu.matmul %138, %23, %cst_78 {dimension_numbers = #tpu.dot_dimension_numbers<[1], [0], [0], [1], [0, 0, 1, 1], [], []>} : vector<8x32xf32>, vector<32x32xf32>, vector<8x32xf32> -> vector<8x32xf32>
    %cst_79 = arith.constant dense<0.000000e+00> : vector<8x32xf32>
    %144 = tpu.matmul %138, %24, %cst_79 {dimension_numbers = #tpu.dot_dimension_numbers<[1], [0], [0], [1], [0, 0, 1, 1], [], []>} : vector<8x32xf32>, vector<32x32xf32>, vector<8x32xf32> -> vector<8x32xf32>
    %cst_80 = arith.constant dense<0.000000e+00> : vector<8x32xf32>
    %145 = tpu.matmul %138, %25, %cst_80 {dimension_numbers = #tpu.dot_dimension_numbers<[1], [0], [0], [1], [0, 0, 1, 1], [], []>} : vector<8x32xf32>, vector<32x32xf32>, vector<8x32xf32> -> vector<8x32xf32>
    %146 = vector.broadcast %26 : vector<1x32xf32> to vector<8x32xf32>
    %147 = arith.addf %145, %146 : vector<8x32xf32>
    %148 = arith.index_cast %c3_i32 : i32 to index
    %c0_81 = arith.constant 0 : index
    %c0_82 = arith.constant 0 : index
    %149 = vector.load %arg27[%148, %c0_81, %c0_82] : memref<8x8x32xf32, #tpu.memory_space<vmem>>, vector<1x8x32xf32>
    %150 = vector.shape_cast %149 : vector<1x8x32xf32> to vector<8x32xf32>
    %151 = arith.addf %150, %143 : vector<8x32xf32>
    %152 = arith.negf %151 : vector<8x32xf32>
    %153 = math.exp %152 : vector<8x32xf32>
    %cst_83 = arith.constant 1.000000e+00 : f32
    %154 = vector.broadcast %cst_83 : f32 to vector<8x32xf32>
    %155 = arith.addf %154, %153 : vector<8x32xf32>
    %156 = arith.divf %154, %155 : vector<8x32xf32>
    %157 = arith.index_cast %c3_i32 : i32 to index
    %c0_84 = arith.constant 0 : index
    %c0_85 = arith.constant 0 : index
    %158 = vector.load %arg28[%157, %c0_84, %c0_85] : memref<8x8x32xf32, #tpu.memory_space<vmem>>, vector<1x8x32xf32>
    %159 = vector.shape_cast %158 : vector<1x8x32xf32> to vector<8x32xf32>
    %160 = arith.addf %159, %144 : vector<8x32xf32>
    %161 = arith.negf %160 : vector<8x32xf32>
    %162 = math.exp %161 : vector<8x32xf32>
    %cst_86 = arith.constant 1.000000e+00 : f32
    %163 = vector.broadcast %cst_86 : f32 to vector<8x32xf32>
    %164 = arith.addf %163, %162 : vector<8x32xf32>
    %165 = arith.divf %163, %164 : vector<8x32xf32>
    %166 = arith.index_cast %c3_i32 : i32 to index
    %c0_87 = arith.constant 0 : index
    %c0_88 = arith.constant 0 : index
    %167 = vector.load %arg29[%166, %c0_87, %c0_88] : memref<8x8x32xf32, #tpu.memory_space<vmem>>, vector<1x8x32xf32>
    %168 = vector.shape_cast %167 : vector<1x8x32xf32> to vector<8x32xf32>
    %169 = arith.mulf %156, %147 : vector<8x32xf32>
    %170 = arith.addf %168, %169 : vector<8x32xf32>
    %171 = math.tanh %170 : vector<8x32xf32>
    %cst_89 = arith.constant 1.000000e+00 : f32
    %172 = vector.broadcast %cst_89 : f32 to vector<8x32xf32>
    %173 = arith.subf %172, %165 : vector<8x32xf32>
    %174 = arith.mulf %173, %171 : vector<8x32xf32>
    %175 = arith.mulf %165, %138 : vector<8x32xf32>
    %176 = arith.addf %174, %175 : vector<8x32xf32>
    %177 = arith.index_cast %c3_i32 : i32 to index
    %c0_90 = arith.constant 0 : index
    %c0_91 = arith.constant 0 : index
    %178 = vector.load %arg26[%177, %c0_90, %c0_91] : memref<8x8x32xf32, #tpu.memory_space<vmem>>, vector<1x8x32xf32>
    %179 = vector.shape_cast %178 : vector<1x8x32xf32> to vector<8x32xf32>
    %180 = vector.shape_cast %176 : vector<8x32xf32> to vector<1x8x32xf32>
    tpu.vector_store %arg26[%177, %c0_90, %c0_91], %180 {strides = array<i32>} : memref<8x8x32xf32, #tpu.memory_space<vmem>>, vector<1x8x32xf32>,
    %c4_i32 = arith.constant 4 : i32
    %cst_92 = arith.constant dense<0.000000e+00> : vector<8x32xf32>
    %181 = tpu.matmul %176, %23, %cst_92 {dimension_numbers = #tpu.dot_dimension_numbers<[1], [0], [0], [1], [0, 0, 1, 1], [], []>} : vector<8x32xf32>, vector<32x32xf32>, vector<8x32xf32> -> vector<8x32xf32>
    %cst_93 = arith.constant dense<0.000000e+00> : vector<8x32xf32>
    %182 = tpu.matmul %176, %24, %cst_93 {dimension_numbers = #tpu.dot_dimension_numbers<[1], [0], [0], [1], [0, 0, 1, 1], [], []>} : vector<8x32xf32>, vector<32x32xf32>, vector<8x32xf32> -> vector<8x32xf32>
    %cst_94 = arith.constant dense<0.000000e+00> : vector<8x32xf32>
    %183 = tpu.matmul %176, %25, %cst_94 {dimension_numbers = #tpu.dot_dimension_numbers<[1], [0], [0], [1], [0, 0, 1, 1], [], []>} : vector<8x32xf32>, vector<32x32xf32>, vector<8x32xf32> -> vector<8x32xf32>
    %184 = vector.broadcast %26 : vector<1x32xf32> to vector<8x32xf32>
    %185 = arith.addf %183, %184 : vector<8x32xf32>
    %186 = arith.index_cast %c4_i32 : i32 to index
    %c0_95 = arith.constant 0 : index
    %c0_96 = arith.constant 0 : index
    %187 = vector.load %arg27[%186, %c0_95, %c0_96] : memref<8x8x32xf32, #tpu.memory_space<vmem>>, vector<1x8x32xf32>
    %188 = vector.shape_cast %187 : vector<1x8x32xf32> to vector<8x32xf32>
    %189 = arith.addf %188, %181 : vector<8x32xf32>
    %190 = arith.negf %189 : vector<8x32xf32>
    %191 = math.exp %190 : vector<8x32xf32>
    %cst_97 = arith.constant 1.000000e+00 : f32
    %192 = vector.broadcast %cst_97 : f32 to vector<8x32xf32>
    %193 = arith.addf %192, %191 : vector<8x32xf32>
    %194 = arith.divf %192, %193 : vector<8x32xf32>
    %195 = arith.index_cast %c4_i32 : i32 to index
    %c0_98 = arith.constant 0 : index
    %c0_99 = arith.constant 0 : index
    %196 = vector.load %arg28[%195, %c0_98, %c0_99] : memref<8x8x32xf32, #tpu.memory_space<vmem>>, vector<1x8x32xf32>
    %197 = vector.shape_cast %196 : vector<1x8x32xf32> to vector<8x32xf32>
    %198 = arith.addf %197, %182 : vector<8x32xf32>
    %199 = arith.negf %198 : vector<8x32xf32>
    %200 = math.exp %199 : vector<8x32xf32>
    %cst_100 = arith.constant 1.000000e+00 : f32
    %201 = vector.broadcast %cst_100 : f32 to vector<8x32xf32>
    %202 = arith.addf %201, %200 : vector<8x32xf32>
    %203 = arith.divf %201, %202 : vector<8x32xf32>
    %204 = arith.index_cast %c4_i32 : i32 to index
    %c0_101 = arith.constant 0 : index
    %c0_102 = arith.constant 0 : index
    %205 = vector.load %arg29[%204, %c0_101, %c0_102] : memref<8x8x32xf32, #tpu.memory_space<vmem>>, vector<1x8x32xf32>
    %206 = vector.shape_cast %205 : vector<1x8x32xf32> to vector<8x32xf32>
    %207 = arith.mulf %194, %185 : vector<8x32xf32>
    %208 = arith.addf %206, %207 : vector<8x32xf32>
    %209 = math.tanh %208 : vector<8x32xf32>
    %cst_103 = arith.constant 1.000000e+00 : f32
    %210 = vector.broadcast %cst_103 : f32 to vector<8x32xf32>
    %211 = arith.subf %210, %203 : vector<8x32xf32>
    %212 = arith.mulf %211, %209 : vector<8x32xf32>
    %213 = arith.mulf %203, %176 : vector<8x32xf32>
    %214 = arith.addf %212, %213 : vector<8x32xf32>
    %215 = arith.index_cast %c4_i32 : i32 to index
    %c0_104 = arith.constant 0 : index
    %c0_105 = arith.constant 0 : index
    %216 = vector.load %arg26[%215, %c0_104, %c0_105] : memref<8x8x32xf32, #tpu.memory_space<vmem>>, vector<1x8x32xf32>
    %217 = vector.shape_cast %216 : vector<1x8x32xf32> to vector<8x32xf32>
    %218 = vector.shape_cast %214 : vector<8x32xf32> to vector<1x8x32xf32>
    tpu.vector_store %arg26[%215, %c0_104, %c0_105], %218 {strides = array<i32>} : memref<8x8x32xf32, #tpu.memory_space<vmem>>, vector<1x8x32xf32>,
    %c5_i32 = arith.constant 5 : i32
    %cst_106 = arith.constant dense<0.000000e+00> : vector<8x32xf32>
    %219 = tpu.matmul %214, %23, %cst_106 {dimension_numbers = #tpu.dot_dimension_numbers<[1], [0], [0], [1], [0, 0, 1, 1], [], []>} : vector<8x32xf32>, vector<32x32xf32>, vector<8x32xf32> -> vector<8x32xf32>
    %cst_107 = arith.constant dense<0.000000e+00> : vector<8x32xf32>
    %220 = tpu.matmul %214, %24, %cst_107 {dimension_numbers = #tpu.dot_dimension_numbers<[1], [0], [0], [1], [0, 0, 1, 1], [], []>} : vector<8x32xf32>, vector<32x32xf32>, vector<8x32xf32> -> vector<8x32xf32>
    %cst_108 = arith.constant dense<0.000000e+00> : vector<8x32xf32>
    %221 = tpu.matmul %214, %25, %cst_108 {dimension_numbers = #tpu.dot_dimension_numbers<[1], [0], [0], [1], [0, 0, 1, 1], [], []>} : vector<8x32xf32>, vector<32x32xf32>, vector<8x32xf32> -> vector<8x32xf32>
    %222 = vector.broadcast %26 : vector<1x32xf32> to vector<8x32xf32>
    %223 = arith.addf %221, %222 : vector<8x32xf32>
    %224 = arith.index_cast %c5_i32 : i32 to index
    %c0_109 = arith.constant 0 : index
    %c0_110 = arith.constant 0 : index
    %225 = vector.load %arg27[%224, %c0_109, %c0_110] : memref<8x8x32xf32, #tpu.memory_space<vmem>>, vector<1x8x32xf32>
    %226 = vector.shape_cast %225 : vector<1x8x32xf32> to vector<8x32xf32>
    %227 = arith.addf %226, %219 : vector<8x32xf32>
    %228 = arith.negf %227 : vector<8x32xf32>
    %229 = math.exp %228 : vector<8x32xf32>
    %cst_111 = arith.constant 1.000000e+00 : f32
    %230 = vector.broadcast %cst_111 : f32 to vector<8x32xf32>
    %231 = arith.addf %230, %229 : vector<8x32xf32>
    %232 = arith.divf %230, %231 : vector<8x32xf32>
    %233 = arith.index_cast %c5_i32 : i32 to index
    %c0_112 = arith.constant 0 : index
    %c0_113 = arith.constant 0 : index
    %234 = vector.load %arg28[%233, %c0_112, %c0_113] : memref<8x8x32xf32, #tpu.memory_space<vmem>>, vector<1x8x32xf32>
    %235 = vector.shape_cast %234 : vector<1x8x32xf32> to vector<8x32xf32>
    %236 = arith.addf %235, %220 : vector<8x32xf32>
    %237 = arith.negf %236 : vector<8x32xf32>
    %238 = math.exp %237 : vector<8x32xf32>
    %cst_114 = arith.constant 1.000000e+00 : f32
    %239 = vector.broadcast %cst_114 : f32 to vector<8x32xf32>
    %240 = arith.addf %239, %238 : vector<8x32xf32>
    %241 = arith.divf %239, %240 : vector<8x32xf32>
    %242 = arith.index_cast %c5_i32 : i32 to index
    %c0_115 = arith.constant 0 : index
    %c0_116 = arith.constant 0 : index
    %243 = vector.load %arg29[%242, %c0_115, %c0_116] : memref<8x8x32xf32, #tpu.memory_space<vmem>>, vector<1x8x32xf32>
    %244 = vector.shape_cast %243 : vector<1x8x32xf32> to vector<8x32xf32>
    %245 = arith.mulf %232, %223 : vector<8x32xf32>
    %246 = arith.addf %244, %245 : vector<8x32xf32>
    %247 = math.tanh %246 : vector<8x32xf32>
    %cst_117 = arith.constant 1.000000e+00 : f32
    %248 = vector.broadcast %cst_117 : f32 to vector<8x32xf32>
    %249 = arith.subf %248, %241 : vector<8x32xf32>
    %250 = arith.mulf %249, %247 : vector<8x32xf32>
    %251 = arith.mulf %241, %214 : vector<8x32xf32>
    %252 = arith.addf %250, %251 : vector<8x32xf32>
    %253 = arith.index_cast %c5_i32 : i32 to index
    %c0_118 = arith.constant 0 : index
    %c0_119 = arith.constant 0 : index
    %254 = vector.load %arg26[%253, %c0_118, %c0_119] : memref<8x8x32xf32, #tpu.memory_space<vmem>>, vector<1x8x32xf32>
    %255 = vector.shape_cast %254 : vector<1x8x32xf32> to vector<8x32xf32>
    %256 = vector.shape_cast %252 : vector<8x32xf32> to vector<1x8x32xf32>
    tpu.vector_store %arg26[%253, %c0_118, %c0_119], %256 {strides = array<i32>} : memref<8x8x32xf32, #tpu.memory_space<vmem>>, vector<1x8x32xf32>,
    %c6_i32 = arith.constant 6 : i32
    %cst_120 = arith.constant dense<0.000000e+00> : vector<8x32xf32>
    %257 = tpu.matmul %252, %23, %cst_120 {dimension_numbers = #tpu.dot_dimension_numbers<[1], [0], [0], [1], [0, 0, 1, 1], [], []>} : vector<8x32xf32>, vector<32x32xf32>, vector<8x32xf32> -> vector<8x32xf32>
    %cst_121 = arith.constant dense<0.000000e+00> : vector<8x32xf32>
    %258 = tpu.matmul %252, %24, %cst_121 {dimension_numbers = #tpu.dot_dimension_numbers<[1], [0], [0], [1], [0, 0, 1, 1], [], []>} : vector<8x32xf32>, vector<32x32xf32>, vector<8x32xf32> -> vector<8x32xf32>
    %cst_122 = arith.constant dense<0.000000e+00> : vector<8x32xf32>
    %259 = tpu.matmul %252, %25, %cst_122 {dimension_numbers = #tpu.dot_dimension_numbers<[1], [0], [0], [1], [0, 0, 1, 1], [], []>} : vector<8x32xf32>, vector<32x32xf32>, vector<8x32xf32> -> vector<8x32xf32>
    %260 = vector.broadcast %26 : vector<1x32xf32> to vector<8x32xf32>
    %261 = arith.addf %259, %260 : vector<8x32xf32>
    %262 = arith.index_cast %c6_i32 : i32 to index
    %c0_123 = arith.constant 0 : index
    %c0_124 = arith.constant 0 : index
    %263 = vector.load %arg27[%262, %c0_123, %c0_124] : memref<8x8x32xf32, #tpu.memory_space<vmem>>, vector<1x8x32xf32>
    %264 = vector.shape_cast %263 : vector<1x8x32xf32> to vector<8x32xf32>
    %265 = arith.addf %264, %257 : vector<8x32xf32>
    %266 = arith.negf %265 : vector<8x32xf32>
    %267 = math.exp %266 : vector<8x32xf32>
    %cst_125 = arith.constant 1.000000e+00 : f32
    %268 = vector.broadcast %cst_125 : f32 to vector<8x32xf32>
    %269 = arith.addf %268, %267 : vector<8x32xf32>
    %270 = arith.divf %268, %269 : vector<8x32xf32>
    %271 = arith.index_cast %c6_i32 : i32 to index
    %c0_126 = arith.constant 0 : index
    %c0_127 = arith.constant 0 : index
    %272 = vector.load %arg28[%271, %c0_126, %c0_127] : memref<8x8x32xf32, #tpu.memory_space<vmem>>, vector<1x8x32xf32>
    %273 = vector.shape_cast %272 : vector<1x8x32xf32> to vector<8x32xf32>
    %274 = arith.addf %273, %258 : vector<8x32xf32>
    %275 = arith.negf %274 : vector<8x32xf32>
    %276 = math.exp %275 : vector<8x32xf32>
    %cst_128 = arith.constant 1.000000e+00 : f32
    %277 = vector.broadcast %cst_128 : f32 to vector<8x32xf32>
    %278 = arith.addf %277, %276 : vector<8x32xf32>
    %279 = arith.divf %277, %278 : vector<8x32xf32>
    %280 = arith.index_cast %c6_i32 : i32 to index
    %c0_129 = arith.constant 0 : index
    %c0_130 = arith.constant 0 : index
    %281 = vector.load %arg29[%280, %c0_129, %c0_130] : memref<8x8x32xf32, #tpu.memory_space<vmem>>, vector<1x8x32xf32>
    %282 = vector.shape_cast %281 : vector<1x8x32xf32> to vector<8x32xf32>
    %283 = arith.mulf %270, %261 : vector<8x32xf32>
    %284 = arith.addf %282, %283 : vector<8x32xf32>
    %285 = math.tanh %284 : vector<8x32xf32>
    %cst_131 = arith.constant 1.000000e+00 : f32
    %286 = vector.broadcast %cst_131 : f32 to vector<8x32xf32>
    %287 = arith.subf %286, %279 : vector<8x32xf32>
    %288 = arith.mulf %287, %285 : vector<8x32xf32>
    %289 = arith.mulf %279, %252 : vector<8x32xf32>
    %290 = arith.addf %288, %289 : vector<8x32xf32>
    %291 = arith.index_cast %c6_i32 : i32 to index
    %c0_132 = arith.constant 0 : index
    %c0_133 = arith.constant 0 : index
    %292 = vector.load %arg26[%291, %c0_132, %c0_133] : memref<8x8x32xf32, #tpu.memory_space<vmem>>, vector<1x8x32xf32>
    %293 = vector.shape_cast %292 : vector<1x8x32xf32> to vector<8x32xf32>
    %294 = vector.shape_cast %290 : vector<8x32xf32> to vector<1x8x32xf32>
    tpu.vector_store %arg26[%291, %c0_132, %c0_133], %294 {strides = array<i32>} : memref<8x8x32xf32, #tpu.memory_space<vmem>>, vector<1x8x32xf32>,
    %c7_i32 = arith.constant 7 : i32
    %cst_134 = arith.constant dense<0.000000e+00> : vector<8x32xf32>
    %295 = tpu.matmul %290, %23, %cst_134 {dimension_numbers = #tpu.dot_dimension_numbers<[1], [0], [0], [1], [0, 0, 1, 1], [], []>} : vector<8x32xf32>, vector<32x32xf32>, vector<8x32xf32> -> vector<8x32xf32>
    %cst_135 = arith.constant dense<0.000000e+00> : vector<8x32xf32>
    %296 = tpu.matmul %290, %24, %cst_135 {dimension_numbers = #tpu.dot_dimension_numbers<[1], [0], [0], [1], [0, 0, 1, 1], [], []>} : vector<8x32xf32>, vector<32x32xf32>, vector<8x32xf32> -> vector<8x32xf32>
    %cst_136 = arith.constant dense<0.000000e+00> : vector<8x32xf32>
    %297 = tpu.matmul %290, %25, %cst_136 {dimension_numbers = #tpu.dot_dimension_numbers<[1], [0], [0], [1], [0, 0, 1, 1], [], []>} : vector<8x32xf32>, vector<32x32xf32>, vector<8x32xf32> -> vector<8x32xf32>
    %298 = vector.broadcast %26 : vector<1x32xf32> to vector<8x32xf32>
    %299 = arith.addf %297, %298 : vector<8x32xf32>
    %300 = arith.index_cast %c7_i32 : i32 to index
    %c0_137 = arith.constant 0 : index
    %c0_138 = arith.constant 0 : index
    %301 = vector.load %arg27[%300, %c0_137, %c0_138] : memref<8x8x32xf32, #tpu.memory_space<vmem>>, vector<1x8x32xf32>
    %302 = vector.shape_cast %301 : vector<1x8x32xf32> to vector<8x32xf32>
    %303 = arith.addf %302, %295 : vector<8x32xf32>
    %304 = arith.negf %303 : vector<8x32xf32>
    %305 = math.exp %304 : vector<8x32xf32>
    %cst_139 = arith.constant 1.000000e+00 : f32
    %306 = vector.broadcast %cst_139 : f32 to vector<8x32xf32>
    %307 = arith.addf %306, %305 : vector<8x32xf32>
    %308 = arith.divf %306, %307 : vector<8x32xf32>
    %309 = arith.index_cast %c7_i32 : i32 to index
    %c0_140 = arith.constant 0 : index
    %c0_141 = arith.constant 0 : index
    %310 = vector.load %arg28[%309, %c0_140, %c0_141] : memref<8x8x32xf32, #tpu.memory_space<vmem>>, vector<1x8x32xf32>
    %311 = vector.shape_cast %310 : vector<1x8x32xf32> to vector<8x32xf32>
    %312 = arith.addf %311, %296 : vector<8x32xf32>
    %313 = arith.negf %312 : vector<8x32xf32>
    %314 = math.exp %313 : vector<8x32xf32>
    %cst_142 = arith.constant 1.000000e+00 : f32
    %315 = vector.broadcast %cst_142 : f32 to vector<8x32xf32>
    %316 = arith.addf %315, %314 : vector<8x32xf32>
    %317 = arith.divf %315, %316 : vector<8x32xf32>
    %318 = arith.index_cast %c7_i32 : i32 to index
    %c0_143 = arith.constant 0 : index
    %c0_144 = arith.constant 0 : index
    %319 = vector.load %arg29[%318, %c0_143, %c0_144] : memref<8x8x32xf32, #tpu.memory_space<vmem>>, vector<1x8x32xf32>
    %320 = vector.shape_cast %319 : vector<1x8x32xf32> to vector<8x32xf32>
    %321 = arith.mulf %308, %299 : vector<8x32xf32>
    %322 = arith.addf %320, %321 : vector<8x32xf32>
    %323 = math.tanh %322 : vector<8x32xf32>
    %cst_145 = arith.constant 1.000000e+00 : f32
    %324 = vector.broadcast %cst_145 : f32 to vector<8x32xf32>
    %325 = arith.subf %324, %317 : vector<8x32xf32>
    %326 = arith.mulf %325, %323 : vector<8x32xf32>
    %327 = arith.mulf %317, %290 : vector<8x32xf32>
    %328 = arith.addf %326, %327 : vector<8x32xf32>
    %329 = arith.index_cast %c7_i32 : i32 to index
    %c0_146 = arith.constant 0 : index
    %c0_147 = arith.constant 0 : index
    %330 = vector.load %arg26[%329, %c0_146, %c0_147] : memref<8x8x32xf32, #tpu.memory_space<vmem>>, vector<1x8x32xf32>
    %331 = vector.shape_cast %330 : vector<1x8x32xf32> to vector<8x32xf32>
    %332 = vector.shape_cast %328 : vector<8x32xf32> to vector<1x8x32xf32>
    tpu.vector_store %arg26[%329, %c0_146, %c0_147], %332 {strides = array<i32>} : memref<8x8x32xf32, #tpu.memory_space<vmem>>, vector<1x8x32xf32>,
    %c8_i32 = arith.constant 8 : i32
    %c0_148 = arith.constant 0 : index
    %c0_149 = arith.constant 0 : index
    %c0_150 = arith.constant 0 : index
    %333 = vector.load %arg25[%c0_148, %c0_149, %c0_150] : memref<2x8x32xf32, #tpu.memory_space<vmem>>, vector<1x8x32xf32>
    %334 = vector.shape_cast %333 : vector<1x8x32xf32> to vector<8x32xf32>
    %335 = vector.shape_cast %328 : vector<8x32xf32> to vector<1x8x32xf32>
    tpu.vector_store %arg25[%c0_148, %c0_149, %c0_150], %335 {strides = array<i32>} : memref<2x8x32xf32, #tpu.memory_space<vmem>>, vector<1x8x32xf32>,
    %c0_151 = arith.constant 0 : index
    %c0_152 = arith.constant 0 : index
    %c0_153 = arith.constant 0 : index
    %336 = vector.load %arg26[%c0_151, %c0_152, %c0_153] : memref<8x8x32xf32, #tpu.memory_space<vmem>>, vector<8x8x32xf32>
    %337 = vector.shape_cast %336 : vector<8x8x32xf32> to vector<64x32xf32>
    %c0_154 = arith.constant 0 : index
    %c0_155 = arith.constant 0 : index
    %338 = vector.load %arg12[%c0_154, %c0_155] : memref<32x32xf32, #tpu.memory_space<vmem>>, vector<32x32xf32>
    %cst_156 = arith.constant dense<0.000000e+00> : vector<64x32xf32>
    %339 = tpu.matmul %337, %338, %cst_156 {dimension_numbers = #tpu.dot_dimension_numbers<[1], [0], [0], [1], [0, 0, 1, 1], [], []>} : vector<64x32xf32>, vector<32x32xf32>, vector<64x32xf32> -> vector<64x32xf32>
    %c0_157 = arith.constant 0 : index
    %c0_158 = arith.constant 0 : index
    %340 = vector.load %arg18[%c0_157, %c0_158] : memref<1x32xf32, #tpu.memory_space<vmem>>, vector<1x32xf32>
    %341 = vector.broadcast %340 : vector<1x32xf32> to vector<64x32xf32>
    %342 = arith.addf %339, %341 : vector<64x32xf32>
    %343 = vector.shape_cast %342 : vector<64x32xf32> to vector<8x8x32xf32>
    %c0_159 = arith.constant 0 : index
    %c0_160 = arith.constant 0 : index
    %c0_161 = arith.constant 0 : index
    %344 = vector.load %arg27[%c0_159, %c0_160, %c0_161] : memref<8x8x32xf32, #tpu.memory_space<vmem>>, vector<8x8x32xf32>
    tpu.vector_store %arg27[%c0_159, %c0_160, %c0_161], %343 {strides = array<i32>} : memref<8x8x32xf32, #tpu.memory_space<vmem>>, vector<8x8x32xf32>,
    %c0_162 = arith.constant 0 : index
    %c0_163 = arith.constant 0 : index
    %345 = vector.load %arg13[%c0_162, %c0_163] : memref<32x32xf32, #tpu.memory_space<vmem>>, vector<32x32xf32>
    %cst_164 = arith.constant dense<0.000000e+00> : vector<64x32xf32>
    %346 = tpu.matmul %337, %345, %cst_164 {dimension_numbers = #tpu.dot_dimension_numbers<[1], [0], [0], [1], [0, 0, 1, 1], [], []>} : vector<64x32xf32>, vector<32x32xf32>, vector<64x32xf32> -> vector<64x32xf32>
    %c0_165 = arith.constant 0 : index
    %c0_166 = arith.constant 0 : index
    %347 = vector.load %arg19[%c0_165, %c0_166] : memref<1x32xf32, #tpu.memory_space<vmem>>, vector<1x32xf32>
    %348 = vector.broadcast %347 : vector<1x32xf32> to vector<64x32xf32>
    %349 = arith.addf %346, %348 : vector<64x32xf32>
    %350 = vector.shape_cast %349 : vector<64x32xf32> to vector<8x8x32xf32>
    %c0_167 = arith.constant 0 : index
    %c0_168 = arith.constant 0 : index
    %c0_169 = arith.constant 0 : index
    %351 = vector.load %arg28[%c0_167, %c0_168, %c0_169] : memref<8x8x32xf32, #tpu.memory_space<vmem>>, vector<8x8x32xf32>
    tpu.vector_store %arg28[%c0_167, %c0_168, %c0_169], %350 {strides = array<i32>} : memref<8x8x32xf32, #tpu.memory_space<vmem>>, vector<8x8x32xf32>,
    %c0_170 = arith.constant 0 : index
    %c0_171 = arith.constant 0 : index
    %352 = vector.load %arg14[%c0_170, %c0_171] : memref<32x32xf32, #tpu.memory_space<vmem>>, vector<32x32xf32>
    %cst_172 = arith.constant dense<0.000000e+00> : vector<64x32xf32>
    %353 = tpu.matmul %337, %352, %cst_172 {dimension_numbers = #tpu.dot_dimension_numbers<[1], [0], [0], [1], [0, 0, 1, 1], [], []>} : vector<64x32xf32>, vector<32x32xf32>, vector<64x32xf32> -> vector<64x32xf32>
    %c0_173 = arith.constant 0 : index
    %c0_174 = arith.constant 0 : index
    %354 = vector.load %arg20[%c0_173, %c0_174] : memref<1x32xf32, #tpu.memory_space<vmem>>, vector<1x32xf32>
    %355 = vector.broadcast %354 : vector<1x32xf32> to vector<64x32xf32>
    %356 = arith.addf %353, %355 : vector<64x32xf32>
    %357 = vector.shape_cast %356 : vector<64x32xf32> to vector<8x8x32xf32>
    %c0_175 = arith.constant 0 : index
    %c0_176 = arith.constant 0 : index
    %c0_177 = arith.constant 0 : index
    %358 = vector.load %arg29[%c0_175, %c0_176, %c0_177] : memref<8x8x32xf32, #tpu.memory_space<vmem>>, vector<8x8x32xf32>
    tpu.vector_store %arg29[%c0_175, %c0_176, %c0_177], %357 {strides = array<i32>} : memref<8x8x32xf32, #tpu.memory_space<vmem>>, vector<8x8x32xf32>,
    %c0_178 = arith.constant 0 : index
    %c0_179 = arith.constant 0 : index
    %359 = vector.load %arg15[%c0_178, %c0_179] : memref<32x32xf32, #tpu.memory_space<vmem>>, vector<32x32xf32>
    %c0_180 = arith.constant 0 : index
    %c0_181 = arith.constant 0 : index
    %360 = vector.load %arg16[%c0_180, %c0_181] : memref<32x32xf32, #tpu.memory_space<vmem>>, vector<32x32xf32>
    %c0_182 = arith.constant 0 : index
    %c0_183 = arith.constant 0 : index
    %361 = vector.load %arg17[%c0_182, %c0_183] : memref<32x32xf32, #tpu.memory_space<vmem>>, vector<32x32xf32>
    %c0_184 = arith.constant 0 : index
    %c0_185 = arith.constant 0 : index
    %362 = vector.load %arg21[%c0_184, %c0_185] : memref<1x32xf32, #tpu.memory_space<vmem>>, vector<1x32xf32>
    %c1 = arith.constant 1 : index
    %c0_186 = arith.constant 0 : index
    %c0_187 = arith.constant 0 : index
    %363 = vector.load %arg1[%c1, %c0_186, %c0_187] : memref<2x8x32xf32, #tpu.memory_space<vmem>>, vector<1x8x32xf32>
    %364 = vector.shape_cast %363 : vector<1x8x32xf32> to vector<8x32xf32>
    %c0_i32_188 = arith.constant 0 : i32
    %cst_189 = arith.constant dense<0.000000e+00> : vector<8x32xf32>
    %365 = tpu.matmul %364, %359, %cst_189 {dimension_numbers = #tpu.dot_dimension_numbers<[1], [0], [0], [1], [0, 0, 1, 1], [], []>} : vector<8x32xf32>, vector<32x32xf32>, vector<8x32xf32> -> vector<8x32xf32>
    %cst_190 = arith.constant dense<0.000000e+00> : vector<8x32xf32>
    %366 = tpu.matmul %364, %360, %cst_190 {dimension_numbers = #tpu.dot_dimension_numbers<[1], [0], [0], [1], [0, 0, 1, 1], [], []>} : vector<8x32xf32>, vector<32x32xf32>, vector<8x32xf32> -> vector<8x32xf32>
    %cst_191 = arith.constant dense<0.000000e+00> : vector<8x32xf32>
    %367 = tpu.matmul %364, %361, %cst_191 {dimension_numbers = #tpu.dot_dimension_numbers<[1], [0], [0], [1], [0, 0, 1, 1], [], []>} : vector<8x32xf32>, vector<32x32xf32>, vector<8x32xf32> -> vector<8x32xf32>
    %368 = vector.broadcast %362 : vector<1x32xf32> to vector<8x32xf32>
    %369 = arith.addf %367, %368 : vector<8x32xf32>
    %370 = arith.index_cast %c0_i32_188 : i32 to index
    %c0_192 = arith.constant 0 : index
    %c0_193 = arith.constant 0 : index
    %371 = vector.load %arg27[%370, %c0_192, %c0_193] : memref<8x8x32xf32, #tpu.memory_space<vmem>>, vector<1x8x32xf32>
    %372 = vector.shape_cast %371 : vector<1x8x32xf32> to vector<8x32xf32>
    %373 = arith.addf %372, %365 : vector<8x32xf32>
    %374 = arith.negf %373 : vector<8x32xf32>
    %375 = math.exp %374 : vector<8x32xf32>
    %cst_194 = arith.constant 1.000000e+00 : f32
    %376 = vector.broadcast %cst_194 : f32 to vector<8x32xf32>
    %377 = arith.addf %376, %375 : vector<8x32xf32>
    %378 = arith.divf %376, %377 : vector<8x32xf32>
    %379 = arith.index_cast %c0_i32_188 : i32 to index
    %c0_195 = arith.constant 0 : index
    %c0_196 = arith.constant 0 : index
    %380 = vector.load %arg28[%379, %c0_195, %c0_196] : memref<8x8x32xf32, #tpu.memory_space<vmem>>, vector<1x8x32xf32>
    %381 = vector.shape_cast %380 : vector<1x8x32xf32> to vector<8x32xf32>
    %382 = arith.addf %381, %366 : vector<8x32xf32>
    %383 = arith.negf %382 : vector<8x32xf32>
    %384 = math.exp %383 : vector<8x32xf32>
    %cst_197 = arith.constant 1.000000e+00 : f32
    %385 = vector.broadcast %cst_197 : f32 to vector<8x32xf32>
    %386 = arith.addf %385, %384 : vector<8x32xf32>
    %387 = arith.divf %385, %386 : vector<8x32xf32>
    %388 = arith.index_cast %c0_i32_188 : i32 to index
    %c0_198 = arith.constant 0 : index
    %c0_199 = arith.constant 0 : index
    %389 = vector.load %arg29[%388, %c0_198, %c0_199] : memref<8x8x32xf32, #tpu.memory_space<vmem>>, vector<1x8x32xf32>
    %390 = vector.shape_cast %389 : vector<1x8x32xf32> to vector<8x32xf32>
    %391 = arith.mulf %378, %369 : vector<8x32xf32>
    %392 = arith.addf %390, %391 : vector<8x32xf32>
    %393 = math.tanh %392 : vector<8x32xf32>
    %cst_200 = arith.constant 1.000000e+00 : f32
    %394 = vector.broadcast %cst_200 : f32 to vector<8x32xf32>
    %395 = arith.subf %394, %387 : vector<8x32xf32>
    %396 = arith.mulf %395, %393 : vector<8x32xf32>
    %397 = arith.mulf %387, %364 : vector<8x32xf32>
    %398 = arith.addf %396, %397 : vector<8x32xf32>
    %c1_i32_201 = arith.constant 1 : i32
    %cst_202 = arith.constant dense<0.000000e+00> : vector<8x32xf32>
    %399 = tpu.matmul %398, %359, %cst_202 {dimension_numbers = #tpu.dot_dimension_numbers<[1], [0], [0], [1], [0, 0, 1, 1], [], []>} : vector<8x32xf32>, vector<32x32xf32>, vector<8x32xf32> -> vector<8x32xf32>
    %cst_203 = arith.constant dense<0.000000e+00> : vector<8x32xf32>
    %400 = tpu.matmul %398, %360, %cst_203 {dimension_numbers = #tpu.dot_dimension_numbers<[1], [0], [0], [1], [0, 0, 1, 1], [], []>} : vector<8x32xf32>, vector<32x32xf32>, vector<8x32xf32> -> vector<8x32xf32>
    %cst_204 = arith.constant dense<0.000000e+00> : vector<8x32xf32>
    %401 = tpu.matmul %398, %361, %cst_204 {dimension_numbers = #tpu.dot_dimension_numbers<[1], [0], [0], [1], [0, 0, 1, 1], [], []>} : vector<8x32xf32>, vector<32x32xf32>, vector<8x32xf32> -> vector<8x32xf32>
    %402 = vector.broadcast %362 : vector<1x32xf32> to vector<8x32xf32>
    %403 = arith.addf %401, %402 : vector<8x32xf32>
    %404 = arith.index_cast %c1_i32_201 : i32 to index
    %c0_205 = arith.constant 0 : index
    %c0_206 = arith.constant 0 : index
    %405 = vector.load %arg27[%404, %c0_205, %c0_206] : memref<8x8x32xf32, #tpu.memory_space<vmem>>, vector<1x8x32xf32>
    %406 = vector.shape_cast %405 : vector<1x8x32xf32> to vector<8x32xf32>
    %407 = arith.addf %406, %399 : vector<8x32xf32>
    %408 = arith.negf %407 : vector<8x32xf32>
    %409 = math.exp %408 : vector<8x32xf32>
    %cst_207 = arith.constant 1.000000e+00 : f32
    %410 = vector.broadcast %cst_207 : f32 to vector<8x32xf32>
    %411 = arith.addf %410, %409 : vector<8x32xf32>
    %412 = arith.divf %410, %411 : vector<8x32xf32>
    %413 = arith.index_cast %c1_i32_201 : i32 to index
    %c0_208 = arith.constant 0 : index
    %c0_209 = arith.constant 0 : index
    %414 = vector.load %arg28[%413, %c0_208, %c0_209] : memref<8x8x32xf32, #tpu.memory_space<vmem>>, vector<1x8x32xf32>
    %415 = vector.shape_cast %414 : vector<1x8x32xf32> to vector<8x32xf32>
    %416 = arith.addf %415, %400 : vector<8x32xf32>
    %417 = arith.negf %416 : vector<8x32xf32>
    %418 = math.exp %417 : vector<8x32xf32>
    %cst_210 = arith.constant 1.000000e+00 : f32
    %419 = vector.broadcast %cst_210 : f32 to vector<8x32xf32>
    %420 = arith.addf %419, %418 : vector<8x32xf32>
    %421 = arith.divf %419, %420 : vector<8x32xf32>
    %422 = arith.index_cast %c1_i32_201 : i32 to index
    %c0_211 = arith.constant 0 : index
    %c0_212 = arith.constant 0 : index
    %423 = vector.load %arg29[%422, %c0_211, %c0_212] : memref<8x8x32xf32, #tpu.memory_space<vmem>>, vector<1x8x32xf32>
    %424 = vector.shape_cast %423 : vector<1x8x32xf32> to vector<8x32xf32>
    %425 = arith.mulf %412, %403 : vector<8x32xf32>
    %426 = arith.addf %424, %425 : vector<8x32xf32>
    %427 = math.tanh %426 : vector<8x32xf32>
    %cst_213 = arith.constant 1.000000e+00 : f32
    %428 = vector.broadcast %cst_213 : f32 to vector<8x32xf32>
    %429 = arith.subf %428, %421 : vector<8x32xf32>
    %430 = arith.mulf %429, %427 : vector<8x32xf32>
    %431 = arith.mulf %421, %398 : vector<8x32xf32>
    %432 = arith.addf %430, %431 : vector<8x32xf32>
    %c2_i32_214 = arith.constant 2 : i32
    %cst_215 = arith.constant dense<0.000000e+00> : vector<8x32xf32>
    %433 = tpu.matmul %432, %359, %cst_215 {dimension_numbers = #tpu.dot_dimension_numbers<[1], [0], [0], [1], [0, 0, 1, 1], [], []>} : vector<8x32xf32>, vector<32x32xf32>, vector<8x32xf32> -> vector<8x32xf32>
    %cst_216 = arith.constant dense<0.000000e+00> : vector<8x32xf32>
    %434 = tpu.matmul %432, %360, %cst_216 {dimension_numbers = #tpu.dot_dimension_numbers<[1], [0], [0], [1], [0, 0, 1, 1], [], []>} : vector<8x32xf32>, vector<32x32xf32>, vector<8x32xf32> -> vector<8x32xf32>
    %cst_217 = arith.constant dense<0.000000e+00> : vector<8x32xf32>
    %435 = tpu.matmul %432, %361, %cst_217 {dimension_numbers = #tpu.dot_dimension_numbers<[1], [0], [0], [1], [0, 0, 1, 1], [], []>} : vector<8x32xf32>, vector<32x32xf32>, vector<8x32xf32> -> vector<8x32xf32>
    %436 = vector.broadcast %362 : vector<1x32xf32> to vector<8x32xf32>
    %437 = arith.addf %435, %436 : vector<8x32xf32>
    %438 = arith.index_cast %c2_i32_214 : i32 to index
    %c0_218 = arith.constant 0 : index
    %c0_219 = arith.constant 0 : index
    %439 = vector.load %arg27[%438, %c0_218, %c0_219] : memref<8x8x32xf32, #tpu.memory_space<vmem>>, vector<1x8x32xf32>
    %440 = vector.shape_cast %439 : vector<1x8x32xf32> to vector<8x32xf32>
    %441 = arith.addf %440, %433 : vector<8x32xf32>
    %442 = arith.negf %441 : vector<8x32xf32>
    %443 = math.exp %442 : vector<8x32xf32>
    %cst_220 = arith.constant 1.000000e+00 : f32
    %444 = vector.broadcast %cst_220 : f32 to vector<8x32xf32>
    %445 = arith.addf %444, %443 : vector<8x32xf32>
    %446 = arith.divf %444, %445 : vector<8x32xf32>
    %447 = arith.index_cast %c2_i32_214 : i32 to index
    %c0_221 = arith.constant 0 : index
    %c0_222 = arith.constant 0 : index
    %448 = vector.load %arg28[%447, %c0_221, %c0_222] : memref<8x8x32xf32, #tpu.memory_space<vmem>>, vector<1x8x32xf32>
    %449 = vector.shape_cast %448 : vector<1x8x32xf32> to vector<8x32xf32>
    %450 = arith.addf %449, %434 : vector<8x32xf32>
    %451 = arith.negf %450 : vector<8x32xf32>
    %452 = math.exp %451 : vector<8x32xf32>
    %cst_223 = arith.constant 1.000000e+00 : f32
    %453 = vector.broadcast %cst_223 : f32 to vector<8x32xf32>
    %454 = arith.addf %453, %452 : vector<8x32xf32>
    %455 = arith.divf %453, %454 : vector<8x32xf32>
    %456 = arith.index_cast %c2_i32_214 : i32 to index
    %c0_224 = arith.constant 0 : index
    %c0_225 = arith.constant 0 : index
    %457 = vector.load %arg29[%456, %c0_224, %c0_225] : memref<8x8x32xf32, #tpu.memory_space<vmem>>, vector<1x8x32xf32>
    %458 = vector.shape_cast %457 : vector<1x8x32xf32> to vector<8x32xf32>
    %459 = arith.mulf %446, %437 : vector<8x32xf32>
    %460 = arith.addf %458, %459 : vector<8x32xf32>
    %461 = math.tanh %460 : vector<8x32xf32>
    %cst_226 = arith.constant 1.000000e+00 : f32
    %462 = vector.broadcast %cst_226 : f32 to vector<8x32xf32>
    %463 = arith.subf %462, %455 : vector<8x32xf32>
    %464 = arith.mulf %463, %461 : vector<8x32xf32>
    %465 = arith.mulf %455, %432 : vector<8x32xf32>
    %466 = arith.addf %464, %465 : vector<8x32xf32>
    %c3_i32_227 = arith.constant 3 : i32
    %cst_228 = arith.constant dense<0.000000e+00> : vector<8x32xf32>
    %467 = tpu.matmul %466, %359, %cst_228 {dimension_numbers = #tpu.dot_dimension_numbers<[1], [0], [0], [1], [0, 0, 1, 1], [], []>} : vector<8x32xf32>, vector<32x32xf32>, vector<8x32xf32> -> vector<8x32xf32>
    %cst_229 = arith.constant dense<0.000000e+00> : vector<8x32xf32>
    %468 = tpu.matmul %466, %360, %cst_229 {dimension_numbers = #tpu.dot_dimension_numbers<[1], [0], [0], [1], [0, 0, 1, 1], [], []>} : vector<8x32xf32>, vector<32x32xf32>, vector<8x32xf32> -> vector<8x32xf32>
    %cst_230 = arith.constant dense<0.000000e+00> : vector<8x32xf32>
    %469 = tpu.matmul %466, %361, %cst_230 {dimension_numbers = #tpu.dot_dimension_numbers<[1], [0], [0], [1], [0, 0, 1, 1], [], []>} : vector<8x32xf32>, vector<32x32xf32>, vector<8x32xf32> -> vector<8x32xf32>
    %470 = vector.broadcast %362 : vector<1x32xf32> to vector<8x32xf32>
    %471 = arith.addf %469, %470 : vector<8x32xf32>
    %472 = arith.index_cast %c3_i32_227 : i32 to index
    %c0_231 = arith.constant 0 : index
    %c0_232 = arith.constant 0 : index
    %473 = vector.load %arg27[%472, %c0_231, %c0_232] : memref<8x8x32xf32, #tpu.memory_space<vmem>>, vector<1x8x32xf32>
    %474 = vector.shape_cast %473 : vector<1x8x32xf32> to vector<8x32xf32>
    %475 = arith.addf %474, %467 : vector<8x32xf32>
    %476 = arith.negf %475 : vector<8x32xf32>
    %477 = math.exp %476 : vector<8x32xf32>
    %cst_233 = arith.constant 1.000000e+00 : f32
    %478 = vector.broadcast %cst_233 : f32 to vector<8x32xf32>
    %479 = arith.addf %478, %477 : vector<8x32xf32>
    %480 = arith.divf %478, %479 : vector<8x32xf32>
    %481 = arith.index_cast %c3_i32_227 : i32 to index
    %c0_234 = arith.constant 0 : index
    %c0_235 = arith.constant 0 : index
    %482 = vector.load %arg28[%481, %c0_234, %c0_235] : memref<8x8x32xf32, #tpu.memory_space<vmem>>, vector<1x8x32xf32>
    %483 = vector.shape_cast %482 : vector<1x8x32xf32> to vector<8x32xf32>
    %484 = arith.addf %483, %468 : vector<8x32xf32>
    %485 = arith.negf %484 : vector<8x32xf32>
    %486 = math.exp %485 : vector<8x32xf32>
    %cst_236 = arith.constant 1.000000e+00 : f32
    %487 = vector.broadcast %cst_236 : f32 to vector<8x32xf32>
    %488 = arith.addf %487, %486 : vector<8x32xf32>
    %489 = arith.divf %487, %488 : vector<8x32xf32>
    %490 = arith.index_cast %c3_i32_227 : i32 to index
    %c0_237 = arith.constant 0 : index
    %c0_238 = arith.constant 0 : index
    %491 = vector.load %arg29[%490, %c0_237, %c0_238] : memref<8x8x32xf32, #tpu.memory_space<vmem>>, vector<1x8x32xf32>
    %492 = vector.shape_cast %491 : vector<1x8x32xf32> to vector<8x32xf32>
    %493 = arith.mulf %480, %471 : vector<8x32xf32>
    %494 = arith.addf %492, %493 : vector<8x32xf32>
    %495 = math.tanh %494 : vector<8x32xf32>
    %cst_239 = arith.constant 1.000000e+00 : f32
    %496 = vector.broadcast %cst_239 : f32 to vector<8x32xf32>
    %497 = arith.subf %496, %489 : vector<8x32xf32>
    %498 = arith.mulf %497, %495 : vector<8x32xf32>
    %499 = arith.mulf %489, %466 : vector<8x32xf32>
    %500 = arith.addf %498, %499 : vector<8x32xf32>
    %c4_i32_240 = arith.constant 4 : i32
    %cst_241 = arith.constant dense<0.000000e+00> : vector<8x32xf32>
    %501 = tpu.matmul %500, %359, %cst_241 {dimension_numbers = #tpu.dot_dimension_numbers<[1], [0], [0], [1], [0, 0, 1, 1], [], []>} : vector<8x32xf32>, vector<32x32xf32>, vector<8x32xf32> -> vector<8x32xf32>
    %cst_242 = arith.constant dense<0.000000e+00> : vector<8x32xf32>
    %502 = tpu.matmul %500, %360, %cst_242 {dimension_numbers = #tpu.dot_dimension_numbers<[1], [0], [0], [1], [0, 0, 1, 1], [], []>} : vector<8x32xf32>, vector<32x32xf32>, vector<8x32xf32> -> vector<8x32xf32>
    %cst_243 = arith.constant dense<0.000000e+00> : vector<8x32xf32>
    %503 = tpu.matmul %500, %361, %cst_243 {dimension_numbers = #tpu.dot_dimension_numbers<[1], [0], [0], [1], [0, 0, 1, 1], [], []>} : vector<8x32xf32>, vector<32x32xf32>, vector<8x32xf32> -> vector<8x32xf32>
    %504 = vector.broadcast %362 : vector<1x32xf32> to vector<8x32xf32>
    %505 = arith.addf %503, %504 : vector<8x32xf32>
    %506 = arith.index_cast %c4_i32_240 : i32 to index
    %c0_244 = arith.constant 0 : index
    %c0_245 = arith.constant 0 : index
    %507 = vector.load %arg27[%506, %c0_244, %c0_245] : memref<8x8x32xf32, #tpu.memory_space<vmem>>, vector<1x8x32xf32>
    %508 = vector.shape_cast %507 : vector<1x8x32xf32> to vector<8x32xf32>
    %509 = arith.addf %508, %501 : vector<8x32xf32>
    %510 = arith.negf %509 : vector<8x32xf32>
    %511 = math.exp %510 : vector<8x32xf32>
    %cst_246 = arith.constant 1.000000e+00 : f32
    %512 = vector.broadcast %cst_246 : f32 to vector<8x32xf32>
    %513 = arith.addf %512, %511 : vector<8x32xf32>
    %514 = arith.divf %512, %513 : vector<8x32xf32>
    %515 = arith.index_cast %c4_i32_240 : i32 to index
    %c0_247 = arith.constant 0 : index
    %c0_248 = arith.constant 0 : index
    %516 = vector.load %arg28[%515, %c0_247, %c0_248] : memref<8x8x32xf32, #tpu.memory_space<vmem>>, vector<1x8x32xf32>
    %517 = vector.shape_cast %516 : vector<1x8x32xf32> to vector<8x32xf32>
    %518 = arith.addf %517, %502 : vector<8x32xf32>
    %519 = arith.negf %518 : vector<8x32xf32>
    %520 = math.exp %519 : vector<8x32xf32>
    %cst_249 = arith.constant 1.000000e+00 : f32
    %521 = vector.broadcast %cst_249 : f32 to vector<8x32xf32>
    %522 = arith.addf %521, %520 : vector<8x32xf32>
    %523 = arith.divf %521, %522 : vector<8x32xf32>
    %524 = arith.index_cast %c4_i32_240 : i32 to index
    %c0_250 = arith.constant 0 : index
    %c0_251 = arith.constant 0 : index
    %525 = vector.load %arg29[%524, %c0_250, %c0_251] : memref<8x8x32xf32, #tpu.memory_space<vmem>>, vector<1x8x32xf32>
    %526 = vector.shape_cast %525 : vector<1x8x32xf32> to vector<8x32xf32>
    %527 = arith.mulf %514, %505 : vector<8x32xf32>
    %528 = arith.addf %526, %527 : vector<8x32xf32>
    %529 = math.tanh %528 : vector<8x32xf32>
    %cst_252 = arith.constant 1.000000e+00 : f32
    %530 = vector.broadcast %cst_252 : f32 to vector<8x32xf32>
    %531 = arith.subf %530, %523 : vector<8x32xf32>
    %532 = arith.mulf %531, %529 : vector<8x32xf32>
    %533 = arith.mulf %523, %500 : vector<8x32xf32>
    %534 = arith.addf %532, %533 : vector<8x32xf32>
    %c5_i32_253 = arith.constant 5 : i32
    %cst_254 = arith.constant dense<0.000000e+00> : vector<8x32xf32>
    %535 = tpu.matmul %534, %359, %cst_254 {dimension_numbers = #tpu.dot_dimension_numbers<[1], [0], [0], [1], [0, 0, 1, 1], [], []>} : vector<8x32xf32>, vector<32x32xf32>, vector<8x32xf32> -> vector<8x32xf32>
    %cst_255 = arith.constant dense<0.000000e+00> : vector<8x32xf32>
    %536 = tpu.matmul %534, %360, %cst_255 {dimension_numbers = #tpu.dot_dimension_numbers<[1], [0], [0], [1], [0, 0, 1, 1], [], []>} : vector<8x32xf32>, vector<32x32xf32>, vector<8x32xf32> -> vector<8x32xf32>
    %cst_256 = arith.constant dense<0.000000e+00> : vector<8x32xf32>
    %537 = tpu.matmul %534, %361, %cst_256 {dimension_numbers = #tpu.dot_dimension_numbers<[1], [0], [0], [1], [0, 0, 1, 1], [], []>} : vector<8x32xf32>, vector<32x32xf32>, vector<8x32xf32> -> vector<8x32xf32>
    %538 = vector.broadcast %362 : vector<1x32xf32> to vector<8x32xf32>
    %539 = arith.addf %537, %538 : vector<8x32xf32>
    %540 = arith.index_cast %c5_i32_253 : i32 to index
    %c0_257 = arith.constant 0 : index
    %c0_258 = arith.constant 0 : index
    %541 = vector.load %arg27[%540, %c0_257, %c0_258] : memref<8x8x32xf32, #tpu.memory_space<vmem>>, vector<1x8x32xf32>
    %542 = vector.shape_cast %541 : vector<1x8x32xf32> to vector<8x32xf32>
    %543 = arith.addf %542, %535 : vector<8x32xf32>
    %544 = arith.negf %543 : vector<8x32xf32>
    %545 = math.exp %544 : vector<8x32xf32>
    %cst_259 = arith.constant 1.000000e+00 : f32
    %546 = vector.broadcast %cst_259 : f32 to vector<8x32xf32>
    %547 = arith.addf %546, %545 : vector<8x32xf32>
    %548 = arith.divf %546, %547 : vector<8x32xf32>
    %549 = arith.index_cast %c5_i32_253 : i32 to index
    %c0_260 = arith.constant 0 : index
    %c0_261 = arith.constant 0 : index
    %550 = vector.load %arg28[%549, %c0_260, %c0_261] : memref<8x8x32xf32, #tpu.memory_space<vmem>>, vector<1x8x32xf32>
    %551 = vector.shape_cast %550 : vector<1x8x32xf32> to vector<8x32xf32>
    %552 = arith.addf %551, %536 : vector<8x32xf32>
    %553 = arith.negf %552 : vector<8x32xf32>
    %554 = math.exp %553 : vector<8x32xf32>
    %cst_262 = arith.constant 1.000000e+00 : f32
    %555 = vector.broadcast %cst_262 : f32 to vector<8x32xf32>
    %556 = arith.addf %555, %554 : vector<8x32xf32>
    %557 = arith.divf %555, %556 : vector<8x32xf32>
    %558 = arith.index_cast %c5_i32_253 : i32 to index
    %c0_263 = arith.constant 0 : index
    %c0_264 = arith.constant 0 : index
    %559 = vector.load %arg29[%558, %c0_263, %c0_264] : memref<8x8x32xf32, #tpu.memory_space<vmem>>, vector<1x8x32xf32>
    %560 = vector.shape_cast %559 : vector<1x8x32xf32> to vector<8x32xf32>
    %561 = arith.mulf %548, %539 : vector<8x32xf32>
    %562 = arith.addf %560, %561 : vector<8x32xf32>
    %563 = math.tanh %562 : vector<8x32xf32>
    %cst_265 = arith.constant 1.000000e+00 : f32
    %564 = vector.broadcast %cst_265 : f32 to vector<8x32xf32>
    %565 = arith.subf %564, %557 : vector<8x32xf32>
    %566 = arith.mulf %565, %563 : vector<8x32xf32>
    %567 = arith.mulf %557, %534 : vector<8x32xf32>
    %568 = arith.addf %566, %567 : vector<8x32xf32>
    %c6_i32_266 = arith.constant 6 : i32
    %cst_267 = arith.constant dense<0.000000e+00> : vector<8x32xf32>
    %569 = tpu.matmul %568, %359, %cst_267 {dimension_numbers = #tpu.dot_dimension_numbers<[1], [0], [0], [1], [0, 0, 1, 1], [], []>} : vector<8x32xf32>, vector<32x32xf32>, vector<8x32xf32> -> vector<8x32xf32>
    %cst_268 = arith.constant dense<0.000000e+00> : vector<8x32xf32>
    %570 = tpu.matmul %568, %360, %cst_268 {dimension_numbers = #tpu.dot_dimension_numbers<[1], [0], [0], [1], [0, 0, 1, 1], [], []>} : vector<8x32xf32>, vector<32x32xf32>, vector<8x32xf32> -> vector<8x32xf32>
    %cst_269 = arith.constant dense<0.000000e+00> : vector<8x32xf32>
    %571 = tpu.matmul %568, %361, %cst_269 {dimension_numbers = #tpu.dot_dimension_numbers<[1], [0], [0], [1], [0, 0, 1, 1], [], []>} : vector<8x32xf32>, vector<32x32xf32>, vector<8x32xf32> -> vector<8x32xf32>
    %572 = vector.broadcast %362 : vector<1x32xf32> to vector<8x32xf32>
    %573 = arith.addf %571, %572 : vector<8x32xf32>
    %574 = arith.index_cast %c6_i32_266 : i32 to index
    %c0_270 = arith.constant 0 : index
    %c0_271 = arith.constant 0 : index
    %575 = vector.load %arg27[%574, %c0_270, %c0_271] : memref<8x8x32xf32, #tpu.memory_space<vmem>>, vector<1x8x32xf32>
    %576 = vector.shape_cast %575 : vector<1x8x32xf32> to vector<8x32xf32>
    %577 = arith.addf %576, %569 : vector<8x32xf32>
    %578 = arith.negf %577 : vector<8x32xf32>
    %579 = math.exp %578 : vector<8x32xf32>
    %cst_272 = arith.constant 1.000000e+00 : f32
    %580 = vector.broadcast %cst_272 : f32 to vector<8x32xf32>
    %581 = arith.addf %580, %579 : vector<8x32xf32>
    %582 = arith.divf %580, %581 : vector<8x32xf32>
    %583 = arith.index_cast %c6_i32_266 : i32 to index
    %c0_273 = arith.constant 0 : index
    %c0_274 = arith.constant 0 : index
    %584 = vector.load %arg28[%583, %c0_273, %c0_274] : memref<8x8x32xf32, #tpu.memory_space<vmem>>, vector<1x8x32xf32>
    %585 = vector.shape_cast %584 : vector<1x8x32xf32> to vector<8x32xf32>
    %586 = arith.addf %585, %570 : vector<8x32xf32>
    %587 = arith.negf %586 : vector<8x32xf32>
    %588 = math.exp %587 : vector<8x32xf32>
    %cst_275 = arith.constant 1.000000e+00 : f32
    %589 = vector.broadcast %cst_275 : f32 to vector<8x32xf32>
    %590 = arith.addf %589, %588 : vector<8x32xf32>
    %591 = arith.divf %589, %590 : vector<8x32xf32>
    %592 = arith.index_cast %c6_i32_266 : i32 to index
    %c0_276 = arith.constant 0 : index
    %c0_277 = arith.constant 0 : index
    %593 = vector.load %arg29[%592, %c0_276, %c0_277] : memref<8x8x32xf32, #tpu.memory_space<vmem>>, vector<1x8x32xf32>
    %594 = vector.shape_cast %593 : vector<1x8x32xf32> to vector<8x32xf32>
    %595 = arith.mulf %582, %573 : vector<8x32xf32>
    %596 = arith.addf %594, %595 : vector<8x32xf32>
    %597 = math.tanh %596 : vector<8x32xf32>
    %cst_278 = arith.constant 1.000000e+00 : f32
    %598 = vector.broadcast %cst_278 : f32 to vector<8x32xf32>
    %599 = arith.subf %598, %591 : vector<8x32xf32>
    %600 = arith.mulf %599, %597 : vector<8x32xf32>
    %601 = arith.mulf %591, %568 : vector<8x32xf32>
    %602 = arith.addf %600, %601 : vector<8x32xf32>
    %c7_i32_279 = arith.constant 7 : i32
    %cst_280 = arith.constant dense<0.000000e+00> : vector<8x32xf32>
    %603 = tpu.matmul %602, %359, %cst_280 {dimension_numbers = #tpu.dot_dimension_numbers<[1], [0], [0], [1], [0, 0, 1, 1], [], []>} : vector<8x32xf32>, vector<32x32xf32>, vector<8x32xf32> -> vector<8x32xf32>
    %cst_281 = arith.constant dense<0.000000e+00> : vector<8x32xf32>
    %604 = tpu.matmul %602, %360, %cst_281 {dimension_numbers = #tpu.dot_dimension_numbers<[1], [0], [0], [1], [0, 0, 1, 1], [], []>} : vector<8x32xf32>, vector<32x32xf32>, vector<8x32xf32> -> vector<8x32xf32>
    %cst_282 = arith.constant dense<0.000000e+00> : vector<8x32xf32>
    %605 = tpu.matmul %602, %361, %cst_282 {dimension_numbers = #tpu.dot_dimension_numbers<[1], [0], [0], [1], [0, 0, 1, 1], [], []>} : vector<8x32xf32>, vector<32x32xf32>, vector<8x32xf32> -> vector<8x32xf32>
    %606 = vector.broadcast %362 : vector<1x32xf32> to vector<8x32xf32>
    %607 = arith.addf %605, %606 : vector<8x32xf32>
    %608 = arith.index_cast %c7_i32_279 : i32 to index
    %c0_283 = arith.constant 0 : index
    %c0_284 = arith.constant 0 : index
    %609 = vector.load %arg27[%608, %c0_283, %c0_284] : memref<8x8x32xf32, #tpu.memory_space<vmem>>, vector<1x8x32xf32>
    %610 = vector.shape_cast %609 : vector<1x8x32xf32> to vector<8x32xf32>
    %611 = arith.addf %610, %603 : vector<8x32xf32>
    %612 = arith.negf %611 : vector<8x32xf32>
    %613 = math.exp %612 : vector<8x32xf32>
    %cst_285 = arith.constant 1.000000e+00 : f32
    %614 = vector.broadcast %cst_285 : f32 to vector<8x32xf32>
    %615 = arith.addf %614, %613 : vector<8x32xf32>
    %616 = arith.divf %614, %615 : vector<8x32xf32>
    %617 = arith.index_cast %c7_i32_279 : i32 to index
    %c0_286 = arith.constant 0 : index
    %c0_287 = arith.constant 0 : index
    %618 = vector.load %arg28[%617, %c0_286, %c0_287] : memref<8x8x32xf32, #tpu.memory_space<vmem>>, vector<1x8x32xf32>
    %619 = vector.shape_cast %618 : vector<1x8x32xf32> to vector<8x32xf32>
    %620 = arith.addf %619, %604 : vector<8x32xf32>
    %621 = arith.negf %620 : vector<8x32xf32>
    %622 = math.exp %621 : vector<8x32xf32>
    %cst_288 = arith.constant 1.000000e+00 : f32
    %623 = vector.broadcast %cst_288 : f32 to vector<8x32xf32>
    %624 = arith.addf %623, %622 : vector<8x32xf32>
    %625 = arith.divf %623, %624 : vector<8x32xf32>
    %626 = arith.index_cast %c7_i32_279 : i32 to index
    %c0_289 = arith.constant 0 : index
    %c0_290 = arith.constant 0 : index
    %627 = vector.load %arg29[%626, %c0_289, %c0_290] : memref<8x8x32xf32, #tpu.memory_space<vmem>>, vector<1x8x32xf32>
    %628 = vector.shape_cast %627 : vector<1x8x32xf32> to vector<8x32xf32>
    %629 = arith.mulf %616, %607 : vector<8x32xf32>
    %630 = arith.addf %628, %629 : vector<8x32xf32>
    %631 = math.tanh %630 : vector<8x32xf32>
    %cst_291 = arith.constant 1.000000e+00 : f32
    %632 = vector.broadcast %cst_291 : f32 to vector<8x32xf32>
    %633 = arith.subf %632, %625 : vector<8x32xf32>
    %634 = arith.mulf %633, %631 : vector<8x32xf32>
    %635 = arith.mulf %625, %602 : vector<8x32xf32>
    %636 = arith.addf %634, %635 : vector<8x32xf32>
    %c8_i32_292 = arith.constant 8 : i32
    %c1_293 = arith.constant 1 : index
    %c0_294 = arith.constant 0 : index
    %c0_295 = arith.constant 0 : index
    %637 = vector.load %arg25[%c1_293, %c0_294, %c0_295] : memref<2x8x32xf32, #tpu.memory_space<vmem>>, vector<1x8x32xf32>
    %638 = vector.shape_cast %637 : vector<1x8x32xf32> to vector<8x32xf32>
    %639 = vector.shape_cast %636 : vector<8x32xf32> to vector<1x8x32xf32>
    tpu.vector_store %arg25[%c1_293, %c0_294, %c0_295], %639 {strides = array<i32>} : memref<2x8x32xf32, #tpu.memory_space<vmem>>, vector<1x8x32xf32>,
    %cst_296 = arith.constant 0.000000e+00 : f32
    %640 = vector.broadcast %cst_296 : f32 to vector<8x32xf32>
    %641 = arith.maximumf %636, %640 : vector<8x32xf32>
    %c0_297 = arith.constant 0 : index
    %c0_298 = arith.constant 0 : index
    %642 = vector.load %arg22[%c0_297, %c0_298] : memref<32x4xf32, #tpu.memory_space<vmem>>, vector<32x4xf32>
    %cst_299 = arith.constant dense<0.000000e+00> : vector<8x4xf32>
    %643 = tpu.matmul %641, %642, %cst_299 {dimension_numbers = #tpu.dot_dimension_numbers<[1], [0], [0], [1], [0, 0, 1, 1], [], []>} : vector<8x32xf32>, vector<32x4xf32>, vector<8x4xf32> -> vector<8x4xf32>
    %c0_300 = arith.constant 0 : index
    %c0_301 = arith.constant 0 : index
    %644 = vector.load %arg23[%c0_300, %c0_301] : memref<1x4xf32, #tpu.memory_space<vmem>>, vector<1x4xf32>
    %645 = vector.broadcast %644 : vector<1x4xf32> to vector<8x4xf32>
    %646 = arith.addf %643, %645 : vector<8x4xf32>
    %c0_302 = arith.constant 0 : index
    %c0_303 = arith.constant 0 : index
    %647 = vector.load %arg24[%c0_302, %c0_303] : memref<8x4xf32, #tpu.memory_space<vmem>>, vector<8x4xf32>
    tpu.vector_store %arg24[%c0_302, %c0_303], %646 {strides = array<i32>} : memref<8x4xf32, #tpu.memory_space<vmem>>, vector<8x4xf32>,
    return
  }
}

</mosaic_0001>

<bundles_post_ra>
// kernel: gru_net_forward.1
= control target key start
LH: loop header
LB: loop body
LE: loop exit
PB: predicated region body
PF: predicated region fallthrough
CT: control target
= control target key end

     0   :  { %s7833_s0 = inlined_call_operand.vmem [shape: f32[8,8,16], index: 0, kind: input, shape index: {}]   ;;  %s7834_s1 = inlined_call_operand.vmem [shape: f32[2,8,32], index: 1, kind: input, shape index: {}]   ;;  %s7835_s2 = inlined_call_operand.hbm [shape: f32[16,32], index: 2, kind: input, shape index: {}]   ;;  %s7836_s3 = inlined_call_operand.hbm [shape: f32[16,32], index: 3, kind: input, shape index: {}]   ;;  %s7837_s4 = inlined_call_operand.hbm [shape: f32[16,32], index: 4, kind: input, shape index: {}]   ;;  %s7838_s5 = inlined_call_operand.vmem [shape: f32[32,32], index: 5, kind: input, shape index: {}]   ;;  %s7839_s6 = inlined_call_operand.vmem [shape: f32[32,32], index: 6, kind: input, shape index: {}]   ;;  %s7840_s7 = inlined_call_operand.vmem [shape: f32[32,32], index: 7, kind: input, shape index: {}]   ;;  %s7841_s8 = inlined_call_operand.vmem [shape: f32[1,32], index: 8, kind: input, shape index: {}]   ;;  %s7842_s9 = inlined_call_operand.vmem [shape: f32[1,32], index: 9, kind: input, shape index: {}]   ;;  %s7843_s10 = inlined_call_operand.vmem [shape: f32[1,32], index: 10, kind: input, shape index: {}]   ;;  %s7844_s11 = inlined_call_operand.vmem [shape: f32[1,32], index: 11, kind: input, shape index: {}]   ;;  %s7845_s12 = inlined_call_operand.vmem [shape: f32[32,32], index: 12, kind: input, shape index: {}]   ;;  %s7846_s13 = inlined_call_operand.vmem [shape: f32[32,32], index: 13, kind: input, shape index: {}]   ;;  %s7847_s14 = inlined_call_operand.hbm [shape: f32[32,32], index: 14, kind: input, shape index: {}]   ;;  %s7848_s15 = inlined_call_operand.hbm [shape: f32[32,32], index: 15, kind: input, shape index: {}]   ;;  %s7849_s16 = inlined_call_operand.hbm [shape: f32[32,32], index: 16, kind: input, shape index: {}]   ;;  %s7850_s17 = inlined_call_operand.hbm [shape: f32[32,32], index: 17, kind: input, shape index: {}]   ;;  %s7851_s18 = inlined_call_operand.vmem [shape: f32[1,32], index: 18, kind: input, shape index: {}]   ;;  %s7852_s19 = inlined_call_operand.vmem [shape: f32[1,32], index: 19, kind: input, shape index: {}]   ;;  %s7853_s20 = inlined_call_operand.vmem [shape: f32[1,32], index: 20, kind: input, shape index: {}]   ;;  %s7854_s21 = inlined_call_operand.hbm [shape: f32[1,32], index: 21, kind: input, shape index: {}]   ;;  %s7855_s22 = inlined_call_operand.vmem [shape: f32[32,4], index: 22, kind: input, shape index: {}]   ;;  %s7856_s23 = inlined_call_operand.hbm [shape: f32[1,4], index: 23, kind: input, shape index: {}]   ;;  %s7857_s24 = inlined_call_operand.vmem [shape: f32[8,4], index: 24, kind: output, shape index: {0}]   ;;  %s7858_s25 = inlined_call_operand.hbm [shape: f32[2,8,32], index: 25, kind: output, shape index: {1}]  }
   0x1   :  { %7867 = sst [smem:[#allocation28_spill]] %s7833_s0 }
   0x2   :  { %7868 = sst [smem:[#allocation29_spill]] %s7834_s1 }
   0x3   :  { %7869 = sst [smem:[#allocation30_spill]] %s7835_s2 }
   0x4   :  { %7870 = sst [smem:[#allocation31_spill]] %s7836_s3 }
   0x5   :  { %7871 = sst [smem:[#allocation32_spill]] %s7837_s4 }
   0x6   :  { %7872 = sst [smem:[#allocation33_spill]] %s7838_s5 }
   0x7   :  { %7873 = sst [smem:[#allocation34_spill]] %s7839_s6 }
   0x8   :  { %7874 = sst [smem:[#allocation35_spill]] %s7840_s7 }
   0x9   :  { %7875 = sst [smem:[#allocation36_spill]] %s7841_s8 }
   0xa   :  { %7876 = sst [smem:[#allocation37_spill]] %s7842_s9 }
   0xb   :  { %7877 = sst [smem:[#allocation38_spill]] %s7857_s24 }
   0xc   :  { %31 = vsyncpa [#allocation7], 0 }
   0xd   :  { %32 = vsyncpa [#allocation10], 0 }
   0xe   :  { %33 = vsyncpa [#allocation13], 0 }
   0xf   :  { %34 = vsyncpa [#allocation16], 0 }
  0x10   :  { %35 = vsyncpa [#allocation19], 0 }
  0x11   :  { %36 = vsyncpa [#allocation8], 0  ;;  %s6822_s29 = smov [#allocation9]   ;;  %s6823_s6 = smov [#allocation12]  }
  0x12   :  { %s58_s2 = sshll.u32 %s6822_s29, 4  ;;  %s100_s30 = sshll.u32 %s6823_s6, 4  ;;  %s59_s2 = int_to_ptr.vmem [resolvable:$true] %s58_s2  ;;  %s6967_s30 = int_to_ptr.vmem [resolvable:$true] %s100_s30 }
  0x13   :  { %s7878_s26 = sld [smem:[#allocation31_spill]] }
  0x19   :  { %s6590_s1 = scalar_lea.hbm %s7878_s26, 256 }
  0x1a   :  { %p6591_p0 = scmp.ne.s32.totalorder %s7878_s26, %s6590_s1  ;;  %p6594_p1 = scmp.lt.u32.totalorder %s6590_s1, %s7878_s26 }
  0x1c   :  { %p6596_p2 = pnand %p6594_p1, %p6591_p0 }
  0x1e   :  { %6599 = shalt.err (!%p6596_p2)
}
  0x1f   :  { %s6600_s9 = scalar_lea.vmem %s59_s2, 256  ;;  %p6605_p4 = scmp.lt.s32.totalorder %s59_s2, %s59_s2 }
  0x20   :  { %p6601_p3 = scmp.ne.s32.totalorder %s59_s2, %s6600_s9  ;;  %p6606_p5 = scmp.lt.s32.totalorder %s6600_s9, %s6600_s9 }
  0x22   :  { %p6607_p6 = por %p6606_p5, %p6605_p4 }
  0x24   :  { %p6608_p7 = pnand %p6607_p6, %p6601_p3 }
  0x26   :  { %6611 = shalt.err (!%p6608_p7)
}
  0x27   :  { %s6824_s5 = smov 128   ;;  %s6825_s0 = smov 8  }
  0x28   :  { %64 = dma.hbm_to_vmem [thread:$0]  %s7878_s26, 256, %s59_s2, [#allocation10], %s6824_s5, %s6824_s5, %s6825_s0  }
  0x29   :  { %s6612_s1 = scalar_lea.hbm %s7847_s14, 512 }
  0x2a   :  { %p6613_p8 = scmp.ne.s32.totalorder %s7847_s14, %s6612_s1  ;;  %p6616_p9 = scmp.lt.u32.totalorder %s6612_s1, %s7847_s14 }
  0x2c   :  { %p6618_p10 = pnand %p6616_p9, %p6613_p8 }
  0x2e   :  { %6621 = shalt.err (!%p6618_p10)
}
  0x2f   :  { %s6622_s9 = scalar_lea.vmem %s6967_s30, 512  ;;  %p6627_p12 = scmp.lt.s32.totalorder %s6967_s30, %s6967_s30 }
  0x30   :  { %p6623_p11 = scmp.ne.s32.totalorder %s6967_s30, %s6622_s9  ;;  %p6628_p13 = scmp.lt.s32.totalorder %s6622_s9, %s6622_s9 }
  0x32   :  { %p6629_p0 = por %p6628_p13, %p6627_p12 }
  0x34   :  { %p6630_p1 = pnand %p6629_p0, %p6623_p11 }
  0x36   :  { %6633 = shalt.err (!%p6630_p1)
}
  0x37   :  { %106 = dma.hbm_to_vmem [thread:$0]  %s7847_s14, 512, %s6967_s30, [#allocation13], %s6824_s5, %s6824_s5, %s6825_s0  }
  0x38   :  { %s6826_s29 = smov [#allocation15]   ;;  %s6827_s7 = smov [#allocation18]  }
  0x39   :  { %s124_s6 = sshll.u32 %s6826_s29, 4  ;;  %s155_s3 = sshll.u32 %s6827_s7, 4  ;;  %s125_s6 = int_to_ptr.vmem [resolvable:$true] %s124_s6  ;;  %s156_s3 = int_to_ptr.vmem [resolvable:$true] %s155_s3 }
  0x3a   :  { %s6634_s27 = scalar_lea.hbm %s7849_s16, 512 }
  0x3b   :  { %p6635_p2 = scmp.ne.s32.totalorder %s7849_s16, %s6634_s27  ;;  %p6638_p3 = scmp.lt.u32.totalorder %s6634_s27, %s7849_s16 }
  0x3d   :  { %p6640_p4 = pnand %p6638_p3, %p6635_p2 }
  0x3f   :  { %6643 = shalt.err (!%p6640_p4)
}
  0x40   :  { %s6644_s14 = scalar_lea.vmem %s125_s6, 512  ;;  %p6649_p6 = scmp.lt.s32.totalorder %s125_s6, %s125_s6 }
  0x41   :  { %p6645_p5 = scmp.ne.s32.totalorder %s125_s6, %s6644_s14  ;;  %p6650_p7 = scmp.lt.s32.totalorder %s6644_s14, %s6644_s14 }
  0x43   :  { %p6651_p8 = por %p6650_p7, %p6649_p6 }
  0x45   :  { %p6652_p9 = pnand %p6651_p8, %p6645_p5 }
  0x47   :  { %6655 = shalt.err (!%p6652_p9)
}
  0x48   :  { %130 = dma.hbm_to_vmem [thread:$0]  %s7849_s16, 512, %s125_s6, [#allocation16], %s6824_s5, %s6824_s5, %s6825_s0  }
  0x49   :  { %s6656_s24 = scalar_lea.hbm %s7854_s21, 16 }
  0x4a   :  { %p6657_p10 = scmp.ne.s32.totalorder %s7854_s21, %s6656_s24  ;;  %p6660_p11 = scmp.lt.u32.totalorder %s6656_s24, %s7854_s21 }
  0x4c   :  { %p6662_p12 = pnand %p6660_p11, %p6657_p10 }
  0x4e   :  { %6665 = shalt.err (!%p6662_p12)
}
  0x4f   :  { %s6666_s4 = scalar_lea.vmem %s156_s3, 16  ;;  %s6670_s28 = scalar_lea.vmem %s156_s3, 32 }
  0x50   :  { %p6667_p13 = scmp.ne.s32.totalorder %s156_s3, %s6666_s4  ;;  %p6671_p0 = scmp.lt.s32.totalorder %s156_s3, %s156_s3 }
  0x51   :  { %p6672_p1 = scmp.lt.s32.totalorder %s6670_s28, %s6666_s4 }
  0x53   :  { %p6673_p2 = por %p6672_p1, %p6671_p0 }
  0x55   :  { %p6674_p3 = pnand %p6673_p2, %p6667_p13 }
  0x57   :  { %6677 = shalt.err (!%p6674_p3)
}
  0x58   :  { %158 = dma.hbm_to_vmem [thread:$0]  %s7854_s21, 16, %s156_s3, [#allocation19]  }
  0x59   :  { %s6828_s9 = smov [#allocation6]   ;;  %s6829_s30 = smov [#allocation11]  }
  0x5a   :  { %s46_s14 = sshll.u32 %s6828_s9, 4  ;;  %s70_s2 = sshll.u32 %s6829_s30, 4  ;;  %s47_s14 = int_to_ptr.vmem [resolvable:$true] %s46_s14  ;;  %s7031_s2 = int_to_ptr.vmem [resolvable:$true] %s70_s2 }
  0x5b   :  { %s7879_s24 = sld [smem:[#allocation30_spill]] }
  0x61   :  { %s6678_s7 = scalar_lea.hbm %s7879_s24, 256 }
  0x62   :  { %p6679_p4 = scmp.ne.s32.totalorder %s7879_s24, %s6678_s7  ;;  %p6682_p5 = scmp.lt.u32.totalorder %s6678_s7, %s7879_s24 }
  0x64   :  { %p6684_p6 = pnand %p6682_p5, %p6679_p4 }
  0x66   :  { %6687 = shalt.err (!%p6684_p6)
}
  0x67   :  { %s6688_s21 = scalar_lea.vmem %s47_s14, 256  ;;  %p6693_p8 = scmp.lt.s32.totalorder %s47_s14, %s47_s14 }
  0x68   :  { %p6689_p7 = scmp.ne.s32.totalorder %s47_s14, %s6688_s21  ;;  %p6694_p9 = scmp.lt.s32.totalorder %s6688_s21, %s6688_s21 }
  0x6a   :  { %p6695_p10 = por %p6694_p9, %p6693_p8 }
  0x6c   :  { %p6696_p11 = pnand %p6695_p10, %p6689_p7 }
  0x6e   :  { %6699 = shalt.err (!%p6696_p11)
}
  0x6f   :  { %52 = dma.hbm_to_vmem [thread:$0]  %s7879_s24, 256, %s47_s14, [#allocation7], %s6824_s5, %s6824_s5, %s6825_s0  }
  0x70   :  { %s7880_s9 = sld [smem:[#allocation32_spill]] }
  0x76   :  { %s6700_s30 = scalar_lea.hbm %s7880_s9, 256 }
  0x77   :  { %p6701_p12 = scmp.ne.s32.totalorder %s7880_s9, %s6700_s30  ;;  %p6704_p13 = scmp.lt.u32.totalorder %s6700_s30, %s7880_s9 }
  0x79   :  { %p6706_p0 = pnand %p6704_p13, %p6701_p12 }
  0x7b   :  { %6709 = shalt.err (!%p6706_p0)
}
  0x7c   :  { %s6710_s8 = scalar_lea.vmem %s7031_s2, 256  ;;  %p6715_p2 = scmp.lt.s32.totalorder %s7031_s2, %s7031_s2 }
  0x7d   :  { %p6711_p1 = scmp.ne.s32.totalorder %s7031_s2, %s6710_s8  ;;  %p6716_p3 = scmp.lt.s32.totalorder %s6710_s8, %s6710_s8 }
  0x7f   :  { %p6717_p4 = por %p6716_p3, %p6715_p2 }
  0x81   :  { %p6718_p5 = pnand %p6717_p4, %p6711_p1 }
  0x83   :  { %6721 = shalt.err (!%p6718_p5)
}
  0x84   :  { %76 = dma.hbm_to_vmem [thread:$0]  %s7880_s9, 256, %s7031_s2, [#allocation10], %s6824_s5, %s6824_s5, %s6825_s0  }
  0x85   :  { %s6830_s27 = smov [#allocation14]   ;;  %s6831_s21 = smov [#allocation17]  }
  0x86   :  { %s112_s4 = sshll.u32 %s6830_s27, 4  ;;  %s136_s3 = sshll.u32 %s6831_s21, 4  ;;  %s113_s4 = int_to_ptr.vmem [resolvable:$true] %s112_s4  ;;  %s7068_s3 = int_to_ptr.vmem [resolvable:$true] %s136_s3 }
  0x87   :  { %s6722_s6 = scalar_lea.hbm %s7848_s15, 512 }
  0x88   :  { %p6723_p6 = scmp.ne.s32.totalorder %s7848_s15, %s6722_s6  ;;  %p6726_p7 = scmp.lt.u32.totalorder %s6722_s6, %s7848_s15 }
  0x8a   :  { %p6728_p8 = pnand %p6726_p7, %p6723_p6 }
  0x8c   :  { %6731 = shalt.err (!%p6728_p8)
}
  0x8d   :  { %s6732_s2 = scalar_lea.vmem %s113_s4, 512  ;;  %p6737_p10 = scmp.lt.s32.totalorder %s113_s4, %s113_s4 }
  0x8e   :  { %p6733_p9 = scmp.ne.s32.totalorder %s113_s4, %s6732_s2  ;;  %p6738_p11 = scmp.lt.s32.totalorder %s6732_s2, %s6732_s2 }
  0x90   :  { %p6739_p12 = por %p6738_p11, %p6737_p10 }
  0x92   :  { %p6740_p13 = pnand %p6739_p12, %p6733_p9 }
  0x94   :  { %6743 = shalt.err (!%p6740_p13)
}
  0x95   :  { %118 = dma.hbm_to_vmem [thread:$0]  %s7848_s15, 512, %s113_s4, [#allocation13], %s6824_s5, %s6824_s5, %s6825_s0  }
  0x96   :  { %s6744_s24 = scalar_lea.hbm %s7850_s17, 512 }
  0x97   :  { %p6745_p0 = scmp.ne.s32.totalorder %s7850_s17, %s6744_s24  ;;  %p6748_p1 = scmp.lt.u32.totalorder %s6744_s24, %s7850_s17 }
  0x99   :  { %p6750_p2 = pnand %p6748_p1, %p6745_p0 }
  0x9b   :  { %6753 = shalt.err (!%p6750_p2)
}
  0x9c   :  { %s6754_s6 = scalar_lea.vmem %s7068_s3, 512  ;;  %p6759_p4 = scmp.lt.s32.totalorder %s7068_s3, %s7068_s3 }
  0x9d   :  { %p6755_p3 = scmp.ne.s32.totalorder %s7068_s3, %s6754_s6  ;;  %p6760_p5 = scmp.lt.s32.totalorder %s6754_s6, %s6754_s6 }
  0x9f   :  { %p6761_p6 = por %p6760_p5, %p6759_p4 }
  0xa1   :  { %p6762_p7 = pnand %p6761_p6, %p6755_p3 }
  0xa3   :  { %6765 = shalt.err (!%p6762_p7)
}
  0xa4   :  { %142 = dma.hbm_to_vmem [thread:$0]  %s7850_s17, 512, %s7068_s3, [#allocation16], %s6824_s5, %s6824_s5, %s6825_s0  }
  0xa5   :  { %s6832_s30 = smov [#allocation20]   ;;  %s6766_s2 = scalar_lea.hbm %s7856_s23, 16 }
  0xa6   :  { %s167_s26 = sshll.u32 %s6832_s30, 4  ;;  %p6767_p8 = scmp.ne.s32.totalorder %s7856_s23, %s6766_s2  ;;  %s168_s26 = int_to_ptr.vmem [resolvable:$true] %s167_s26 }
  0xa7   :  { %p6770_p9 = scmp.lt.u32.totalorder %s6766_s2, %s7856_s23 }
  0xa9   :  { %p6772_p10 = pnand %p6770_p9, %p6767_p8 }
  0xab   :  { %6775 = shalt.err (!%p6772_p10)
}
  0xac   :  { %s6776_s24 = scalar_lea.vmem %s168_s26, 16  ;;  %s6780_s17 = scalar_lea.vmem %s168_s26, 32 }
  0xad   :  { %p6777_p11 = scmp.ne.s32.totalorder %s168_s26, %s6776_s24  ;;  %p6781_p12 = scmp.lt.s32.totalorder %s168_s26, %s168_s26 }
  0xae   :  { %p6782_p13 = scmp.lt.s32.totalorder %s6780_s17, %s6776_s24 }
  0xb0   :  { %p6783_p0 = por %p6782_p13, %p6781_p12 }
  0xb2   :  { %p6784_p1 = pnand %p6783_p0, %p6777_p11 }
  0xb4   :  { %6787 = shalt.err (!%p6784_p1)
}
  0xb5   :  { %170 = dma.hbm_to_vmem [thread:$0]  %s7856_s23, 16, %s168_s26, [#allocation19]  }
  0xb6   :  { %6810 = dma.done.wait [#allocation7], 256  }
  0xb7   :  { %6811 = vsyncadd [#allocation7], 4294967040 }
  0xb8   :  { %6812 = dma.done.wait [#allocation10], 512  }
  0xb9   :  { %6813 = vsyncadd [#allocation10], 4294966784 }
  0xba   :  { %6814 = dma.done.wait [#allocation13], 1024  }
  0xbb   :  { %6815 = vsyncadd [#allocation13], 4294966272 }
  0xbc   :  { %6816 = dma.done.wait [#allocation16], 1024  }
  0xbd   :  { %6817 = vsyncadd [#allocation16], 4294966272 }
  0xbe   :  { %6818 = dma.done.wait [#allocation19], 32  }
  0xbf   :  { %6819 = vsyncadd [#allocation19], 4294967264  ;;  %vm215_vm0 = vcmask 130048   ;;  %v206_v0 = vld [vmem:[#allocation6] sm:$0xff]  ;;  %v207_v1 = vld [vmem:[#allocation6 + $0x8] sm:$0xff]  ;;  %s7881_s16 = sld [smem:[#allocation28_spill]] }
  0xc0   :  { %v6083_v3 = vpack.c.bf16 %v207_v1, %v206_v0  ;;  %v354_v4 = vld [vmem:[#allocation9] sm:$0xff]  ;;  %v355_v5 = vld [vmem:[#allocation9 + $0x8] sm:$0xff]  ;;  %s7882_s29 = sld [smem:[#allocation33_spill]]  ;;  %v476_v11 = vld [vmem:[#allocation11] sm:$0xff]  ;;  %v6833_v16 = vmov 0.0|0.0   ;;  %s7883_s30 = sld [smem:[#allocation35_spill]] }
  0xc1   :  { %v6087_v6 = vpack.c.bf16 %v355_v5, %v354_v4  ;;  %v477_v12 = vld [vmem:[#allocation11 + $0x8] sm:$0xff]  ;;  %s7884_s17 = sld [smem:[#allocation34_spill]]  ;;  %vm6834_vm1 = vmmov 0   ;;  %v6835_v32 = vmov 0.0   ;;  %vm345_vm2 = vcmask 261120   ;;  %s7885_s23 = sld [smem:[#allocation29_spill]] }
  0xc2   :  { %6413 = vmatprep.subr.bf16.mxu1 %v6083_v3  ;;  %6084 = vmatprep.subr.bf16.mxu0 %v6083_v3  ;;  %v6091_v14 = vpack.c.bf16 %v477_v12, %v476_v11  ;;  %s7886_s7 = sld [smem:[#allocation36_spill]]  ;;  %s7887_s1 = sld [smem:[#allocation37_spill]]  ;;  %v5004_v0 = vld [vmem:[%s7843_s10] ss:$0 sm:$0xff] }
  0xc3   :  { %6414 = vmatpush3.bf16.msra.mxu1 %v6083_v3  ;;  %6086 = vmatpush3.bf16.msra.mxu0 %v6083_v3 }
  0xc4   :  { %6088 = vmatprep.subr.bf16.mxu1 %v6087_v6  ;;  %6092 = vmatprep.subr.bf16.mxu0 %v6091_v14 }
  0xc5   :  { %v7120_v2 = vld [vmem:[%s7881_s16 + $0x30] sm:$0xff]  ;;  %v7127_v7 = vld [vmem:[%s7881_s16 + $0x38] sm:$0xff]  ;;  %v198_v8 = vld [vmem:[%s7881_s16] sm:$0xff] }
  0xc6   :  { %5449 = vmatprep.mubr.msk.f32.mxu1 %vm215_vm0, %v7120_v2  ;;  %v598_v9 = vld [vmem:[%s7882_s29] sm:$0xff]  ;;  %v599_v10 = vld [vmem:[%s7882_s29 + $0x8] sm:$0xff]  ;;  %5440 = vmatprep.mubr.msk.f32.mxu0 %vm215_vm0, %v198_v8  ;;  %v200_v17 = vld [vmem:[%s7881_s16 + $0x10] sm:$0xff] }
  0xc7   :  { %v199_v13 = vld [vmem:[%s7881_s16 + $0x8] sm:$0xff]  ;;  %5450 = vmatmul.mubr.msk.f32.vlgmr.msra.gmra.mrb[0].mxu1 %vm215_vm0, %v7127_v7  ;;  %v7146_v15 = vpack.c.bf16 %v599_v10, %v598_v9  ;;  %v600_v18 = vld [vmem:[%s7882_s29 + $0x10] sm:$0xff]  ;;  %v601_v19 = vld [vmem:[%s7882_s29 + $0x18] sm:$0xff] }
  0xc8   :  { %5441 = vmatmul.mubr.msk.f32.vlgmr.msra.gmra.mrb[0].mxu0 %vm215_vm0, %v199_v13  ;;  %6090 = vmatpush3.bf16.msra.mxu1 %v6087_v6  ;;  %v201_v20 = vld [vmem:[%s7881_s16 + $0x18] sm:$0xff]  ;;  %v202_v21 = vld [vmem:[%s7881_s16 + $0x20] sm:$0xff]  ;;  %v7169_v22 = vpack.c.bf16 %v601_v19, %v600_v18  ;;  %v607_v24 = vld [vmem:[%s7883_s30 + $0x8] sm:$0xff] }
  0xc9   :  { %5456 = vmatprep.mubr.msk.f32.mxu1 %vm215_vm0, %v198_v8  ;;  %6095 = vmatprep.subr.bf16.mxu1 %v6833_v16  ;;  %v606_v23 = vld [vmem:[%s7883_s30] sm:$0xff]  ;;  %v203_v25 = vld [vmem:[%s7881_s16 + $0x28] sm:$0xff]  ;;  %v608_v27 = vld [vmem:[%s7883_s30 + $0x10] sm:$0xff] }
  0xca   :  { %6094 = vmatpush3.bf16.msra.mxu0 %v6091_v14  ;;  %5443 = vmatprep.mubr.msk.f32.mxu0 %vm215_vm0, %v200_v17  ;;  %v7187_v26 = vpack.c.bf16 %v607_v24, %v606_v23  ;;  %v609_v28 = vld [vmem:[%s7883_s30 + $0x18] sm:$0xff]  ;;  %v602_v29 = vld [vmem:[%s7884_s17] sm:$0xff]  ;;  %v603_v30 = vld [vmem:[%s7884_s17 + $0x8] sm:$0xff] }
  0xcb   :  { %5457 = vmatmul.mubr.msk.f32.vlgmr.msra.gmra.mrb[2].mxu1 %vm215_vm0, %v199_v13  ;;  %6107 = vmatprep.subr.bf16.mxu0 %v6833_v16  ;;  %v7210_v31 = vpack.c.bf16 %v609_v28, %v608_v27  ;;  %v7220_v33 = vld [vmem:[%s7885_s23] sm:$0xff]  ;;  %v7222_v34 = vpack.c.bf16 %v603_v30, %v602_v29  ;;  %v604_v35 = vld [vmem:[%s7884_s17 + $0x10] sm:$0xff]  ;;  %v605_v36 = vld [vmem:[%s7884_s17 + $0x18] sm:$0xff] }
  0xcc   :  { %5444 = vmatmul.mubr.msk.f32.gmra.mrb[2].mxu0 %vm215_vm0, %v201_v20  ;;  %6097 = vmatpush3.bf16.msra.mxu1 %v7146_v15  ;;  %v7237_v37 = vpack.c.bf16 %v605_v36, %v604_v35  ;;  %v4986_v38 = vld [vmem:[%s7886_s7] ss:$0 sm:$0xff] }
  0xcd   :  { %5459 = vmatprep.mubr.msk.f32.mxu1 %vm215_vm0, %v200_v17  ;;  %6098 = vmatprep.subr.bf16.mxu1 %v6833_v16  ;;  %v4995_v46 = vld [vmem:[%s7887_s1] ss:$0 sm:$0xff] }
  0xce   :  { %5446 = vmatprep.mubr.msk.f32.mxu0 %vm215_vm0, %v202_v21 }
  0xcf   :  { %5460 = vmatmul.mubr.msk.f32.gmra.mrb[4].mxu1 %vm215_vm0, %v201_v20 }
  0xd0   :  { %5447 = vmatmul.mubr.msk.f32.gmra.mrb[4].mxu0 %vm215_vm0, %v203_v25  ;;  %5462 = vmatprep.mubr.msk.f32.mxu1 %vm215_vm0, %v202_v21 }
  0xd1   :  { %6100 = vmatpush3.bf16.msra.mxu1 %v7169_v22  ;;  %5472 = vmatprep.mubr.msk.f32.mxu0 %vm215_vm0, %v198_v8 }
  0xd2   :  { %6101 = vmatprep.subr.bf16.mxu1 %v6833_v16 }
  0xd3   :  { %5463 = vmatmul.mubr.msk.f32.gmra.mrb[6].mxu1 %vm215_vm0, %v203_v25 }
  0xd4   :  { %5473 = vmatmul.mubr.msk.f32.vlgmr.msra.gmra.mrb[6].mxu0 %vm215_vm0, %v199_v13  ;;  %5465 = vmatprep.mubr.msk.f32.mxu1 %vm215_vm0, %v7120_v2 }
  0xd5   :  { %6109 = vmatpush3.bf16.msra.mxu0 %v7187_v26  ;;  %5475 = vmatprep.mubr.msk.f32.mxu0 %vm215_vm0, %v200_v17 }
  0xd6   :  { %6110 = vmatprep.subr.bf16.mxu0 %v6833_v16 }
  0xd7   :  { %5466 = vmatmul.mubr.msk.f32.gmra.mrb[8].mxu1 %vm215_vm0, %v7127_v7 }
  0xd8   :  { %5476 = vmatmul.mubr.msk.f32.gmra.mrb[8].mxu0 %vm215_vm0, %v201_v20  ;;  %5492 = vmatprep.mubr.msk.f32.mxu1 %vm6834_vm1, %v6835_v32 }
  0xd9   :  { %5478 = vmatprep.mubr.msk.f32.mxu0 %vm215_vm0, %v202_v21  ;;  %6112 = vmatpush3.bf16.msra.mxu0 %v7210_v31 }
  0xda   :  { %6119 = vmatprep.subr.bf16.mxu0 %v6833_v16 }
  0xdb   :  { %5493 = vmatmul.mubr.msk.f32.vlgmr.msra.gmra.mrb[10].mxu1 %vm345_vm2, %v7220_v33 }
  0xdc   :  { %5479 = vmatmul.mubr.msk.f32.gmra.mrb[10].mxu0 %vm215_vm0, %v203_v25  ;;  %6103 = vmatpush3.bf16.msra.mxu1 %v7222_v34 }
  0xdd   :  { %5503 = vmatprep.mubr.msk.f32.mxu1 %vm6834_vm1, %v6835_v32  ;;  %6104 = vmatprep.subr.bf16.mxu1 %v6833_v16 }
  0xde   :  { %5481 = vmatprep.mubr.msk.f32.mxu0 %vm215_vm0, %v7120_v2 }
  0xe0   :  { %5482 = vmatmul.mubr.msk.f32.gmra.mrb[12].mxu0 %vm215_vm0, %v7127_v7  ;;  %6106 = vmatpush3.bf16.msra.mxu1 %v7237_v37 }
  0xe1   :  { %5514 = vmatprep.mubr.msk.f32.mxu0 %vm6834_vm1, %v6835_v32  ;;  %6113 = vmatprep.subr.bf16.mxu1 %v6833_v16 }
  0xe3   :  { %5504 = vmatmul.mubr.msk.f32.vlgmr.msra.gmra.mrb[12].mxu1 %vm345_vm2, %v7220_v33 }
  0xe4   :  { %5515 = vmatmul.mubr.msk.f32.vlgmr.msra.gmra.mrb[14].mxu0 %vm345_vm2, %v7220_v33  ;;  %6115 = vmatpush3.bf16.msra.mxu1 %v7146_v15 }
  0xe5   :  { %6121 = vmatpush3.bf16.msra.mxu0 %v7222_v34  ;;  %6116 = vmatprep.subr.bf16.mxu1 %v6833_v16 }
  0xe6   :  { %6122 = vmatprep.subr.bf16.mxu0 %v6833_v16  ;;  %5525 = vmatprep.mubr.msk.f32.mxu1 %vm6834_vm1, %v6835_v32 }
  0xe7   :  { %5536 = vmatprep.mubr.msk.f32.mxu0 %vm6834_vm1, %v6835_v32 }
  0xe8   :  { %6118 = vmatpush3.bf16.msra.mxu1 %v7169_v22 }
  0xe9   :  { %6124 = vmatpush3.bf16.msra.mxu0 %v7237_v37  ;;  %6125 = vmatprep.subr.bf16.mxu1 %v6833_v16 }
  0xea   :  { %6131 = vmatprep.subr.bf16.mxu0 %v6833_v16 }
 0x19a   :  { %v5451_v39 = vpop.f32.mrb[0].mxu1 }
 0x19b   :  { %v5442_v40 = vpop.f32.mrb[0].mxu0  ;;  %v342_v41 = vadd.f32 %v5451_v39, %v4986_v38  ;;  %v336_v42 = vpop.f32.mrb[1].mxu1 }
 0x19c   :  { %v312_v43 = vadd.f32 %v5442_v40, %v4986_v38  ;;  %v306_v44 = vpop.f32.mrb[1].mxu0  ;;  %v337_v45 = vadd.f32 %v4986_v38, %v336_v42 }
 0x19d   :  { %v307_v47 = vadd.f32 %v4986_v38, %v306_v44  ;;  %353 = vst.msk [vmem:[#allocation3 + $0x38] sm:$0xff] %vm345_vm2, %v342_v41 }
 0x19e   :  { %347 = vst.msk [vmem:[#allocation3 + $0x8] sm:$0xff] %vm345_vm2, %v312_v43  ;;  %352 = vst.msk [vmem:[#allocation3 + $0x30] sm:$0xff] %vm345_vm2, %v337_v45  ;;  %v5458_v48 = vpop.f32.mrb[2].mxu1 }
 0x19f   :  { %346 = vst.msk [vmem:[#allocation3] sm:$0xff] %vm345_vm2, %v307_v47  ;;  %v5445_v49 = vpop.f32.mrb[2].mxu0  ;;  %v435_v50 = vadd.f32 %v5458_v48, %v4995_v46  ;;  %v429_v51 = vpop.f32.mrb[3].mxu1  ;;  %v7302_v48 = vld [vmem:[%s7844_s11] ss:$0 sm:$0xff] }
 0x1a0   :  { %v322_v52 = vadd.f32 %v5445_v49, %v4986_v38  ;;  %v316_v53 = vpop.f32.mrb[3].mxu0  ;;  %v430_v54 = vadd.f32 %v4995_v46, %v429_v51 }
 0x1a1   :  { %v317_v55 = vadd.f32 %v4986_v38, %v316_v53  ;;  %469 = vst.msk [vmem:[#allocation4 + $0x8] sm:$0xff] %vm345_vm2, %v435_v50 }
 0x1a2   :  { %349 = vst.msk [vmem:[#allocation3 + $0x18] sm:$0xff] %vm345_vm2, %v322_v52  ;;  %468 = vst.msk [vmem:[#allocation4] sm:$0xff] %vm345_vm2, %v430_v54  ;;  %v5461_v56 = vpop.f32.mrb[4].mxu1 }
 0x1a3   :  { %348 = vst.msk [vmem:[#allocation3 + $0x10] sm:$0xff] %vm345_vm2, %v317_v55  ;;  %v5448_v57 = vpop.f32.mrb[4].mxu0  ;;  %v445_v58 = vadd.f32 %v5461_v56, %v4995_v46  ;;  %v439_v59 = vpop.f32.mrb[5].mxu1 }
 0x1a4   :  { %v332_v60 = vadd.f32 %v5448_v57, %v4986_v38  ;;  %v326_v61 = vpop.f32.mrb[5].mxu0  ;;  %v440_v62 = vadd.f32 %v4995_v46, %v439_v59 }
 0x1a5   :  { %v327_v63 = vadd.f32 %v4986_v38, %v326_v61  ;;  %471 = vst.msk [vmem:[#allocation4 + $0x18] sm:$0xff] %vm345_vm2, %v445_v58 }
 0x1a6   :  { %351 = vst.msk [vmem:[#allocation3 + $0x28] sm:$0xff] %vm345_vm2, %v332_v60  ;;  %470 = vst.msk [vmem:[#allocation4 + $0x10] sm:$0xff] %vm345_vm2, %v440_v62  ;;  %v5464_v1 = vpop.f32.mrb[6].mxu1  ;;  %v831_v18 = vld [vmem:[#allocation3] sm:$0xff]  ;;  %v1070_v62 = vld [vmem:[#allocation3 + $0x8] sm:$0xff] }
 0x1a7   :  { %350 = vst.msk [vmem:[#allocation3 + $0x20] sm:$0xff] %vm345_vm2, %v327_v63  ;;  %v5474_v2 = vpop.f32.mrb[6].mxu0  ;;  %v455_v3 = vadd.f32 %v5464_v1, %v4995_v46  ;;  %v449_v4 = vpop.f32.mrb[7].mxu1 }
 0x1a8   :  { %v557_v5 = vadd.f32 %v5474_v2, %v5004_v0  ;;  %v551_v6 = vpop.f32.mrb[7].mxu0  ;;  %v450_v7 = vadd.f32 %v4995_v46, %v449_v4  ;;  %v1079_v4 = vld [vmem:[#allocation4 + $0x8] sm:$0xff] }
 0x1a9   :  { %v552_v8 = vadd.f32 %v5004_v0, %v551_v6  ;;  %473 = vst.msk [vmem:[#allocation4 + $0x28] sm:$0xff] %vm345_vm2, %v455_v3  ;;  %v839_v40 = vld [vmem:[#allocation4] sm:$0xff] }
 0x1aa   :  { %591 = vst.msk [vmem:[#allocation5 + $0x8] sm:$0xff] %vm345_vm2, %v557_v5  ;;  %472 = vst.msk [vmem:[#allocation4 + $0x20] sm:$0xff] %vm345_vm2, %v450_v7  ;;  %v5467_v9 = vpop.f32.mrb[8].mxu1 }
 0x1ab   :  { %590 = vst.msk [vmem:[#allocation5] sm:$0xff] %vm345_vm2, %v552_v8  ;;  %v5477_v10 = vpop.f32.mrb[8].mxu0  ;;  %v465_v11 = vadd.f32 %v5467_v9, %v4995_v46  ;;  %v459_v12 = vpop.f32.mrb[9].mxu1 }
 0x1ac   :  { %v567_v13 = vadd.f32 %v5477_v10, %v5004_v0  ;;  %v561_v14 = vpop.f32.mrb[9].mxu0  ;;  %v460_v17 = vadd.f32 %v4995_v46, %v459_v12 }
 0x1ad   :  { %v562_v19 = vadd.f32 %v5004_v0, %v561_v14  ;;  %475 = vst.msk [vmem:[#allocation4 + $0x38] sm:$0xff] %vm345_vm2, %v465_v11 }
 0x1ae   :  { %593 = vst.msk [vmem:[#allocation5 + $0x18] sm:$0xff] %vm345_vm2, %v567_v13  ;;  %474 = vst.msk [vmem:[#allocation4 + $0x30] sm:$0xff] %vm345_vm2, %v460_v17  ;;  %v681_v20 = vpop.f32.mrb[10].mxu1 }
 0x1af   :  { %592 = vst.msk [vmem:[#allocation5 + $0x10] sm:$0xff] %vm345_vm2, %v562_v19  ;;  %v5480_v21 = vpop.f32.mrb[10].mxu0  ;;  %v832_v23 = vadd.f32 %v831_v18, %v681_v20  ;;  %v5494_v24 = vpop.f32.mrb[11].mxu1 }
 0x1b0   :  { %v577_v25 = vadd.f32 %v5480_v21, %v5004_v0  ;;  %v571_v27 = vpop.f32.mrb[11].mxu0 }
 0x1b1   :  { %v572_v28 = vadd.f32 %v5004_v0, %v571_v27  ;;  %v5017_v29 = vmul.f32 -1.442695, %v832_v23  ;;  %v1088_v18 = vld [vmem:[#allocation5 + $0x8] sm:$0xff] }
 0x1b2   :  { %595 = vst.msk [vmem:[#allocation5 + $0x28] sm:$0xff] %vm345_vm2, %v577_v25  ;;  %v847_v54 = vld [vmem:[#allocation5] sm:$0xff] }
 0x1b3   :  { %594 = vst.msk [vmem:[#allocation5 + $0x20] sm:$0xff] %vm345_vm2, %v572_v28  ;;  %v5483_v30 = vpop.f32.mrb[12].mxu0  ;;  %6430 = vpow2.f32 %v5017_v29  ;;  %v1312_v29 = vld [vmem:[#allocation3 + $0x10] sm:$0xff] }
 0x1b4   :  { %v587_v35 = vadd.f32 %v5483_v30, %v5004_v0  ;;  %v581_v36 = vpop.f32.mrb[13].mxu0 }
 0x1b5   :  { %v582_v38 = vadd.f32 %v5004_v0, %v581_v36 }
 0x1b6   :  { %597 = vst.msk [vmem:[#allocation5 + $0x38] sm:$0xff] %vm345_vm2, %v587_v35  ;;  %v751_v39 = vpop.f32.mrb[12].mxu1 }
 0x1b7   :  { %596 = vst.msk [vmem:[#allocation5 + $0x30] sm:$0xff] %vm345_vm2, %v582_v38  ;;  %v827_v41 = vpop.f32.mrb[14].mxu0  ;;  %v840_v42 = vadd.f32 %v839_v40, %v751_v39  ;;  %v5505_v43 = vpop.f32.mrb[13].mxu1  ;;  %v1321_v40 = vld [vmem:[#allocation4 + $0x10] sm:$0xff] }
 0x1b8   :  { %v5516_v44 = vpop.f32.mrb[15].mxu0  ;;  %v828_v51 = vadd.f32 %v7302_v48, %v827_v41 }
 0x1b9   :  { %v5018_v45 = vmul.f32 -1.442695, %v840_v42 }
 0x1bb   :  { %6432 = vpow2.f32 %v5018_v45 }
 0x1bd   :  { %v6431_v46 = vpop.eup %6430 }
 0x1be   :  { %v836_v47 = vadd.f32 1.0, %v6431_v46 }
 0x1c0   :  { %6434 = vrcp.f32 %v836_v47 }
 0x1c5   :  { %v6433_v49 = vpop.eup %6432 }
 0x1c6   :  { %v844_v50 = vadd.f32 1.0, %v6433_v49 }
 0x1c8   :  { %6436 = vrcp.f32 %v844_v50 }
 0x1ca   :  { %v6435_v52 = vpop.eup %6434 }
 0x1cb   :  { %v848_v53 = vmul.f32 %v6435_v52, %v828_v51 }
 0x1cd   :  { %v849_v55 = vadd.f32 %v848_v53, %v847_v54  ;;  %v1330_v53 = vld [vmem:[#allocation5 + $0x10] sm:$0xff] }
 0x1cf   :  { %6438 = vtanh.f32 %v849_v55 }
 0x1d2   :  { %v6437_v56 = vpop.eup %6436 }
 0x1d3   :  { %v851_v57 = vsub.f32 1.0, %v6437_v56  ;;  %v853_v60 = vmul.f32 %v6437_v56, %v7220_v33 }
 0x1d9   :  { %v6439_v58 = vpop.eup %6438 }
 0x1da   :  { %v852_v59 = vmul.f32 %v6439_v58, %v851_v57 }
 0x1dc   :  { %v854_v61 = vadd.f32 %v853_v60, %v852_v59 }
 0x1de   :  { %855 = vst.msk [vmem:[#allocation2] sm:$0xff] %vm345_vm2, %v854_v61  ;;  %5526 = vmatmul.mubr.msk.f32.vlgmr.msra.gmra.mrb[14].mxu1 %vm345_vm2, %v854_v61  ;;  %5537 = vmatmul.mubr.msk.f32.vlgmr.msra.gmra.mrb[16].mxu0 %vm345_vm2, %v854_v61 }
 0x1df   :  { %6127 = vmatpush3.bf16.msra.mxu1 %v7187_v26  ;;  %5547 = vmatprep.mubr.msk.f32.mxu1 %vm6834_vm1, %v6835_v32 }
 0x1e0   :  { %6128 = vmatprep.subr.bf16.mxu1 %v6833_v16  ;;  %6133 = vmatpush3.bf16.msra.mxu0 %v7146_v15 }
 0x1e1   :  { %6134 = vmatprep.subr.bf16.mxu0 %v6833_v16  ;;  %5558 = vmatprep.mubr.msk.f32.mxu0 %vm6834_vm1, %v6835_v32 }
 0x1e3   :  { %6130 = vmatpush3.bf16.msra.mxu1 %v7210_v31 }
 0x1e4   :  { %6137 = vmatprep.subr.bf16.mxu1 %v6833_v16  ;;  %6136 = vmatpush3.bf16.msra.mxu0 %v7169_v22 }
 0x1e5   :  { %6143 = vmatprep.subr.bf16.mxu0 %v6833_v16 }
 0x1e6   :  { %5548 = vmatmul.mubr.msk.f32.vlgmr.msra.gmra.mrb[16].mxu1 %vm345_vm2, %v854_v61 }
 0x1e7   :  { %6139 = vmatpush3.bf16.msra.mxu1 %v7222_v34  ;;  %5569 = vmatprep.mubr.msk.f32.mxu1 %vm6834_vm1, %v6835_v32 }
 0x1e8   :  { %6140 = vmatprep.subr.bf16.mxu1 %v6833_v16 }
 0x1eb   :  { %6142 = vmatpush3.bf16.msra.mxu1 %v7237_v37 }
 0x1ec   :  { %6149 = vmatprep.subr.bf16.mxu1 %v6833_v16 }
 0x2b1   :  { %v925_v33 = vpop.f32.mrb[14].mxu1  ;;  %v995_v63 = vpop.f32.mrb[16].mxu0 }
 0x2b2   :  { %v1071_v0 = vadd.f32 %v1070_v62, %v925_v33  ;;  %v5527_v1 = vpop.f32.mrb[15].mxu1  ;;  %v5538_v2 = vpop.f32.mrb[17].mxu0  ;;  %v1080_v5 = vadd.f32 %v1079_v4, %v995_v63  ;;  %v1554_v33 = vld [vmem:[#allocation3 + $0x18] sm:$0xff] }
 0x2b4   :  { %v5022_v3 = vmul.f32 -1.442695, %v1071_v0  ;;  %v5023_v6 = vmul.f32 -1.442695, %v1080_v5 }
 0x2b6   :  { %6440 = vpow2.f32 %v5022_v3  ;;  %v1563_v3 = vld [vmem:[#allocation4 + $0x18] sm:$0xff] }
 0x2b7   :  { %6442 = vpow2.f32 %v5023_v6 }
 0x2b9   :  { %v1065_v7 = vpop.f32.mrb[16].mxu1 }
 0x2ba   :  { %v5549_v8 = vpop.f32.mrb[17].mxu1  ;;  %v1066_v13 = vadd.f32 %v7302_v48, %v1065_v7 }
 0x2c0   :  { %v6441_v9 = vpop.eup %6440 }
 0x2c1   :  { %v1075_v10 = vadd.f32 1.0, %v6441_v9  ;;  %v6443_v11 = vpop.eup %6442 }
 0x2c2   :  { %v1084_v12 = vadd.f32 1.0, %v6443_v11 }
 0x2c3   :  { %6444 = vrcp.f32 %v1075_v10 }
 0x2c4   :  { %6446 = vrcp.f32 %v1084_v12 }
 0x2cd   :  { %v6445_v14 = vpop.eup %6444 }
 0x2ce   :  { %v1089_v17 = vmul.f32 %v6445_v14, %v1066_v13  ;;  %v6447_v20 = vpop.eup %6446 }
 0x2cf   :  { %v1092_v21 = vsub.f32 1.0, %v6447_v20  ;;  %v1094_v25 = vmul.f32 %v6447_v20, %v854_v61 }
 0x2d0   :  { %v1090_v19 = vadd.f32 %v1089_v17, %v1088_v18  ;;  %v1572_v17 = vld [vmem:[#allocation5 + $0x18] sm:$0xff] }
 0x2d2   :  { %6448 = vtanh.f32 %v1090_v19 }
 0x2dc   :  { %v6449_v23 = vpop.eup %6448 }
 0x2dd   :  { %v1093_v24 = vmul.f32 %v6449_v23, %v1092_v21 }
 0x2df   :  { %v1095_v27 = vadd.f32 %v1094_v25, %v1093_v24 }
 0x2e1   :  { %1097 = vst.msk [vmem:[#allocation2 + $0x8] sm:$0xff] %vm345_vm2, %v1095_v27  ;;  %5559 = vmatmul.mubr.msk.f32.vlgmr.msra.gmra.mrb[18].mxu0 %vm345_vm2, %v1095_v27  ;;  %5570 = vmatmul.mubr.msk.f32.vlgmr.msra.gmra.mrb[18].mxu1 %vm345_vm2, %v1095_v27 }
 0x2e2   :  { %6145 = vmatpush3.bf16.msra.mxu0 %v7187_v26  ;;  %5580 = vmatprep.mubr.msk.f32.mxu0 %vm6834_vm1, %v6835_v32 }
 0x2e3   :  { %6146 = vmatprep.subr.bf16.mxu0 %v6833_v16  ;;  %6151 = vmatpush3.bf16.msra.mxu1 %v7146_v15 }
 0x2e4   :  { %6152 = vmatprep.subr.bf16.mxu1 %v6833_v16  ;;  %5591 = vmatprep.mubr.msk.f32.mxu1 %vm6834_vm1, %v6835_v32 }
 0x2e6   :  { %6148 = vmatpush3.bf16.msra.mxu0 %v7210_v31 }
 0x2e7   :  { %6155 = vmatprep.subr.bf16.mxu0 %v6833_v16  ;;  %6154 = vmatpush3.bf16.msra.mxu1 %v7169_v22 }
 0x2e8   :  { %6161 = vmatprep.subr.bf16.mxu1 %v6833_v16 }
 0x2e9   :  { %5581 = vmatmul.mubr.msk.f32.vlgmr.msra.gmra.mrb[20].mxu0 %vm345_vm2, %v1095_v27 }
 0x2ea   :  { %6157 = vmatpush3.bf16.msra.mxu0 %v7222_v34  ;;  %5602 = vmatprep.mubr.msk.f32.mxu0 %vm6834_vm1, %v6835_v32 }
 0x2eb   :  { %6158 = vmatprep.subr.bf16.mxu0 %v6833_v16 }
 0x2ee   :  { %6160 = vmatpush3.bf16.msra.mxu0 %v7237_v37 }
 0x2ef   :  { %6167 = vmatprep.subr.bf16.mxu0 %v6833_v16 }
 0x3b4   :  { %v1167_v28 = vpop.f32.mrb[18].mxu0  ;;  %v1237_v30 = vpop.f32.mrb[18].mxu1 }
 0x3b5   :  { %v1313_v35 = vadd.f32 %v1312_v29, %v1167_v28  ;;  %v5560_v36 = vpop.f32.mrb[19].mxu0  ;;  %v5571_v38 = vpop.f32.mrb[19].mxu1  ;;  %v1322_v41 = vadd.f32 %v1321_v40, %v1237_v30  ;;  %v1796_v28 = vld [vmem:[#allocation3 + $0x20] sm:$0xff] }
 0x3b7   :  { %v5027_v39 = vmul.f32 -1.442695, %v1313_v35  ;;  %v5028_v42 = vmul.f32 -1.442695, %v1322_v41 }
 0x3b9   :  { %6450 = vpow2.f32 %v5027_v39  ;;  %v1805_v39 = vld [vmem:[#allocation4 + $0x20] sm:$0xff] }
 0x3ba   :  { %6452 = vpow2.f32 %v5028_v42 }
 0x3bc   :  { %v1307_v43 = vpop.f32.mrb[20].mxu0 }
 0x3bd   :  { %v5582_v44 = vpop.f32.mrb[21].mxu0  ;;  %v1308_v50 = vadd.f32 %v7302_v48, %v1307_v43 }
 0x3c3   :  { %v6451_v45 = vpop.eup %6450 }
 0x3c4   :  { %v1317_v46 = vadd.f32 1.0, %v6451_v45  ;;  %v6453_v47 = vpop.eup %6452 }
 0x3c5   :  { %v1326_v49 = vadd.f32 1.0, %v6453_v47 }
 0x3c6   :  { %6454 = vrcp.f32 %v1317_v46 }
 0x3c7   :  { %6456 = vrcp.f32 %v1326_v49 }
 0x3d0   :  { %v6455_v51 = vpop.eup %6454 }
 0x3d1   :  { %v1331_v52 = vmul.f32 %v6455_v51, %v1308_v50  ;;  %v6457_v55 = vpop.eup %6456 }
 0x3d2   :  { %v1334_v56 = vsub.f32 1.0, %v6457_v55  ;;  %v1336_v59 = vmul.f32 %v6457_v55, %v1095_v27 }
 0x3d3   :  { %v1332_v54 = vadd.f32 %v1331_v52, %v1330_v53  ;;  %v1814_v52 = vld [vmem:[#allocation5 + $0x20] sm:$0xff] }
 0x3d5   :  { %6458 = vtanh.f32 %v1332_v54 }
 0x3df   :  { %v6459_v57 = vpop.eup %6458 }
 0x3e0   :  { %v1335_v58 = vmul.f32 %v6459_v57, %v1334_v56 }
 0x3e2   :  { %v1337_v60 = vadd.f32 %v1336_v59, %v1335_v58 }
 0x3e4   :  { %1339 = vst.msk [vmem:[#allocation2 + $0x10] sm:$0xff] %vm345_vm2, %v1337_v60  ;;  %5592 = vmatmul.mubr.msk.f32.vlgmr.msra.gmra.mrb[20].mxu1 %vm345_vm2, %v1337_v60  ;;  %5603 = vmatmul.mubr.msk.f32.vlgmr.msra.gmra.mrb[22].mxu0 %vm345_vm2, %v1337_v60 }
 0x3e5   :  { %6163 = vmatpush3.bf16.msra.mxu1 %v7187_v26  ;;  %5613 = vmatprep.mubr.msk.f32.mxu1 %vm6834_vm1, %v6835_v32 }
 0x3e6   :  { %6164 = vmatprep.subr.bf16.mxu1 %v6833_v16  ;;  %6169 = vmatpush3.bf16.msra.mxu0 %v7146_v15 }
 0x3e7   :  { %6170 = vmatprep.subr.bf16.mxu0 %v6833_v16  ;;  %5624 = vmatprep.mubr.msk.f32.mxu0 %vm6834_vm1, %v6835_v32 }
 0x3e9   :  { %6166 = vmatpush3.bf16.msra.mxu1 %v7210_v31 }
 0x3ea   :  { %6173 = vmatprep.subr.bf16.mxu1 %v6833_v16  ;;  %6172 = vmatpush3.bf16.msra.mxu0 %v7169_v22 }
 0x3eb   :  { %6179 = vmatprep.subr.bf16.mxu0 %v6833_v16 }
 0x3ec   :  { %5614 = vmatmul.mubr.msk.f32.vlgmr.msra.gmra.mrb[22].mxu1 %vm345_vm2, %v1337_v60 }
 0x3ed   :  { %6175 = vmatpush3.bf16.msra.mxu1 %v7222_v34  ;;  %5635 = vmatprep.mubr.msk.f32.mxu1 %vm6834_vm1, %v6835_v32 }
 0x3ee   :  { %6176 = vmatprep.subr.bf16.mxu1 %v6833_v16 }
 0x3f1   :  { %6178 = vmatpush3.bf16.msra.mxu1 %v7237_v37 }
 0x3f2   :  { %6185 = vmatprep.subr.bf16.mxu1 %v6833_v16 }
 0x4b7   :  { %v1409_v61 = vpop.f32.mrb[20].mxu1  ;;  %v1479_v62 = vpop.f32.mrb[22].mxu0 }
 0x4b8   :  { %v1555_v63 = vadd.f32 %v1554_v33, %v1409_v61  ;;  %v5593_v0 = vpop.f32.mrb[21].mxu1  ;;  %v5604_v1 = vpop.f32.mrb[23].mxu0  ;;  %v1564_v4 = vadd.f32 %v1563_v3, %v1479_v62  ;;  %v2038_v61 = vld [vmem:[#allocation3 + $0x28] sm:$0xff] }
 0x4ba   :  { %v5032_v2 = vmul.f32 -1.442695, %v1555_v63  ;;  %v5033_v5 = vmul.f32 -1.442695, %v1564_v4 }
 0x4bc   :  { %6460 = vpow2.f32 %v5032_v2  ;;  %v2047_v2 = vld [vmem:[#allocation4 + $0x28] sm:$0xff] }
 0x4bd   :  { %6462 = vpow2.f32 %v5033_v5 }
 0x4bf   :  { %v1549_v6 = vpop.f32.mrb[22].mxu1 }
 0x4c0   :  { %v5615_v7 = vpop.f32.mrb[23].mxu1  ;;  %v1550_v12 = vadd.f32 %v7302_v48, %v1549_v6 }
 0x4c6   :  { %v6461_v8 = vpop.eup %6460 }
 0x4c7   :  { %v1559_v9 = vadd.f32 1.0, %v6461_v8  ;;  %v6463_v10 = vpop.eup %6462 }
 0x4c8   :  { %v1568_v11 = vadd.f32 1.0, %v6463_v10 }
 0x4c9   :  { %6464 = vrcp.f32 %v1559_v9 }
 0x4ca   :  { %6466 = vrcp.f32 %v1568_v11 }
 0x4d3   :  { %v6465_v13 = vpop.eup %6464 }
 0x4d4   :  { %v1573_v14 = vmul.f32 %v6465_v13, %v1550_v12  ;;  %v6467_v19 = vpop.eup %6466 }
 0x4d5   :  { %v1576_v20 = vsub.f32 1.0, %v6467_v19  ;;  %v1578_v24 = vmul.f32 %v6467_v19, %v1337_v60 }
 0x4d6   :  { %v1574_v18 = vadd.f32 %v1573_v14, %v1572_v17  ;;  %v2056_v14 = vld [vmem:[#allocation5 + $0x28] sm:$0xff] }
 0x4d8   :  { %6468 = vtanh.f32 %v1574_v18 }
 0x4e2   :  { %v6469_v21 = vpop.eup %6468 }
 0x4e3   :  { %v1577_v23 = vmul.f32 %v6469_v21, %v1576_v20 }
 0x4e5   :  { %v1579_v25 = vadd.f32 %v1578_v24, %v1577_v23 }
 0x4e7   :  { %1581 = vst.msk [vmem:[#allocation2 + $0x18] sm:$0xff] %vm345_vm2, %v1579_v25  ;;  %5625 = vmatmul.mubr.msk.f32.vlgmr.msra.gmra.mrb[24].mxu0 %vm345_vm2, %v1579_v25  ;;  %5636 = vmatmul.mubr.msk.f32.vlgmr.msra.gmra.mrb[24].mxu1 %vm345_vm2, %v1579_v25 }
 0x4e8   :  { %6181 = vmatpush3.bf16.msra.mxu0 %v7187_v26  ;;  %5646 = vmatprep.mubr.msk.f32.mxu0 %vm6834_vm1, %v6835_v32 }
 0x4e9   :  { %6182 = vmatprep.subr.bf16.mxu0 %v6833_v16  ;;  %6187 = vmatpush3.bf16.msra.mxu1 %v7146_v15 }
 0x4ea   :  { %6188 = vmatprep.subr.bf16.mxu1 %v6833_v16  ;;  %5657 = vmatprep.mubr.msk.f32.mxu1 %vm6834_vm1, %v6835_v32 }
 0x4ec   :  { %6184 = vmatpush3.bf16.msra.mxu0 %v7210_v31 }
 0x4ed   :  { %6191 = vmatprep.subr.bf16.mxu0 %v6833_v16  ;;  %6190 = vmatpush3.bf16.msra.mxu1 %v7169_v22 }
 0x4ee   :  { %6197 = vmatprep.subr.bf16.mxu1 %v6833_v16 }
 0x4ef   :  { %5647 = vmatmul.mubr.msk.f32.vlgmr.msra.gmra.mrb[26].mxu0 %vm345_vm2, %v1579_v25 }
 0x4f0   :  { %6193 = vmatpush3.bf16.msra.mxu0 %v7222_v34  ;;  %5668 = vmatprep.mubr.msk.f32.mxu0 %vm6834_vm1, %v6835_v32 }
 0x4f1   :  { %6194 = vmatprep.subr.bf16.mxu0 %v6833_v16 }
 0x4f4   :  { %6196 = vmatpush3.bf16.msra.mxu0 %v7237_v37 }
 0x4f5   :  { %6203 = vmatprep.subr.bf16.mxu0 %v6833_v16 }
 0x5ba   :  { %v1651_v27 = vpop.f32.mrb[24].mxu0  ;;  %v1721_v29 = vpop.f32.mrb[24].mxu1 }
 0x5bb   :  { %v1797_v30 = vadd.f32 %v1796_v28, %v1651_v27  ;;  %v5626_v35 = vpop.f32.mrb[25].mxu0  ;;  %v5637_v36 = vpop.f32.mrb[25].mxu1  ;;  %v1806_v40 = vadd.f32 %v1805_v39, %v1721_v29  ;;  %v2280_v28 = vld [vmem:[#allocation3 + $0x30] sm:$0xff] }
 0x5bd   :  { %v5037_v38 = vmul.f32 -1.442695, %v1797_v30  ;;  %v5038_v41 = vmul.f32 -1.442695, %v1806_v40 }
 0x5bf   :  { %6470 = vpow2.f32 %v5037_v38  ;;  %v2289_v38 = vld [vmem:[#allocation4 + $0x30] sm:$0xff] }
 0x5c0   :  { %6472 = vpow2.f32 %v5038_v41 }
 0x5c2   :  { %v1791_v42 = vpop.f32.mrb[26].mxu0 }
 0x5c3   :  { %v5648_v43 = vpop.f32.mrb[27].mxu0  ;;  %v1792_v49 = vadd.f32 %v7302_v48, %v1791_v42 }
 0x5c9   :  { %v6471_v44 = vpop.eup %6470 }
 0x5ca   :  { %v1801_v45 = vadd.f32 1.0, %v6471_v44  ;;  %v6473_v46 = vpop.eup %6472 }
 0x5cb   :  { %v1810_v47 = vadd.f32 1.0, %v6473_v46 }
 0x5cc   :  { %6474 = vrcp.f32 %v1801_v45 }
 0x5cd   :  { %6476 = vrcp.f32 %v1810_v47 }
 0x5d6   :  { %v6475_v50 = vpop.eup %6474 }
 0x5d7   :  { %v1815_v51 = vmul.f32 %v6475_v50, %v1792_v49  ;;  %v6477_v54 = vpop.eup %6476  ;;  %v2298_v50 = vld [vmem:[#allocation5 + $0x30] sm:$0xff] }
 0x5d8   :  { %v1818_v55 = vsub.f32 1.0, %v6477_v54  ;;  %v1820_v58 = vmul.f32 %v6477_v54, %v1579_v25 }
 0x5d9   :  { %v1816_v53 = vadd.f32 %v1815_v51, %v1814_v52 }
 0x5db   :  { %6478 = vtanh.f32 %v1816_v53 }
 0x5e5   :  { %v6479_v56 = vpop.eup %6478 }
 0x5e6   :  { %v1819_v57 = vmul.f32 %v6479_v56, %v1818_v55 }
 0x5e8   :  { %v1821_v59 = vadd.f32 %v1820_v58, %v1819_v57  ;;  %v2561_v57 = vld [vmem:[%s7845_s12 + $0x10] sm:$0xff]  ;;  %v2562_v58 = vld [vmem:[%s7845_s12 + $0x18] sm:$0xff] }
 0x5ea   :  { %1823 = vst.msk [vmem:[#allocation2 + $0x20] sm:$0xff] %vm345_vm2, %v1821_v59  ;;  %5658 = vmatmul.mubr.msk.f32.vlgmr.msra.gmra.mrb[26].mxu1 %vm345_vm2, %v1821_v59  ;;  %5669 = vmatmul.mubr.msk.f32.vlgmr.msra.gmra.mrb[28].mxu0 %vm345_vm2, %v1821_v59 }
 0x5eb   :  { %6199 = vmatpush3.bf16.msra.mxu1 %v7187_v26  ;;  %5679 = vmatprep.mubr.msk.f32.mxu1 %vm6834_vm1, %v6835_v32 }
 0x5ec   :  { %6200 = vmatprep.subr.bf16.mxu1 %v6833_v16  ;;  %6205 = vmatpush3.bf16.msra.mxu0 %v7146_v15 }
 0x5ed   :  { %6206 = vmatprep.subr.bf16.mxu0 %v6833_v16  ;;  %5690 = vmatprep.mubr.msk.f32.mxu0 %vm6834_vm1, %v6835_v32 }
 0x5ef   :  { %6202 = vmatpush3.bf16.msra.mxu1 %v7210_v31 }
 0x5f0   :  { %6209 = vmatprep.subr.bf16.mxu1 %v6833_v16  ;;  %6208 = vmatpush3.bf16.msra.mxu0 %v7169_v22 }
 0x5f1   :  { %6215 = vmatprep.subr.bf16.mxu0 %v6833_v16 }
 0x5f2   :  { %5680 = vmatmul.mubr.msk.f32.vlgmr.msra.gmra.mrb[28].mxu1 %vm345_vm2, %v1821_v59 }
 0x5f3   :  { %6211 = vmatpush3.bf16.msra.mxu1 %v7222_v34  ;;  %5701 = vmatprep.mubr.msk.f32.mxu1 %vm6834_vm1, %v6835_v32 }
 0x5f4   :  { %6212 = vmatprep.subr.bf16.mxu1 %v6833_v16 }
 0x5f7   :  { %6214 = vmatpush3.bf16.msra.mxu1 %v7237_v37 }
 0x5f8   :  { %6221 = vmatprep.subr.bf16.mxu1 %v6833_v16 }
 0x6bd   :  { %v1893_v60 = vpop.f32.mrb[26].mxu1  ;;  %v1963_v33 = vpop.f32.mrb[28].mxu0 }
 0x6be   :  { %v2039_v62 = vadd.f32 %v2038_v61, %v1893_v60  ;;  %v5659_v63 = vpop.f32.mrb[27].mxu1  ;;  %v5670_v0 = vpop.f32.mrb[29].mxu0  ;;  %v2048_v3 = vadd.f32 %v2047_v2, %v1963_v33  ;;  %v6243_v60 = vpack.c.bf16 %v2562_v58, %v2561_v57  ;;  %v2707_v61 = vld [vmem:[%s7846_s13] sm:$0xff]  ;;  %v2708_v33 = vld [vmem:[%s7846_s13 + $0x8] sm:$0xff] }
 0x6bf   :  { %v6247_v63 = vpack.c.bf16 %v2708_v33, %v2707_v61  ;;  %v2709_v0 = vld [vmem:[%s7846_s13 + $0x10] sm:$0xff]  ;;  %v7484_v2 = vld [vmem:[#allocation2 + $0x8] sm:$0xff] }
 0x6c0   :  { %v5042_v1 = vmul.f32 -1.442695, %v2039_v62  ;;  %v5043_v4 = vmul.f32 -1.442695, %v2048_v3  ;;  %v7470_v62 = vld [vmem:[#allocation2] sm:$0xff]  ;;  %v7490_v3 = vld [vmem:[#allocation2 + $0x10] sm:$0xff] }
 0x6c2   :  { %6480 = vpow2.f32 %v5042_v1 }
 0x6c3   :  { %6482 = vpow2.f32 %v5043_v4  ;;  %v7500_v4 = vld [vmem:[#allocation2 + $0x20] sm:$0xff] }
 0x6c5   :  { %v2033_v5 = vpop.f32.mrb[28].mxu1 }
 0x6c6   :  { %v5681_v6 = vpop.f32.mrb[29].mxu1  ;;  %v2034_v11 = vadd.f32 %v7302_v48, %v2033_v5 }
 0x6cc   :  { %v6481_v7 = vpop.eup %6480 }
 0x6cd   :  { %v2043_v8 = vadd.f32 1.0, %v6481_v7  ;;  %v6483_v9 = vpop.eup %6482  ;;  %v2955_v7 = vld [vmem:[#allocation14] sm:$0xff] }
 0x6ce   :  { %v2052_v10 = vadd.f32 1.0, %v6483_v9  ;;  %v2831_v9 = vld [vmem:[#allocation12] sm:$0xff] }
 0x6cf   :  { %6484 = vrcp.f32 %v2043_v8  ;;  %v2956_v8 = vld [vmem:[#allocation14 + $0x8] sm:$0xff] }
 0x6d0   :  { %6486 = vrcp.f32 %v2052_v10  ;;  %v7525_v10 = vpack.c.bf16 %v2956_v8, %v2955_v7 }
 0x6d9   :  { %v6485_v12 = vpop.eup %6484 }
 0x6da   :  { %v2057_v13 = vmul.f32 %v6485_v12, %v2034_v11  ;;  %v6487_v18 = vpop.eup %6486  ;;  %v2832_v11 = vld [vmem:[#allocation12 + $0x8] sm:$0xff]  ;;  %v2957_v12 = vld [vmem:[#allocation14 + $0x10] sm:$0xff] }
 0x6db   :  { %v2060_v19 = vsub.f32 1.0, %v6487_v18  ;;  %v2062_v23 = vmul.f32 %v6487_v18, %v1821_v59  ;;  %v2833_v18 = vld [vmem:[#allocation12 + $0x10] sm:$0xff] }
 0x6dc   :  { %v2058_v17 = vadd.f32 %v2057_v13, %v2056_v14  ;;  %v2958_v13 = vld [vmem:[#allocation14 + $0x18] sm:$0xff]  ;;  %v6255_v14 = vpack.c.bf16 %v2832_v11, %v2831_v9 }
 0x6de   :  { %6488 = vtanh.f32 %v2058_v17  ;;  %v7528_v17 = vpack.c.bf16 %v2958_v13, %v2957_v12  ;;  %v2540_v12 = vld [vmem:[#allocation5 + $0x38] sm:$0xff] }
 0x6e8   :  { %v6489_v20 = vpop.eup %6488 }
 0x6e9   :  { %v2061_v21 = vmul.f32 %v6489_v20, %v2060_v19  ;;  %v2834_v19 = vld [vmem:[#allocation12 + $0x18] sm:$0xff] }
 0x6ea   :  { %v6259_v20 = vpack.c.bf16 %v2834_v19, %v2833_v18 }
 0x6eb   :  { %v2063_v24 = vadd.f32 %v2062_v23, %v2061_v21  ;;  %v2522_v23 = vld [vmem:[#allocation3 + $0x38] sm:$0xff] }
 0x6ed   :  { %2065 = vst.msk [vmem:[#allocation2 + $0x28] sm:$0xff] %vm345_vm2, %v2063_v24  ;;  %5691 = vmatmul.mubr.msk.f32.vlgmr.msra.gmra.mrb[30].mxu0 %vm345_vm2, %v2063_v24  ;;  %5702 = vmatmul.mubr.msk.f32.vlgmr.msra.gmra.mrb[30].mxu1 %vm345_vm2, %v2063_v24 }
 0x6ee   :  { %6217 = vmatpush3.bf16.msra.mxu0 %v7187_v26  ;;  %5712 = vmatprep.mubr.msk.f32.mxu0 %vm6834_vm1, %v6835_v32 }
 0x6ef   :  { %6218 = vmatprep.subr.bf16.mxu0 %v6833_v16  ;;  %6223 = vmatpush3.bf16.msra.mxu1 %v7146_v15  ;;  %v2559_v15 = vld [vmem:[%s7845_s12] sm:$0xff] }
 0x6f0   :  { %6224 = vmatprep.subr.bf16.mxu1 %v6833_v16  ;;  %5723 = vmatprep.mubr.msk.f32.mxu1 %vm6834_vm1, %v6835_v32 }
 0x6f2   :  { %6220 = vmatpush3.bf16.msra.mxu0 %v7210_v31 }
 0x6f3   :  { %6227 = vmatprep.subr.bf16.mxu0 %v6833_v16  ;;  %6226 = vmatpush3.bf16.msra.mxu1 %v7169_v22  ;;  %v2560_v22 = vld [vmem:[%s7845_s12 + $0x8] sm:$0xff] }
 0x6f4   :  { %6233 = vmatprep.subr.bf16.mxu1 %v6833_v16  ;;  %v6239_v25 = vpack.c.bf16 %v2560_v22, %v2559_v15  ;;  %v7505_v5 = vld [vmem:[#allocation2 + $0x28] sm:$0xff] }
 0x6f5   :  { %5713 = vmatmul.mubr.msk.f32.vlgmr.msra.gmra.mrb[32].mxu0 %vm345_vm2, %v2063_v24 }
 0x6f6   :  { %6229 = vmatpush3.bf16.msra.mxu0 %v7222_v34  ;;  %5734 = vmatprep.mubr.msk.f32.mxu0 %vm6834_vm1, %v6835_v32 }
 0x6f7   :  { %6230 = vmatprep.subr.bf16.mxu0 %v6833_v16 }
 0x6fa   :  { %6232 = vmatpush3.bf16.msra.mxu0 %v7237_v37 }
 0x6fb   :  { %6240 = vmatprep.subr.bf16.mxu0 %v6239_v25 }
 0x7c0   :  { %v2135_v27 = vpop.f32.mrb[30].mxu0  ;;  %v2205_v34 = vpop.f32.mrb[30].mxu1 }
 0x7c1   :  { %v2281_v29 = vadd.f32 %v2280_v28, %v2135_v27  ;;  %v5692_v30 = vpop.f32.mrb[31].mxu0  ;;  %v5703_v35 = vpop.f32.mrb[31].mxu1  ;;  %v2290_v39 = vadd.f32 %v2289_v38, %v2205_v34  ;;  %v2531_v28 = vld [vmem:[#allocation4 + $0x38] sm:$0xff] }
 0x7c3   :  { %v5047_v36 = vmul.f32 -1.442695, %v2281_v29  ;;  %v5048_v37 = vmul.f32 -1.442695, %v2290_v39  ;;  %v7537_v29 = vld [vmem:[%s7851_s18] ss:$0 sm:$0xff] }
 0x7c5   :  { %6490 = vpow2.f32 %v5047_v36 }
 0x7c6   :  { %6492 = vpow2.f32 %v5048_v37 }
 0x7c8   :  { %v2275_v40 = vpop.f32.mrb[32].mxu0 }
 0x7c9   :  { %v5714_v41 = vpop.f32.mrb[33].mxu0  ;;  %v2276_v46 = vadd.f32 %v7302_v48, %v2275_v40 }
 0x7cf   :  { %v6491_v42 = vpop.eup %6490 }
 0x7d0   :  { %v2285_v43 = vadd.f32 1.0, %v6491_v42  ;;  %v6493_v44 = vpop.eup %6492 }
 0x7d1   :  { %v2294_v45 = vadd.f32 1.0, %v6493_v44 }
 0x7d2   :  { %6494 = vrcp.f32 %v2285_v43 }
 0x7d3   :  { %6496 = vrcp.f32 %v2294_v45  ;;  %v7548_v45 = vld [vmem:[%s7852_s19] ss:$0 sm:$0xff] }
 0x7dc   :  { %v6495_v47 = vpop.eup %6494 }
 0x7dd   :  { %v2299_v49 = vmul.f32 %v6495_v47, %v2276_v46  ;;  %v6497_v52 = vpop.eup %6496 }
 0x7de   :  { %v2302_v53 = vsub.f32 1.0, %v6497_v52  ;;  %v2304_v56 = vmul.f32 %v6497_v52, %v2063_v24 }
 0x7df   :  { %v2300_v51 = vadd.f32 %v2299_v49, %v2298_v50 }
 0x7e1   :  { %6498 = vtanh.f32 %v2300_v51 }
 0x7eb   :  { %v6499_v54 = vpop.eup %6498 }
 0x7ec   :  { %v2303_v55 = vmul.f32 %v6499_v54, %v2302_v53 }
 0x7ee   :  { %v7455_v59 = vadd.f32 %v2304_v56, %v2303_v55 }
 0x7f0   :  { %2307 = vst.msk [vmem:[#allocation2 + $0x30] sm:$0xff] %vm345_vm2, %v7455_v59  ;;  %5724 = vmatmul.mubr.msk.f32.vlgmr.msra.gmra.mrb[32].mxu1 %vm345_vm2, %v7455_v59  ;;  %5735 = vmatmul.mubr.msk.f32.vlgmr.msra.gmra.mrb[34].mxu0 %vm345_vm2, %v7455_v59 }
 0x7f1   :  { %6235 = vmatpush3.bf16.msra.mxu1 %v7187_v26  ;;  %6242 = vmatpush3.bf16.msra.mxu0 %v6239_v25  ;;  %v2710_v26 = vld [vmem:[%s7846_s13 + $0x18] sm:$0xff] }
 0x7f2   :  { %5756 = vmatprep.mubr.msk.f32.mxu0 %vm345_vm2, %v7470_v62  ;;  %6236 = vmatprep.subr.bf16.mxu1 %v6833_v16  ;;  %v6251_v1 = vpack.c.bf16 %v2710_v26, %v2709_v0 }
 0x7f3   :  { %6244 = vmatprep.subr.bf16.mxu0 %v6243_v60  ;;  %5745 = vmatprep.mubr.msk.f32.mxu1 %vm6834_vm1, %v6835_v32 }
 0x7f5   :  { %6238 = vmatpush3.bf16.msra.mxu1 %v7210_v31  ;;  %6246 = vmatpush3.bf16.msra.mxu0 %v6243_v60  ;;  %v7496_v31 = vld [vmem:[#allocation2 + $0x18] sm:$0xff] }
 0x7f6   :  { %6248 = vmatprep.subr.bf16.mxu1 %v6247_v63  ;;  %6256 = vmatprep.subr.bf16.mxu0 %v6255_v14 }
 0x7f7   :  { %v7511_v6 = vld [vmem:[#allocation2 + $0x30] sm:$0xff] }
 0x7f8   :  { %5746 = vmatmul.mubr.msk.f32.vlgmr.msra.gmra.mrb[34].mxu1 %vm345_vm2, %v7455_v59  ;;  %5757 = vmatmul.mubr.msk.f32.vlgmr.msra.gmra.mrb[36].mxu0 %vm345_vm2, %v7484_v2 }
 0x7f9   :  { %5759 = vmatprep.mubr.msk.f32.mxu0 %vm345_vm2, %v7490_v3  ;;  %6250 = vmatpush3.bf16.msra.mxu1 %v6247_v63 }
 0x7fa   :  { %5776 = vmatprep.mubr.msk.f32.mxu1 %vm345_vm2, %v7470_v62  ;;  %6252 = vmatprep.subr.bf16.mxu1 %v6251_v1 }
 0x7fb   :  { %6258 = vmatpush3.bf16.msra.mxu0 %v6255_v14 }
 0x7fc   :  { %5760 = vmatmul.mubr.msk.f32.gmra.mrb[38].mxu0 %vm345_vm2, %v7496_v31  ;;  %6260 = vmatprep.subr.bf16.mxu0 %v6259_v20 }
 0x7fd   :  { %5762 = vmatprep.mubr.msk.f32.mxu0 %vm345_vm2, %v7500_v4  ;;  %6254 = vmatpush3.bf16.msra.mxu1 %v6251_v1 }
 0x7fe   :  { %6263 = vmatprep.subr.bf16.mxu1 %v6833_v16 }
 0x7ff   :  { %6262 = vmatpush3.bf16.msra.mxu0 %v6259_v20 }
 0x800   :  { %5763 = vmatmul.mubr.msk.f32.gmra.mrb[40].mxu0 %vm345_vm2, %v7505_v5  ;;  %5777 = vmatmul.mubr.msk.f32.vlgmr.msra.gmra.mrb[36].mxu1 %vm345_vm2, %v7484_v2 }
 0x801   :  { %5765 = vmatprep.mubr.msk.f32.mxu0 %vm345_vm2, %v7511_v6  ;;  %5779 = vmatprep.mubr.msk.f32.mxu1 %vm345_vm2, %v7490_v3 }
 0x802   :  { %6265 = vmatpush3.bf16.msra.mxu1 %v7525_v10  ;;  %6275 = vmatprep.subr.bf16.mxu0 %v6833_v16 }
 0x803   :  { %6266 = vmatprep.subr.bf16.mxu1 %v6833_v16 }
 0x804   :  { %5780 = vmatmul.mubr.msk.f32.gmra.mrb[38].mxu1 %vm345_vm2, %v7496_v31 }
 0x805   :  { %5782 = vmatprep.mubr.msk.f32.mxu1 %vm345_vm2, %v7500_v4 }
 0x806   :  { %6268 = vmatpush3.bf16.msra.mxu1 %v7528_v17 }
 0x807   :  { %6269 = vmatprep.subr.bf16.mxu1 %v6833_v16 }
 0x808   :  { %5783 = vmatmul.mubr.msk.f32.gmra.mrb[40].mxu1 %vm345_vm2, %v7505_v5 }
 0x809   :  { %5785 = vmatprep.mubr.msk.f32.mxu1 %vm345_vm2, %v7511_v6 }
 0x8c3   :  { %v2377_v21 = vpop.f32.mrb[32].mxu1  ;;  %v2447_v24 = vpop.f32.mrb[34].mxu0 }
 0x8c4   :  { %v2523_v15 = vadd.f32 %v2522_v23, %v2377_v21  ;;  %v5725_v22 = vpop.f32.mrb[33].mxu1  ;;  %v5736_v25 = vpop.f32.mrb[35].mxu0  ;;  %v2532_v34 = vadd.f32 %v2531_v28, %v2447_v24  ;;  %v2960_v24 = vld [vmem:[#allocation15 + $0x8] sm:$0xff]  ;;  %v2961_v28 = vld [vmem:[#allocation15 + $0x10] sm:$0xff] }
 0x8c5   :  { %v2963_v22 = vld [vmem:[#allocation17] sm:$0xff]  ;;  %v2964_v25 = vld [vmem:[#allocation17 + $0x8] sm:$0xff] }
 0x8c6   :  { %v5052_v27 = vmul.f32 -1.442695, %v2523_v15  ;;  %v5053_v30 = vmul.f32 -1.442695, %v2532_v34  ;;  %v2962_v34 = vld [vmem:[#allocation15 + $0x18] sm:$0xff] }
 0x8c8   :  { %6500 = vpow2.f32 %v5052_v27 }
 0x8c9   :  { %6502 = vpow2.f32 %v5053_v30  ;;  %v7585_v30 = vpack.c.bf16 %v2964_v25, %v2963_v22 }
 0x8cb   :  { %v2517_v35 = vpop.f32.mrb[34].mxu1  ;;  %v5758_v36 = vpop.f32.mrb[36].mxu0 }
 0x8cc   :  { %v2666_v38 = vadd.f32 %v5758_v36, %v7537_v29  ;;  %v5747_v39 = vpop.f32.mrb[35].mxu1  ;;  %v2660_v37 = vpop.f32.mrb[37].mxu0  ;;  %v2518_v8 = vadd.f32 %v7302_v48, %v2517_v35  ;;  %v2959_v48 = vld [vmem:[#allocation15] sm:$0xff]  ;;  %v2966_v35 = vld [vmem:[#allocation17 + $0x18] sm:$0xff]  ;;  %v7594_v36 = vpack.c.bf16 %v2962_v34, %v2961_v28 }
 0x8cd   :  { %v2661_v40 = vadd.f32 %v7537_v29, %v2660_v37  ;;  %v7583_v27 = vpack.c.bf16 %v2960_v24, %v2959_v48 }
 0x8ce   :  { %2700 = vst.msk [vmem:[#allocation3 + $0x8] sm:$0xff] %vm345_vm2, %v2666_v38 }
 0x8cf   :  { %2699 = vst.msk [vmem:[#allocation3] sm:$0xff] %vm345_vm2, %v2661_v40  ;;  %v5761_v41 = vpop.f32.mrb[38].mxu0  ;;  %v5072_v40 = vld [vmem:[%s7853_s20] ss:$0 sm:$0xff] }
 0x8d0   :  { %v2676_v42 = vadd.f32 %v5761_v41, %v7537_v29  ;;  %v2670_v43 = vpop.f32.mrb[39].mxu0 }
 0x8d1   :  { %v2671_v44 = vadd.f32 %v7537_v29, %v2670_v43 }
 0x8d2   :  { %v6501_v46 = vpop.eup %6500  ;;  %2702 = vst.msk [vmem:[#allocation3 + $0x18] sm:$0xff] %vm345_vm2, %v2676_v42 }
 0x8d3   :  { %v2527_v47 = vadd.f32 1.0, %v6501_v46  ;;  %2701 = vst.msk [vmem:[#allocation3 + $0x10] sm:$0xff] %vm345_vm2, %v2671_v44  ;;  %v5764_v49 = vpop.f32.mrb[40].mxu0  ;;  %v5778_v50 = vpop.f32.mrb[36].mxu1 }
 0x8d4   :  { %v2686_v51 = vadd.f32 %v5764_v49, %v7537_v29  ;;  %v2790_v52 = vadd.f32 %v5778_v50, %v7548_v45  ;;  %v2680_v53 = vpop.f32.mrb[41].mxu0  ;;  %v2784_v54 = vpop.f32.mrb[37].mxu1 }
 0x8d5   :  { %6504 = vrcp.f32 %v2527_v47  ;;  %v2681_v55 = vadd.f32 %v7537_v29, %v2680_v53  ;;  %v2785_v56 = vadd.f32 %v7548_v45, %v2784_v54  ;;  %v6503_v61 = vpop.eup %6502 }
 0x8d6   :  { %2704 = vst.msk [vmem:[#allocation3 + $0x28] sm:$0xff] %vm345_vm2, %v2686_v51  ;;  %2824 = vst.msk [vmem:[#allocation4 + $0x8] sm:$0xff] %vm345_vm2, %v2790_v52  ;;  %v2536_v0 = vadd.f32 1.0, %v6503_v61  ;;  %v3189_v43 = vld [vmem:[#allocation3] sm:$0xff] }
 0x8d7   :  { %2703 = vst.msk [vmem:[#allocation3 + $0x20] sm:$0xff] %vm345_vm2, %v2681_v55  ;;  %2823 = vst.msk [vmem:[#allocation4] sm:$0xff] %vm345_vm2, %v2785_v56  ;;  %v5781_v57 = vpop.f32.mrb[38].mxu1 }
 0x8d8   :  { %v2800_v58 = vadd.f32 %v5781_v57, %v7548_v45  ;;  %v2794_v60 = vpop.f32.mrb[39].mxu1  ;;  %6506 = vrcp.f32 %v2536_v0 }
 0x8d9   :  { %v2795_v33 = vadd.f32 %v7548_v45, %v2794_v60 }
 0x8da   :  { %2826 = vst.msk [vmem:[#allocation4 + $0x18] sm:$0xff] %vm345_vm2, %v2800_v58 }
 0x8db   :  { %2825 = vst.msk [vmem:[#allocation4 + $0x10] sm:$0xff] %vm345_vm2, %v2795_v33  ;;  %v5784_v63 = vpop.f32.mrb[40].mxu1 }
 0x8dc   :  { %v2810_v26 = vadd.f32 %v5784_v63, %v7548_v45  ;;  %v2804_v1 = vpop.f32.mrb[41].mxu1 }
 0x8dd   :  { %v2805_v7 = vadd.f32 %v7548_v45, %v2804_v1 }
 0x8de   :  { %2828 = vst.msk [vmem:[#allocation4 + $0x28] sm:$0xff] %vm345_vm2, %v2810_v26  ;;  %v3197_v55 = vld [vmem:[#allocation4] sm:$0xff] }
 0x8df   :  { %v6505_v9 = vpop.eup %6504  ;;  %2827 = vst.msk [vmem:[#allocation4 + $0x20] sm:$0xff] %vm345_vm2, %v2805_v7 }
 0x8e0   :  { %v2541_v11 = vmul.f32 %v6505_v9, %v2518_v8 }
 0x8e2   :  { %v2542_v13 = vadd.f32 %v2541_v11, %v2540_v12  ;;  %v6507_v14 = vpop.eup %6506 }
 0x8e3   :  { %v2544_v18 = vsub.f32 1.0, %v6507_v14  ;;  %v2546_v20 = vmul.f32 %v6507_v14, %v7455_v59  ;;  %v7581_v59 = vld [vmem:[%s7885_s23 + $0x8] sm:$0xff] }
 0x8e4   :  { %6508 = vtanh.f32 %v2542_v13  ;;  %v7653_v13 = vld [vmem:[#allocation18] ss:$0 sm:$0xff] }
 0x8ee   :  { %v6509_v19 = vpop.eup %6508 }
 0x8ef   :  { %v2545_v21 = vmul.f32 %v6509_v19, %v2544_v18 }
 0x8f1   :  { %v2547_v23 = vadd.f32 %v2546_v20, %v2545_v21 }
 0x8f3   :  { %2549 = vst.msk [vmem:[#allocation2 + $0x38] sm:$0xff] %vm345_vm2, %v2547_v23  ;;  %2550 = vst.msk [vmem:[#allocation21] sm:$0xff] %vm345_vm2, %v2547_v23 }
 0x8fa   :  { %v2558_v15 = vld [vmem:[#allocation2 + $0x38] sm:$0xff] }
 0x8fb   :  { %5766 = vmatmul.mubr.msk.f32.gmra.mrb[42].mxu0 %vm345_vm2, %v2558_v15  ;;  %5786 = vmatmul.mubr.msk.f32.gmra.mrb[42].mxu1 %vm345_vm2, %v2558_v15 }
 0x8fc   :  { %5796 = vmatprep.mubr.msk.f32.mxu0 %vm345_vm2, %v7470_v62  ;;  %5816 = vmatprep.mubr.msk.f32.mxu1 %vm6834_vm1, %v6835_v32  ;;  %v2965_v62 = vld [vmem:[#allocation17 + $0x10] sm:$0xff] }
 0x8ff   :  { %5797 = vmatmul.mubr.msk.f32.vlgmr.msra.gmra.mrb[44].mxu0 %vm345_vm2, %v7484_v2  ;;  %5817 = vmatmul.mubr.msk.f32.vlgmr.msra.gmra.mrb[44].mxu1 %vm345_vm2, %v7581_v59  ;;  %v7600_v2 = vpack.c.bf16 %v2966_v35, %v2965_v62  ;;  %v3426_v62 = vld [vmem:[#allocation3 + $0x8] sm:$0xff] }
 0x900   :  { %6271 = vmatpush3.bf16.msra.mxu1 %v7583_v27  ;;  %5799 = vmatprep.mubr.msk.f32.mxu0 %vm345_vm2, %v7490_v3 }
 0x901   :  { %6272 = vmatprep.subr.bf16.mxu1 %v6833_v16  ;;  %5827 = vmatprep.mubr.msk.f32.mxu1 %vm6834_vm1, %v6835_v32 }
 0x902   :  { %6277 = vmatpush3.bf16.msra.mxu0 %v7585_v30 }
 0x903   :  { %5800 = vmatmul.mubr.msk.f32.gmra.mrb[46].mxu0 %vm345_vm2, %v7496_v31  ;;  %6278 = vmatprep.subr.bf16.mxu0 %v6833_v16 }
 0x904   :  { %6274 = vmatpush3.bf16.msra.mxu1 %v7594_v36  ;;  %5802 = vmatprep.mubr.msk.f32.mxu0 %vm345_vm2, %v7500_v4 }
 0x905   :  { %6281 = vmatprep.subr.bf16.mxu1 %v6833_v16 }
 0x906   :  { %6280 = vmatpush3.bf16.msra.mxu0 %v7600_v2 }
 0x907   :  { %5828 = vmatmul.mubr.msk.f32.vlgmr.msra.gmra.mrb[46].mxu1 %vm345_vm2, %v7581_v59  ;;  %5803 = vmatmul.mubr.msk.f32.gmra.mrb[48].mxu0 %vm345_vm2, %v7505_v5 }
 0x908   :  { %5805 = vmatprep.mubr.msk.f32.mxu0 %vm345_vm2, %v7511_v6  ;;  %6283 = vmatpush3.bf16.msra.mxu1 %v7525_v10 }
 0x909   :  { %6287 = vmatprep.subr.bf16.mxu0 %v6833_v16  ;;  %6284 = vmatprep.subr.bf16.mxu1 %v6833_v16 }
 0x90a   :  { %5849 = vmatprep.mubr.msk.f32.mxu1 %vm6834_vm1, %v6835_v32 }
 0x90b   :  { %5806 = vmatmul.mubr.msk.f32.gmra.mrb[50].mxu0 %vm345_vm2, %v2558_v15 }
 0x90c   :  { %5838 = vmatprep.mubr.msk.f32.mxu0 %vm6834_vm1, %v6835_v32  ;;  %6286 = vmatpush3.bf16.msra.mxu1 %v7528_v17 }
 0x90d   :  { %6293 = vmatprep.subr.bf16.mxu1 %v6833_v16 }
 0x90f   :  { %5839 = vmatmul.mubr.msk.f32.vlgmr.msra.gmra.mrb[52].mxu0 %vm345_vm2, %v7581_v59 }
 0x910   :  { %6289 = vmatpush3.bf16.msra.mxu0 %v7583_v27  ;;  %5860 = vmatprep.mubr.msk.f32.mxu0 %vm6834_vm1, %v6835_v32 }
 0x911   :  { %6290 = vmatprep.subr.bf16.mxu0 %v6833_v16 }
 0x914   :  { %6292 = vmatpush3.bf16.msra.mxu0 %v7594_v36 }
 0x915   :  { %6299 = vmatprep.subr.bf16.mxu0 %v6833_v16 }
 0x9ce   :  { %v5767_v3 = vpop.f32.mrb[42].mxu0  ;;  %v5787_v31 = vpop.f32.mrb[42].mxu1 }
 0x9cf   :  { %v2696_v4 = vadd.f32 %v5767_v3, %v7537_v29  ;;  %v2820_v5 = vadd.f32 %v5787_v31, %v7548_v45  ;;  %v2690_v6 = vpop.f32.mrb[43].mxu0  ;;  %v2814_v38 = vpop.f32.mrb[43].mxu1 }
 0x9d0   :  { %v2691_v39 = vadd.f32 %v7537_v29, %v2690_v6  ;;  %v2815_v37 = vadd.f32 %v7548_v45, %v2814_v38  ;;  %v3434_v6 = vld [vmem:[#allocation4 + $0x8] sm:$0xff] }
 0x9d1   :  { %2706 = vst.msk [vmem:[#allocation3 + $0x38] sm:$0xff] %vm345_vm2, %v2696_v4  ;;  %2830 = vst.msk [vmem:[#allocation4 + $0x38] sm:$0xff] %vm345_vm2, %v2820_v5 }
 0x9d2   :  { %2705 = vst.msk [vmem:[#allocation3 + $0x30] sm:$0xff] %vm345_vm2, %v2691_v39  ;;  %2829 = vst.msk [vmem:[#allocation4 + $0x30] sm:$0xff] %vm345_vm2, %v2815_v37  ;;  %v5798_v41 = vpop.f32.mrb[44].mxu0  ;;  %v3039_v42 = vpop.f32.mrb[44].mxu1 }
 0x9d3   :  { %v2914_v44 = vadd.f32 %v5798_v41, %v5072_v40  ;;  %v3190_v46 = vadd.f32 %v3189_v43, %v3039_v42  ;;  %v2908_v29 = vpop.f32.mrb[45].mxu0  ;;  %v5818_v47 = vpop.f32.mrb[45].mxu1 }
 0x9d4   :  { %v2909_v45 = vadd.f32 %v5072_v40, %v2908_v29 }
 0x9d5   :  { %2948 = vst.msk [vmem:[#allocation5 + $0x8] sm:$0xff] %vm345_vm2, %v2914_v44  ;;  %v5086_v49 = vmul.f32 -1.442695, %v3190_v46 }
 0x9d6   :  { %2947 = vst.msk [vmem:[#allocation5] sm:$0xff] %vm345_vm2, %v2909_v45  ;;  %v5801_v50 = vpop.f32.mrb[46].mxu0 }
 0x9d7   :  { %6510 = vpow2.f32 %v5086_v49  ;;  %v2924_v51 = vadd.f32 %v5801_v50, %v5072_v40  ;;  %v2918_v52 = vpop.f32.mrb[47].mxu0 }
 0x9d8   :  { %v2919_v53 = vadd.f32 %v5072_v40, %v2918_v52 }
 0x9d9   :  { %2950 = vst.msk [vmem:[#allocation5 + $0x18] sm:$0xff] %vm345_vm2, %v2924_v51 }
 0x9da   :  { %2949 = vst.msk [vmem:[#allocation5 + $0x10] sm:$0xff] %vm345_vm2, %v2919_v53  ;;  %v3109_v54 = vpop.f32.mrb[46].mxu1  ;;  %v5804_v56 = vpop.f32.mrb[48].mxu0 }
 0x9db   :  { %v3198_v57 = vadd.f32 %v3197_v55, %v3109_v54  ;;  %v2934_v58 = vadd.f32 %v5804_v56, %v5072_v40  ;;  %v2928_v60 = vpop.f32.mrb[49].mxu0  ;;  %v5829_v61 = vpop.f32.mrb[47].mxu1 }
 0x9dc   :  { %v2929_v33 = vadd.f32 %v5072_v40, %v2928_v60  ;;  %v3442_v45 = vld [vmem:[#allocation5 + $0x8] sm:$0xff] }
 0x9dd   :  { %v5087_v63 = vmul.f32 -1.442695, %v3198_v57  ;;  %2952 = vst.msk [vmem:[#allocation5 + $0x28] sm:$0xff] %vm345_vm2, %v2934_v58  ;;  %v3205_v23 = vld [vmem:[#allocation5] sm:$0xff]  ;;  %v3663_v57 = vld [vmem:[#allocation3 + $0x10] sm:$0xff] }
 0x9de   :  { %2951 = vst.msk [vmem:[#allocation5 + $0x20] sm:$0xff] %vm345_vm2, %v2929_v33  ;;  %v5807_v0 = vpop.f32.mrb[50].mxu0 }
 0x9df   :  { %6512 = vpow2.f32 %v5087_v63  ;;  %v2944_v26 = vadd.f32 %v5807_v0, %v5072_v40  ;;  %v2938_v1 = vpop.f32.mrb[51].mxu0  ;;  %v3671_v0 = vld [vmem:[#allocation4 + $0x10] sm:$0xff] }
 0x9e0   :  { %v2939_v7 = vadd.f32 %v5072_v40, %v2938_v1 }
 0x9e1   :  { %v6511_v8 = vpop.eup %6510  ;;  %2954 = vst.msk [vmem:[#allocation5 + $0x38] sm:$0xff] %vm345_vm2, %v2944_v26 }
 0x9e2   :  { %v3194_v9 = vadd.f32 1.0, %v6511_v8  ;;  %2953 = vst.msk [vmem:[#allocation5 + $0x30] sm:$0xff] %vm345_vm2, %v2939_v7  ;;  %v3185_v11 = vpop.f32.mrb[52].mxu0 }
 0x9e3   :  { %v5840_v12 = vpop.f32.mrb[53].mxu0  ;;  %v3186_v19 = vadd.f32 %v7653_v13, %v3185_v11 }
 0x9e4   :  { %6514 = vrcp.f32 %v3194_v9 }
 0x9e9   :  { %v6513_v14 = vpop.eup %6512 }
 0x9ea   :  { %v3202_v18 = vadd.f32 1.0, %v6513_v14 }
 0x9ec   :  { %6516 = vrcp.f32 %v3202_v18 }
 0x9ee   :  { %v6515_v20 = vpop.eup %6514 }
 0x9ef   :  { %v3206_v21 = vmul.f32 %v6515_v20, %v3186_v19 }
 0x9f1   :  { %v3207_v48 = vadd.f32 %v3206_v21, %v3205_v23  ;;  %v3679_v21 = vld [vmem:[#allocation5 + $0x10] sm:$0xff] }
 0x9f3   :  { %6518 = vtanh.f32 %v3207_v48 }
 0x9f6   :  { %v6517_v24 = vpop.eup %6516 }
 0x9f7   :  { %v3209_v15 = vsub.f32 1.0, %v6517_v24  ;;  %v3211_v28 = vmul.f32 %v6517_v24, %v7581_v59 }
 0x9fd   :  { %v6519_v22 = vpop.eup %6518 }
 0x9fe   :  { %v3210_v25 = vmul.f32 %v6519_v22, %v3209_v15 }
 0xa00   :  { %v3212_v34 = vadd.f32 %v3211_v28, %v3210_v25 }
 0xa02   :  { %5850 = vmatmul.mubr.msk.f32.vlgmr.msra.gmra.mrb[48].mxu1 %vm345_vm2, %v3212_v34  ;;  %5861 = vmatmul.mubr.msk.f32.vlgmr.msra.gmra.mrb[54].mxu0 %vm345_vm2, %v3212_v34 }
 0xa03   :  { %6295 = vmatpush3.bf16.msra.mxu1 %v7585_v30  ;;  %5871 = vmatprep.mubr.msk.f32.mxu1 %vm6834_vm1, %v6835_v32 }
 0xa04   :  { %6296 = vmatprep.subr.bf16.mxu1 %v6833_v16  ;;  %6301 = vmatpush3.bf16.msra.mxu0 %v7525_v10 }
 0xa05   :  { %6302 = vmatprep.subr.bf16.mxu0 %v6833_v16  ;;  %5882 = vmatprep.mubr.msk.f32.mxu0 %vm6834_vm1, %v6835_v32 }
 0xa07   :  { %6298 = vmatpush3.bf16.msra.mxu1 %v7600_v2 }
 0xa08   :  { %6305 = vmatprep.subr.bf16.mxu1 %v6833_v16  ;;  %6304 = vmatpush3.bf16.msra.mxu0 %v7528_v17 }
 0xa09   :  { %6311 = vmatprep.subr.bf16.mxu0 %v6833_v16 }
 0xa0a   :  { %5872 = vmatmul.mubr.msk.f32.vlgmr.msra.gmra.mrb[50].mxu1 %vm345_vm2, %v3212_v34 }
 0xa0b   :  { %6307 = vmatpush3.bf16.msra.mxu1 %v7583_v27  ;;  %5893 = vmatprep.mubr.msk.f32.mxu1 %vm6834_vm1, %v6835_v32 }
 0xa0c   :  { %6308 = vmatprep.subr.bf16.mxu1 %v6833_v16 }
 0xa0f   :  { %6310 = vmatpush3.bf16.msra.mxu1 %v7594_v36 }
 0xa10   :  { %6317 = vmatprep.subr.bf16.mxu1 %v6833_v16 }
 0xad5   :  { %v3282_v59 = vpop.f32.mrb[48].mxu1  ;;  %v3352_v35 = vpop.f32.mrb[54].mxu0 }
 0xad6   :  { %v3427_v3 = vadd.f32 %v3426_v62, %v3282_v59  ;;  %v5851_v31 = vpop.f32.mrb[49].mxu1  ;;  %v5862_v4 = vpop.f32.mrb[55].mxu0  ;;  %v3435_v38 = vadd.f32 %v3434_v6, %v3352_v35  ;;  %v3900_v59 = vld [vmem:[#allocation3 + $0x18] sm:$0xff] }
 0xad8   :  { %v5091_v5 = vmul.f32 -1.442695, %v3427_v3  ;;  %v5092_v39 = vmul.f32 -1.442695, %v3435_v38 }
 0xada   :  { %6520 = vpow2.f32 %v5091_v5  ;;  %v3908_v5 = vld [vmem:[#allocation4 + $0x18] sm:$0xff] }
 0xadb   :  { %6522 = vpow2.f32 %v5092_v39 }
 0xadd   :  { %v3422_v37 = vpop.f32.mrb[50].mxu1 }
 0xade   :  { %v5873_v40 = vpop.f32.mrb[51].mxu1  ;;  %v3423_v46 = vadd.f32 %v7653_v13, %v3422_v37 }
 0xae4   :  { %v6521_v41 = vpop.eup %6520 }
 0xae5   :  { %v3431_v42 = vadd.f32 1.0, %v6521_v41  ;;  %v6523_v43 = vpop.eup %6522 }
 0xae6   :  { %v3439_v44 = vadd.f32 1.0, %v6523_v43 }
 0xae7   :  { %6524 = vrcp.f32 %v3431_v42 }
 0xae8   :  { %6526 = vrcp.f32 %v3439_v44 }
 0xaf1   :  { %v6525_v29 = vpop.eup %6524 }
 0xaf2   :  { %v3443_v47 = vmul.f32 %v6525_v29, %v3423_v46  ;;  %v6527_v50 = vpop.eup %6526 }
 0xaf3   :  { %v3446_v51 = vsub.f32 1.0, %v6527_v50  ;;  %v3448_v54 = vmul.f32 %v6527_v50, %v3212_v34 }
 0xaf4   :  { %v3444_v49 = vadd.f32 %v3443_v47, %v3442_v45  ;;  %v3916_v47 = vld [vmem:[#allocation5 + $0x18] sm:$0xff] }
 0xaf6   :  { %6528 = vtanh.f32 %v3444_v49 }
 0xb00   :  { %v6529_v52 = vpop.eup %6528 }
 0xb01   :  { %v3447_v53 = vmul.f32 %v6529_v52, %v3446_v51 }
 0xb03   :  { %v3449_v55 = vadd.f32 %v3448_v54, %v3447_v53 }
 0xb05   :  { %5883 = vmatmul.mubr.msk.f32.vlgmr.msra.gmra.mrb[56].mxu0 %vm345_vm2, %v3449_v55  ;;  %5894 = vmatmul.mubr.msk.f32.vlgmr.msra.gmra.mrb[52].mxu1 %vm345_vm2, %v3449_v55 }
 0xb06   :  { %6313 = vmatpush3.bf16.msra.mxu0 %v7585_v30  ;;  %5904 = vmatprep.mubr.msk.f32.mxu0 %vm6834_vm1, %v6835_v32 }
 0xb07   :  { %6314 = vmatprep.subr.bf16.mxu0 %v6833_v16  ;;  %6319 = vmatpush3.bf16.msra.mxu1 %v7525_v10 }
 0xb08   :  { %6320 = vmatprep.subr.bf16.mxu1 %v6833_v16  ;;  %5915 = vmatprep.mubr.msk.f32.mxu1 %vm6834_vm1, %v6835_v32 }
 0xb0a   :  { %6316 = vmatpush3.bf16.msra.mxu0 %v7600_v2 }
 0xb0b   :  { %6323 = vmatprep.subr.bf16.mxu0 %v6833_v16  ;;  %6322 = vmatpush3.bf16.msra.mxu1 %v7528_v17 }
 0xb0c   :  { %6329 = vmatprep.subr.bf16.mxu1 %v6833_v16 }
 0xb0d   :  { %5905 = vmatmul.mubr.msk.f32.vlgmr.msra.gmra.mrb[58].mxu0 %vm345_vm2, %v3449_v55 }
 0xb0e   :  { %6325 = vmatpush3.bf16.msra.mxu0 %v7583_v27  ;;  %5926 = vmatprep.mubr.msk.f32.mxu0 %vm6834_vm1, %v6835_v32 }
 0xb0f   :  { %6326 = vmatprep.subr.bf16.mxu0 %v6833_v16 }
 0xb12   :  { %6328 = vmatpush3.bf16.msra.mxu0 %v7594_v36 }
 0xb13   :  { %6335 = vmatprep.subr.bf16.mxu0 %v6833_v16 }
 0xbd8   :  { %v3519_v56 = vpop.f32.mrb[56].mxu0  ;;  %v3589_v58 = vpop.f32.mrb[52].mxu1 }
 0xbd9   :  { %v3664_v60 = vadd.f32 %v3663_v57, %v3519_v56  ;;  %v5884_v61 = vpop.f32.mrb[57].mxu0  ;;  %v5895_v33 = vpop.f32.mrb[53].mxu1  ;;  %v3672_v26 = vadd.f32 %v3671_v0, %v3589_v58  ;;  %v4137_v56 = vld [vmem:[#allocation3 + $0x20] sm:$0xff] }
 0xbdb   :  { %v5096_v63 = vmul.f32 -1.442695, %v3664_v60  ;;  %v5097_v1 = vmul.f32 -1.442695, %v3672_v26 }
 0xbdd   :  { %6530 = vpow2.f32 %v5096_v63  ;;  %v4145_v63 = vld [vmem:[#allocation4 + $0x20] sm:$0xff] }
 0xbde   :  { %6532 = vpow2.f32 %v5097_v1 }
 0xbe0   :  { %v3659_v7 = vpop.f32.mrb[58].mxu0 }
 0xbe1   :  { %v5906_v8 = vpop.f32.mrb[59].mxu0  ;;  %v3660_v18 = vadd.f32 %v7653_v13, %v3659_v7 }
 0xbe7   :  { %v6531_v9 = vpop.eup %6530 }
 0xbe8   :  { %v3668_v11 = vadd.f32 1.0, %v6531_v9  ;;  %v6533_v12 = vpop.eup %6532 }
 0xbe9   :  { %v3676_v14 = vadd.f32 1.0, %v6533_v12 }
 0xbea   :  { %6534 = vrcp.f32 %v3668_v11 }
 0xbeb   :  { %6536 = vrcp.f32 %v3676_v14 }
 0xbf4   :  { %v6535_v19 = vpop.eup %6534 }
 0xbf5   :  { %v3680_v20 = vmul.f32 %v6535_v19, %v3660_v18  ;;  %v6537_v48 = vpop.eup %6536 }
 0xbf6   :  { %v3683_v24 = vsub.f32 1.0, %v6537_v48  ;;  %v3685_v25 = vmul.f32 %v6537_v48, %v3449_v55 }
 0xbf7   :  { %v3681_v23 = vadd.f32 %v3680_v20, %v3679_v21  ;;  %v4153_v20 = vld [vmem:[#allocation5 + $0x20] sm:$0xff] }
 0xbf9   :  { %6538 = vtanh.f32 %v3681_v23 }
 0xc03   :  { %v6539_v15 = vpop.eup %6538 }
 0xc04   :  { %v3684_v22 = vmul.f32 %v6539_v15, %v3683_v24 }
 0xc06   :  { %v3686_v28 = vadd.f32 %v3685_v25, %v3684_v22 }
 0xc08   :  { %5916 = vmatmul.mubr.msk.f32.vlgmr.msra.gmra.mrb[54].mxu1 %vm345_vm2, %v3686_v28  ;;  %5927 = vmatmul.mubr.msk.f32.vlgmr.msra.gmra.mrb[60].mxu0 %vm345_vm2, %v3686_v28 }
 0xc09   :  { %6331 = vmatpush3.bf16.msra.mxu1 %v7585_v30  ;;  %5937 = vmatprep.mubr.msk.f32.mxu1 %vm6834_vm1, %v6835_v32 }
 0xc0a   :  { %6332 = vmatprep.subr.bf16.mxu1 %v6833_v16  ;;  %6337 = vmatpush3.bf16.msra.mxu0 %v7525_v10 }
 0xc0b   :  { %6338 = vmatprep.subr.bf16.mxu0 %v6833_v16  ;;  %5948 = vmatprep.mubr.msk.f32.mxu0 %vm6834_vm1, %v6835_v32 }
 0xc0d   :  { %6334 = vmatpush3.bf16.msra.mxu1 %v7600_v2 }
 0xc0e   :  { %6341 = vmatprep.subr.bf16.mxu1 %v6833_v16  ;;  %6340 = vmatpush3.bf16.msra.mxu0 %v7528_v17 }
 0xc0f   :  { %6347 = vmatprep.subr.bf16.mxu0 %v6833_v16 }
 0xc10   :  { %5938 = vmatmul.mubr.msk.f32.vlgmr.msra.gmra.mrb[56].mxu1 %vm345_vm2, %v3686_v28 }
 0xc11   :  { %6343 = vmatpush3.bf16.msra.mxu1 %v7583_v27  ;;  %5959 = vmatprep.mubr.msk.f32.mxu1 %vm6834_vm1, %v6835_v32 }
 0xc12   :  { %6344 = vmatprep.subr.bf16.mxu1 %v6833_v16 }
 0xc15   :  { %6346 = vmatpush3.bf16.msra.mxu1 %v7594_v36 }
 0xc16   :  { %6353 = vmatprep.subr.bf16.mxu1 %v6833_v16 }
 0xcdb   :  { %v3756_v34 = vpop.f32.mrb[54].mxu1  ;;  %v3826_v62 = vpop.f32.mrb[60].mxu0 }
 0xcdc   :  { %v3901_v35 = vadd.f32 %v3900_v59, %v3756_v34  ;;  %v5917_v3 = vpop.f32.mrb[55].mxu1  ;;  %v5928_v31 = vpop.f32.mrb[61].mxu0  ;;  %v3909_v6 = vadd.f32 %v3908_v5, %v3826_v62  ;;  %v4374_v34 = vld [vmem:[#allocation3 + $0x28] sm:$0xff] }
 0xcde   :  { %v5101_v4 = vmul.f32 -1.442695, %v3901_v35  ;;  %v5102_v38 = vmul.f32 -1.442695, %v3909_v6 }
 0xce0   :  { %6540 = vpow2.f32 %v5101_v4  ;;  %v4382_v4 = vld [vmem:[#allocation4 + $0x28] sm:$0xff] }
 0xce1   :  { %6542 = vpow2.f32 %v5102_v38 }
 0xce3   :  { %v3896_v39 = vpop.f32.mrb[56].mxu1 }
 0xce4   :  { %v5939_v37 = vpop.f32.mrb[57].mxu1  ;;  %v3897_v44 = vadd.f32 %v7653_v13, %v3896_v39 }
 0xcea   :  { %v6541_v40 = vpop.eup %6540 }
 0xceb   :  { %v3905_v41 = vadd.f32 1.0, %v6541_v40  ;;  %v6543_v42 = vpop.eup %6542 }
 0xcec   :  { %v3913_v43 = vadd.f32 1.0, %v6543_v42 }
 0xced   :  { %6544 = vrcp.f32 %v3905_v41 }
 0xcee   :  { %6546 = vrcp.f32 %v3913_v43 }
 0xcf7   :  { %v6545_v46 = vpop.eup %6544 }
 0xcf8   :  { %v3917_v29 = vmul.f32 %v6545_v46, %v3897_v44  ;;  %v6547_v49 = vpop.eup %6546 }
 0xcf9   :  { %v3920_v50 = vsub.f32 1.0, %v6547_v49  ;;  %v3922_v53 = vmul.f32 %v6547_v49, %v3686_v28 }
 0xcfa   :  { %v3918_v45 = vadd.f32 %v3917_v29, %v3916_v47  ;;  %v4390_v29 = vld [vmem:[#allocation5 + $0x28] sm:$0xff] }
 0xcfc   :  { %6548 = vtanh.f32 %v3918_v45 }
 0xd06   :  { %v6549_v51 = vpop.eup %6548 }
 0xd07   :  { %v3921_v52 = vmul.f32 %v6549_v51, %v3920_v50 }
 0xd09   :  { %v3923_v54 = vadd.f32 %v3922_v53, %v3921_v52 }
 0xd0b   :  { %5949 = vmatmul.mubr.msk.f32.vlgmr.msra.gmra.mrb[62].mxu0 %vm345_vm2, %v3923_v54  ;;  %5960 = vmatmul.mubr.msk.f32.vlgmr.msra.gmra.mrb[58].mxu1 %vm345_vm2, %v3923_v54 }
 0xd0c   :  { %6349 = vmatpush3.bf16.msra.mxu0 %v7585_v30  ;;  %5970 = vmatprep.mubr.msk.f32.mxu0 %vm6834_vm1, %v6835_v32 }
 0xd0d   :  { %6350 = vmatprep.subr.bf16.mxu0 %v6833_v16  ;;  %6355 = vmatpush3.bf16.msra.mxu1 %v7525_v10 }
 0xd0e   :  { %6356 = vmatprep.subr.bf16.mxu1 %v6833_v16  ;;  %5981 = vmatprep.mubr.msk.f32.mxu1 %vm6834_vm1, %v6835_v32 }
 0xd10   :  { %6352 = vmatpush3.bf16.msra.mxu0 %v7600_v2 }
 0xd11   :  { %6359 = vmatprep.subr.bf16.mxu0 %v6833_v16  ;;  %6358 = vmatpush3.bf16.msra.mxu1 %v7528_v17 }
 0xd12   :  { %6365 = vmatprep.subr.bf16.mxu1 %v6833_v16 }
 0xd13   :  { %5971 = vmatmul.mubr.msk.f32.vlgmr.msra.gmra.mrb[64].mxu0 %vm345_vm2, %v3923_v54 }
 0xd14   :  { %6361 = vmatpush3.bf16.msra.mxu0 %v7583_v27  ;;  %5992 = vmatprep.mubr.msk.f32.mxu0 %vm6834_vm1, %v6835_v32 }
 0xd15   :  { %6362 = vmatprep.subr.bf16.mxu0 %v6833_v16 }
 0xd18   :  { %6364 = vmatpush3.bf16.msra.mxu0 %v7594_v36 }
 0xd19   :  { %6371 = vmatprep.subr.bf16.mxu0 %v6833_v16 }
 0xdde   :  { %v3993_v55 = vpop.f32.mrb[62].mxu0  ;;  %v4063_v57 = vpop.f32.mrb[58].mxu1 }
 0xddf   :  { %v4138_v58 = vadd.f32 %v4137_v56, %v3993_v55  ;;  %v5950_v60 = vpop.f32.mrb[63].mxu0  ;;  %v5961_v61 = vpop.f32.mrb[59].mxu1  ;;  %v4146_v0 = vadd.f32 %v4145_v63, %v4063_v57 }
 0xde0   :  { %v4619_v60 = vld [vmem:[#allocation4 + $0x30] sm:$0xff] }
 0xde1   :  { %v5106_v33 = vmul.f32 -1.442695, %v4138_v58  ;;  %v5107_v26 = vmul.f32 -1.442695, %v4146_v0 }
 0xde3   :  { %6550 = vpow2.f32 %v5106_v33 }
 0xde4   :  { %6552 = vpow2.f32 %v5107_v26 }
 0xde6   :  { %v4133_v1 = vpop.f32.mrb[64].mxu0 }
 0xde7   :  { %v5972_v7 = vpop.f32.mrb[65].mxu0  ;;  %v4134_v14 = vadd.f32 %v7653_v13, %v4133_v1 }
 0xded   :  { %v6551_v8 = vpop.eup %6550 }
 0xdee   :  { %v4142_v9 = vadd.f32 1.0, %v6551_v8  ;;  %v6553_v11 = vpop.eup %6552 }
 0xdef   :  { %v4150_v12 = vadd.f32 1.0, %v6553_v11  ;;  %v4627_v11 = vld [vmem:[#allocation5 + $0x30] sm:$0xff] }
 0xdf0   :  { %6554 = vrcp.f32 %v4142_v9 }
 0xdf1   :  { %6556 = vrcp.f32 %v4150_v12 }
 0xdfa   :  { %v6555_v18 = vpop.eup %6554 }
 0xdfb   :  { %v4154_v19 = vmul.f32 %v6555_v18, %v4134_v14  ;;  %v6557_v23 = vpop.eup %6556 }
 0xdfc   :  { %v4157_v48 = vsub.f32 1.0, %v6557_v23  ;;  %v4159_v22 = vmul.f32 %v6557_v23, %v3923_v54  ;;  %v4611_v54 = vld [vmem:[#allocation3 + $0x30] sm:$0xff] }
 0xdfd   :  { %v4155_v21 = vadd.f32 %v4154_v19, %v4153_v20 }
 0xdff   :  { %6558 = vtanh.f32 %v4155_v21 }
 0xe09   :  { %v6559_v24 = vpop.eup %6558 }
 0xe0a   :  { %v4158_v15 = vmul.f32 %v6559_v24, %v4157_v48  ;;  %v4875_v48 = vld [vmem:[%s7855_s22] sm:$0xff]  ;;  %v4877_v24 = vld [vmem:[%s7855_s22 + $0x10] sm:$0xff] }
 0xe0c   :  { %v4160_v25 = vadd.f32 %v4159_v22, %v4158_v15 }
 0xe0e   :  { %5982 = vmatmul.mubr.msk.f32.vlgmr.msra.gmra.mrb[60].mxu1 %vm345_vm2, %v4160_v25  ;;  %5993 = vmatmul.mubr.msk.f32.vlgmr.msra.gmra.mrb[66].mxu0 %vm345_vm2, %v4160_v25 }
 0xe0f   :  { %6367 = vmatpush3.bf16.msra.mxu1 %v7585_v30  ;;  %6003 = vmatprep.mubr.msk.f32.mxu1 %vm6834_vm1, %v6835_v32 }
 0xe10   :  { %6368 = vmatprep.subr.bf16.mxu1 %v6833_v16  ;;  %6373 = vmatpush3.bf16.msra.mxu0 %v7525_v10 }
 0xe11   :  { %6374 = vmatprep.subr.bf16.mxu0 %v6833_v16  ;;  %6014 = vmatprep.mubr.msk.f32.mxu0 %vm6834_vm1, %v6835_v32 }
 0xe13   :  { %6370 = vmatpush3.bf16.msra.mxu1 %v7600_v2 }
 0xe14   :  { %6377 = vmatprep.subr.bf16.mxu1 %v6833_v16  ;;  %6376 = vmatpush3.bf16.msra.mxu0 %v7528_v17 }
 0xe15   :  { %6383 = vmatprep.subr.bf16.mxu0 %v6833_v16 }
 0xe16   :  { %6004 = vmatmul.mubr.msk.f32.vlgmr.msra.gmra.mrb[62].mxu1 %vm345_vm2, %v4160_v25 }
 0xe17   :  { %6379 = vmatpush3.bf16.msra.mxu1 %v7583_v27  ;;  %6025 = vmatprep.mubr.msk.f32.mxu1 %vm6834_vm1, %v6835_v32 }
 0xe18   :  { %6380 = vmatprep.subr.bf16.mxu1 %v6833_v16 }
 0xe1b   :  { %6382 = vmatpush3.bf16.msra.mxu1 %v7594_v36 }
 0xe1c   :  { %6389 = vmatprep.subr.bf16.mxu1 %v6833_v16 }
 0xee1   :  { %v4230_v28 = vpop.f32.mrb[60].mxu1  ;;  %v4300_v59 = vpop.f32.mrb[66].mxu0 }
 0xee2   :  { %v4375_v62 = vadd.f32 %v4374_v34, %v4230_v28  ;;  %v5983_v35 = vpop.f32.mrb[61].mxu1  ;;  %v5994_v3 = vpop.f32.mrb[67].mxu0  ;;  %v4383_v5 = vadd.f32 %v4382_v4, %v4300_v59 }
 0xee3   :  { %v4856_v3 = vld [vmem:[#allocation4 + $0x38] sm:$0xff] }
 0xee4   :  { %v5111_v31 = vmul.f32 -1.442695, %v4375_v62  ;;  %v5112_v6 = vmul.f32 -1.442695, %v4383_v5 }
 0xee6   :  { %6560 = vpow2.f32 %v5111_v31 }
 0xee7   :  { %6562 = vpow2.f32 %v5112_v6 }
 0xee9   :  { %v4370_v38 = vpop.f32.mrb[62].mxu1 }
 0xeea   :  { %v6005_v39 = vpop.f32.mrb[63].mxu1  ;;  %v4371_v43 = vadd.f32 %v7653_v13, %v4370_v38 }
 0xef0   :  { %v6561_v37 = vpop.eup %6560 }
 0xef1   :  { %v4379_v40 = vadd.f32 1.0, %v6561_v37  ;;  %v6563_v41 = vpop.eup %6562 }
 0xef2   :  { %v4387_v42 = vadd.f32 1.0, %v6563_v41 }
 0xef3   :  { %6564 = vrcp.f32 %v4379_v40 }
 0xef4   :  { %6566 = vrcp.f32 %v4387_v42 }
 0xefd   :  { %v6565_v44 = vpop.eup %6564 }
 0xefe   :  { %v4391_v46 = vmul.f32 %v6565_v44, %v4371_v43  ;;  %v6567_v45 = vpop.eup %6566  ;;  %v4864_v43 = vld [vmem:[#allocation5 + $0x38] sm:$0xff] }
 0xeff   :  { %v4394_v49 = vsub.f32 1.0, %v6567_v45  ;;  %v4396_v52 = vmul.f32 %v6567_v45, %v4160_v25  ;;  %v4848_v25 = vld [vmem:[#allocation3 + $0x38] sm:$0xff] }
 0xf00   :  { %v4392_v47 = vadd.f32 %v4391_v46, %v4390_v29 }
 0xf02   :  { %6568 = vtanh.f32 %v4392_v47 }
 0xf0c   :  { %v6569_v50 = vpop.eup %6568 }
 0xf0d   :  { %v4395_v51 = vmul.f32 %v6569_v50, %v4394_v49 }
 0xf0f   :  { %v4397_v53 = vadd.f32 %v4396_v52, %v4395_v51 }
 0xf11   :  { %6015 = vmatmul.mubr.msk.f32.vlgmr.msra.gmra.mrb[68].mxu0 %vm345_vm2, %v4397_v53  ;;  %6026 = vmatmul.mubr.msk.f32.vlgmr.msra.gmra.mrb[64].mxu1 %vm345_vm2, %v4397_v53 }
 0xf12   :  { %6385 = vmatpush3.bf16.msra.mxu0 %v7585_v30  ;;  %6036 = vmatprep.mubr.msk.f32.mxu0 %vm6834_vm1, %v6835_v32 }
 0xf13   :  { %6386 = vmatprep.subr.bf16.mxu0 %v6833_v16  ;;  %6391 = vmatpush3.bf16.msra.mxu1 %v7525_v10 }
 0xf14   :  { %6392 = vmatprep.subr.bf16.mxu1 %v6833_v16  ;;  %6047 = vmatprep.mubr.msk.f32.mxu1 %vm6834_vm1, %v6835_v32 }
 0xf16   :  { %6388 = vmatpush3.bf16.msra.mxu0 %v7600_v2 }
 0xf17   :  { %6395 = vmatprep.subr.bf16.mxu0 %v6833_v16  ;;  %6394 = vmatpush3.bf16.msra.mxu1 %v7528_v17 }
 0xf18   :  { %6401 = vmatprep.subr.bf16.mxu1 %v6833_v16 }
 0xf19   :  { %6037 = vmatmul.mubr.msk.f32.vlgmr.msra.gmra.mrb[70].mxu0 %vm345_vm2, %v4397_v53 }
 0xf1a   :  { %6397 = vmatpush3.bf16.msra.mxu0 %v7583_v27  ;;  %6058 = vmatprep.mubr.msk.f32.mxu0 %vm6834_vm1, %v6835_v32 }
 0xf1b   :  { %6398 = vmatprep.subr.bf16.mxu0 %v6833_v16 }
 0xf1e   :  { %6400 = vmatpush3.bf16.msra.mxu0 %v7594_v36 }
 0xf1f   :  { %6407 = vmatprep.subr.bf16.mxu0 %v6833_v16 }
 0xfe4   :  { %v4467_v10 = vpop.f32.mrb[68].mxu0  ;;  %v4537_v55 = vpop.f32.mrb[64].mxu1 }
 0xfe5   :  { %v4612_v56 = vadd.f32 %v4611_v54, %v4467_v10  ;;  %v6016_v17 = vpop.f32.mrb[69].mxu0  ;;  %v6027_v57 = vpop.f32.mrb[65].mxu1  ;;  %v4620_v61 = vadd.f32 %v4619_v60, %v4537_v55 }
 0xfe7   :  { %v5116_v58 = vmul.f32 -1.442695, %v4612_v56  ;;  %v5117_v27 = vmul.f32 -1.442695, %v4620_v61 }
 0xfe9   :  { %6570 = vpow2.f32 %v5116_v58 }
 0xfea   :  { %6572 = vpow2.f32 %v5117_v27 }
 0xfec   :  { %v4607_v33 = vpop.f32.mrb[70].mxu0 }
 0xfed   :  { %v6038_v63 = vpop.f32.mrb[71].mxu0  ;;  %v4608_v7 = vadd.f32 %v7653_v13, %v4607_v33 }
 0xff3   :  { %v6571_v0 = vpop.eup %6570 }
 0xff4   :  { %v4616_v26 = vadd.f32 1.0, %v6571_v0  ;;  %v6573_v36 = vpop.eup %6572 }
 0xff5   :  { %v4624_v1 = vadd.f32 1.0, %v6573_v36 }
 0xff6   :  { %6574 = vrcp.f32 %v4616_v26 }
 0xff7   :  { %6576 = vrcp.f32 %v4624_v1 }
0x1000   :  { %v6575_v8 = vpop.eup %6574 }
0x1001   :  { %v4628_v9 = vmul.f32 %v6575_v8, %v4608_v7  ;;  %v6577_v14 = vpop.eup %6576 }
0x1002   :  { %v4631_v18 = vsub.f32 1.0, %v6577_v14  ;;  %v4633_v21 = vmul.f32 %v6577_v14, %v4397_v53 }
0x1003   :  { %v4629_v12 = vadd.f32 %v4628_v9, %v4627_v11 }
0x1005   :  { %6578 = vtanh.f32 %v4629_v12 }
0x100f   :  { %v6579_v19 = vpop.eup %6578 }
0x1010   :  { %v4632_v20 = vmul.f32 %v6579_v19, %v4631_v18 }
0x1012   :  { %v4634_v23 = vadd.f32 %v4633_v21, %v4632_v20 }
0x1014   :  { %6048 = vmatmul.mubr.msk.f32.vlgmr.msra.gmra.mrb[66].mxu1 %vm345_vm2, %v4634_v23  ;;  %6059 = vmatmul.mubr.msk.f32.vlgmr.msra.gmra.mrb[72].mxu0 %vm345_vm2, %v4634_v23 }
0x1015   :  { %6403 = vmatpush3.bf16.msra.mxu1 %v7585_v30  ;;  %6069 = vmatprep.mubr.msk.f32.mxu1 %vm6834_vm1, %v6835_v32  ;;  %v4876_v30 = vld [vmem:[%s7855_s22 + $0x8] sm:$0xff] }
0x1016   :  { %6404 = vmatprep.subr.bf16.mxu1 %v6833_v16  ;;  %6080 = vmatprep.mubr.msk.f32.mxu0 %vm6834_vm1, %v6835_v32  ;;  %v6408_v15 = vpack.c.bf16 %v4876_v30, %v4875_v48  ;;  %v4878_v32 = vld [vmem:[%s7855_s22 + $0x18] sm:$0xff]  ;;  %s6836_s22 = smov [#allocation21]  }
0x1017   :  { %s4968_s21 = sshll.u32 %s6836_s22, 4  ;;  %s4969_s21 = int_to_ptr.vmem [resolvable:$true] %s4968_s21 }
0x1018   :  { %6409 = vmatpush3.bf16.msra.mxu0 %v6408_v15  ;;  %s6788_s28 = scalar_lea.vmem %s4969_s21, 256  ;;  %p6793_p3 = scmp.lt.s32.totalorder %s4969_s21, %s4969_s21 }
0x1019   :  { %6406 = vmatpush3.bf16.msra.mxu1 %v7600_v2  ;;  %v6411_v2 = vpack.c.bf16 %v4878_v32, %v4877_v24  ;;  %6410 = vmatprep.subr.bf16.mxu0 %v6833_v16  ;;  %p6789_p2 = scmp.ne.s32.totalorder %s4969_s21, %s6788_s28  ;;  %p6794_p4 = scmp.lt.s32.totalorder %s6788_s28, %s6788_s28 }
0x101b   :  { %p6795_p5 = por %p6794_p4, %p6793_p3 }
0x101c   :  { %6070 = vmatmul.mubr.msk.f32.vlgmr.msra.gmra.mrb[68].mxu1 %vm345_vm2, %v4634_v23  ;;  %6412 = vmatpush3.bf16.msra.mxu0 %v6411_v2 }
0x101d   :  { %p6796_p6 = pnand %p6795_p5, %p6789_p2 }
0x10e7   :  { %v4704_v22 = vpop.f32.mrb[66].mxu1  ;;  %v4774_v28 = vpop.f32.mrb[72].mxu0 }
0x10e8   :  { %v4849_v34 = vadd.f32 %v4848_v25, %v4704_v22  ;;  %v6049_v59 = vpop.f32.mrb[67].mxu1  ;;  %v6060_v62 = vpop.f32.mrb[73].mxu0  ;;  %v4857_v31 = vadd.f32 %v4856_v3, %v4774_v28 }
0x10ea   :  { %v5121_v35 = vmul.f32 -1.442695, %v4849_v34  ;;  %v5122_v4 = vmul.f32 -1.442695, %v4857_v31 }
0x10ec   :  { %6580 = vpow2.f32 %v5121_v35 }
0x10ed   :  { %6582 = vpow2.f32 %v5122_v4 }
0x10ef   :  { %v4844_v5 = vpop.f32.mrb[68].mxu1 }
0x10f0   :  { %v6071_v6 = vpop.f32.mrb[69].mxu1  ;;  %v4845_v40 = vadd.f32 %v7653_v13, %v4844_v5 }
0x10f6   :  { %v6581_v38 = vpop.eup %6580 }
0x10f7   :  { %v4853_v39 = vadd.f32 1.0, %v6581_v38  ;;  %v6583_v37 = vpop.eup %6582 }
0x10f8   :  { %v4861_v16 = vadd.f32 1.0, %v6583_v37 }
0x10f9   :  { %6584 = vrcp.f32 %v4853_v39 }
0x10fa   :  { %6586 = vrcp.f32 %v4861_v16 }
0x1103   :  { %v6585_v41 = vpop.eup %6584 }
0x1104   :  { %v4865_v42 = vmul.f32 %v6585_v41, %v4845_v40  ;;  %v6587_v46 = vpop.eup %6586 }
0x1105   :  { %v4868_v29 = vsub.f32 1.0, %v6587_v46  ;;  %v4870_v45 = vmul.f32 %v6587_v46, %v4634_v23 }
0x1106   :  { %v4866_v44 = vadd.f32 %v4865_v42, %v4864_v43 }
0x1108   :  { %6588 = vtanh.f32 %v4866_v44 }
0x1112   :  { %v6589_v47 = vpop.eup %6588 }
0x1113   :  { %v4869_v49 = vmul.f32 %v6589_v47, %v4868_v29 }
0x1115   :  { %v4871_v50 = vadd.f32 %v4870_v45, %v4869_v49 }
0x1117   :  { %v4874_v51 = vmax.f32 %v4871_v50, 0.0  ;;  %4873 = vst.msk [vmem:[#allocation21 + $0x8] sm:$0xff] %vm345_vm2, %v4871_v50 }
0x1119   :  { %6081 = vmatmul.mubr.msk.f32.vlgmr.msra.gmra.mrb[74].mxu0 %vm345_vm2, %v4874_v51 }
0x111a   :  { %6799 = shalt.err (!%p6796_p6)
}
0x111b   :  { %s6800_s4 = scalar_lea.hbm %s7858_s25, 256 }
0x111c   :  { %p6801_p7 = scmp.ne.s32.totalorder %s7858_s25, %s6800_s4  ;;  %p6804_p8 = scmp.lt.u32.totalorder %s6800_s4, %s7858_s25 }
0x111e   :  { %p6806_p9 = pnand %p6804_p8, %p6801_p7 }
0x1120   :  { %6809 = shalt.err (!%p6806_p9)
}
0x1121   :  { %4974 = dma.vmem_to_hbm [thread:$0]  %s4969_s21, 256, %s7858_s25, [#allocation8], %s6824_s5, %s6824_s5, %s6825_s0   ;;  %v5123_v13 = vld [vmem:[#allocation20] ss:$0 sm:$0xff]  ;;  %vm4959_vm3 = vcmask 31744  }
0x1122   :  { %s7888_s18 = sld [smem:[#allocation38_spill]] }
0x11ec   :  { %v4955_v52 = vpop.f32.mrb[74].mxu0 }
0x11ed   :  { %v4956_v53 = vadd.f32 %v5123_v13, %v4955_v52  ;;  %v6082_v10 = vpop.f32.mrb[75].mxu0 }
0x11ef   :  { %4960 = vst.msk [vmem:[%s7888_s18] sm:$0xff] %vm4959_vm3, %v4956_v53 }
0x11f0   :  { %6820 = dma.done.wait [#allocation8], 256  }
0x11f1   :  { %6821 = vsyncadd [#allocation8], 4294967040 }
0x11f2   :  { %4980 = vsyncpa [#allocation7], 1 }
0x11f3   :  { %4981 = vsyncpa [#allocation10], 1 }
0x11f4   :  { %4982 = vsyncpa [#allocation13], 1 }
0x11f5   :  { %4983 = vsyncpa [#allocation16], 1 }
0x11f6   :  { %4984 = vsyncpa [#allocation19], 1 }
0x11f7   :  { %4985 = vsyncpa [#allocation8], 1 }

</bundles_post_ra>
